<compile_context>
chip_gen: v6e
topology: v6e:2x2x1
jax: 0.10.0
libtpu: 0.0.40
codegen_flags: <defaults>
</compile_context>

<pallas_src>
import functools

import jax
import jax.numpy as jnp
import numpy as np
from jax import lax
from jax.experimental import pallas as pl
from jax.experimental.pallas import tpu as pltpu


def _round_up(x, m):
    return (x + m - 1) // m * m


def _tap_offsets(hw_p, wp, base=0):
    """Flat lane offsets of the 27 taps of a 3x3x3 kernel (kd, kh, kw order)."""
    return tuple(base + kd * hw_p + kh * wp + kw
                 for kd in range(3) for kh in range(3) for kw in range(3))


# ------------------------------ Pallas kernel --------------------------------
def _double_conv_kernel(mask_ref, x_ref, w1_ref, w2_ref, o_ref,
                        xpad_ref, col1_ref, col2_ref, zbuf_ref, *,
                        cin, cout, k1, k2, lanes, taps1, taps2,
                        row_src, row_dst, w_len, z_off, inv_p):
    """Fused [conv3x3x3 -> InstanceNorm3d -> LeakyReLU] x2, one batch element.

    Layout: channels on sublanes, flattened zero-padded spatial on lanes.
      mask_ref : (1, L)       f32   1.0 at valid flat positions (d<D, h<H, w<W)
      x_ref    : (Cin, D*H*W) f32   compact input volume (no halo)
      w1_ref   : (Cout, K1p)  bf16  conv1 weight, tap-major, K padded to 16
      w2_ref   : (Cout, K2p)  bf16  conv2 weight, tap-major, K padded to 16
      o_ref    : (Cout, L)    f32   output at padded flat coords (lane dense)
      xpad_ref : (Cin, Lx)    bf16  zero-padded conv1 input slab   (scratch)
      col*_ref : (K*p, L)     bf16  in-kernel im2col column matrix (scratch)
      zbuf_ref : (Cout, Lz)   bf16  zero-padded conv2 input slab   (scratch)
    """
    # One-time scratch init: halo lanes and K-pad tail rows are written here
    # and never touched again; interiors are fully overwritten every grid step.
    # Requires sequential grid semantics ("arbitrary") so scratch persistence
    # holds on every TensorCore.
    @pl.when(pl.program_id(0) == 0)
    def _init_scratch():
        xpad_ref[...] = jnp.zeros_like(xpad_ref)
        zbuf_ref[...] = jnp.zeros_like(zbuf_ref)
        if col1_ref.shape[0] > k1:
            col1_ref[k1:, :] = jnp.zeros((col1_ref.shape[0] - k1, lanes),
                                         col1_ref.dtype)
        if col2_ref.shape[0] > k2:
            col2_ref[k2:, :] = jnp.zeros((col2_ref.shape[0] - k2, lanes),
                                         col2_ref.dtype)

    mask = mask_ref[...]                                       # (1, L) f32

    # Scatter the compact input rows into the zero-padded bf16 slab:
    # valid voxel (d,h,w) -> padded flat coordinate (d+1)*Hp*Wp + (h+1)*Wp + (w+1).
    # The halo ring stays zero from the one-time init above.
    for src, dst in zip(row_src, row_dst):
        xpad_ref[:, dst:dst + w_len] = (
            x_ref[:, src:src + w_len].astype(xpad_ref.dtype))

    def conv_in_lrelu(src_ref, taps, col_ref, w_ref, cch):
        # Build the (K, L) bf16 column matrix: each 3x3x3 tap is a contiguous
        # lane-slice of the flattened zero-padded slab (no HBM im2col blowup).
        for t, off in enumerate(taps):
            col_ref[t * cch:(t + 1) * cch, :] = src_ref[:, off:off + lanes]
        # Single bf16 MXU matmul with f32 accumulation; L (multiple of 128) is
        # the lane axis.  The result is consumed in-register; only the final
        # normalized tile is stored by the caller (no extra (Cout, L) passes).
        y = jnp.dot(w_ref[...], col_ref[...],
                    preferred_element_type=jnp.float32)        # (Cout, L) f32
        # InstanceNorm3d (affine=False, biased var, eps=1e-5) over the valid
        # positions only; two-pass (subtract-mean-then-square) form in f32.
        mean = jnp.sum(y * mask, axis=1, keepdims=True) * inv_p
        yc = y - mean
        ycm = yc * mask
        var = jnp.sum(ycm * ycm, axis=1, keepdims=True) * inv_p
        z = yc * lax.rsqrt(var + 1e-5)
        return jnp.where(z > 0.0, z, 0.01 * z)                 # LeakyReLU(0.01)

    # ---- block 1 (conv bias dropped: cancelled exactly by the IN mean sub) --
    z1 = conv_in_lrelu(xpad_ref, taps1, col1_ref, w1_ref, cin)

    # Re-embed z1 as conv2's zero-padded input: valid voxel moves to padded
    # coordinate (+1,+1,+1).  The store offset z_off is lane-aligned; conv2's
    # tap offsets absorb the difference (taps2 = z_off - shift + taps1).  The
    # mask multiply keeps the halo ring and round-up tail lanes exactly zero.
    zbuf_ref[:, z_off:z_off + lanes] = (z1 * mask).astype(zbuf_ref.dtype)

    # ---- block 2 ------------------------------------------------------------
    z2 = conv_in_lrelu(zbuf_ref, taps2, col2_ref, w2_ref, cout)

    # TODO(synk): Dropout(p=0.5) is identity in eval mode; training-mode RNG
    # dropout intentionally not reproduced.
    o_ref[...] = z2


# --------------------------------- wrapper -----------------------------------
@jax.jit
def inconv_forward(x_ncdhw, w1, b1, w2, b2):
    """inconv.forward — input/output in PyTorch NCDHW layout (float32).

    Valid for eval mode (Dropout identity) with InstanceNorm3d affine=False
    (the conv biases cancel against the IN mean subtraction).
    """
    n, cin, d, h, w = x_ncdhw.shape
    cout = w1.shape[0]
    hp, wp = h + 2, w + 2
    hw_p = hp * wp
    dhw = d * h * w

    lanes = _round_up(d * hw_p, 128)            # compute width (padded flat coords)
    max_off = 2 * hw_p + 2 * wp + 2             # largest 3x3x3 tap offset
    shift = hw_p + wp + 1                       # (+1,+1,+1) in padded flat coords
    z_off = _round_up(shift, 128)               # lane-aligned store offset for z1
    lx = _round_up(lanes + max_off, 128)        # conv1 padded-slab length
    lz = _round_up(z_off - shift + max_off + lanes, 128)
    k1, k2 = 27 * cin, 27 * cout
    k1p, k2p = _round_up(k1, 16), _round_up(k2, 16)   # bf16 sublane granule only
    taps1 = _tap_offsets(hw_p, wp)
    taps2 = _tap_offsets(hw_p, wp, base=z_off - shift)
    row_src = tuple((dd * h + hh) * w for dd in range(d) for hh in range(h))
    row_dst = tuple((dd + 1) * hw_p + (hh + 1) * wp + 1
                    for dd in range(d) for hh in range(h))

    # Compact channels-first input: a free reshape, no XLA padding pass.
    xc = x_ncdhw.astype(jnp.float32).reshape(n, cin, dhw)

    # Validity mask over flat padded coordinates (static, trace-time constant).
    idx = np.arange(lanes)
    valid = ((idx % wp) < w) & (((idx // wp) % hp) < h) & ((idx // hw_p) < d)
    mask = jnp.asarray(valid.astype(np.float32)).reshape(1, lanes)

    def wmat(wt, c, kp):
        # (Cout, Cin, kd, kh, kw) -> (Cout, 27*Cin), tap-major, K-pad, bf16.
        m = jnp.transpose(wt, (0, 2, 3, 4, 1)).reshape(cout, 27 * c)
        m = jnp.pad(m.astype(jnp.float32), ((0, 0), (0, kp - 27 * c)))
        return m.astype(jnp.bfloat16)
    w1m, w2m = wmat(w1, cin, k1p), wmat(w2, cout, k2p)
    # b1/b2 intentionally unused: cancelled exactly by the IN mean subtraction.
    del b1, b2

    kernel = functools.partial(
        _double_conv_kernel, cin=cin, cout=cout, k1=k1, k2=k2, lanes=lanes,
        taps1=taps1, taps2=taps2, row_src=row_src, row_dst=row_dst, w_len=w,
        z_off=z_off, inv_p=1.0 / float(dhw))

    # Explicit scoped-VMEM budget: bf16 scratch + double-buffered in/out blocks
    # + headroom for the f32 (Cout, L) temporaries; clamped to fit every gen.
    est = 2 * (cin * lx + k1p * lanes + k2p * lanes + cout * lz)      # bf16 scratch
    est += 2 * (cin * dhw * 4 + lanes * 4 + 2 * cout * (k1p + k2p)
                + cout * lanes * 4)                                   # i/o blocks
    est += 6 * cout * lanes * 4                                       # f32 temps
    vmem_limit = int(min(max(2 * est, 32 << 20), 48 << 20))

    out = pl.pallas_call(
        kernel,
        out_shape=jax.ShapeDtypeStruct((n, cout, lanes), jnp.float32),
        grid=(n,),
        in_specs=[
            pl.BlockSpec((1, lanes), lambda i: (0, 0)),            # mask
            pl.BlockSpec((None, cin, dhw), lambda i: (i, 0, 0)),   # x, per batch
            pl.BlockSpec((cout, k1p), lambda i: (0, 0)),           # w1
            pl.BlockSpec((cout, k2p), lambda i: (0, 0)),           # w2
        ],
        out_specs=pl.BlockSpec((None, cout, lanes), lambda i: (i, 0, 0)),
        scratch_shapes=[
            pltpu.VMEM((cin, lx), jnp.bfloat16),     # zero-padded conv1 input
            pltpu.VMEM((k1p, lanes), jnp.bfloat16),  # col1 (in-kernel im2col)
            pltpu.VMEM((k2p, lanes), jnp.bfloat16),  # col2
            pltpu.VMEM((cout, lz), jnp.bfloat16),    # zero-padded conv2 input
        ],
        # "arbitrary": grid must run sequentially so the program_id==0 scratch
        # init (hoisted zero-fills) is seen by every later step on every core.
        # TODO(synk): once the spatial axis is tiled into the grid, mark that
        # axis "parallel" so both v7x TensorCores stay busy for small N.
        compiler_params=pltpu.CompilerParams(
            dimension_semantics=("arbitrary",),
            vmem_limit_bytes=vmem_limit),
    )(mask, xc, w1m, w2m)

    # Strip padded coordinates: (N, Cout, D*Hp*Wp) -> (N, Cout, D, H, W).
    # TODO(synk): in a fused pipeline, keep the lane-dense padded layout for
    # the next op to avoid this strided unpad pass.
    out = out[:, :, :d * hw_p].reshape(n, cout, d, hp, wp)[:, :, :, :h, :w]
    return out


# ----------------------------- pure-JAX reference ----------------------------
def _reference(x_ncdhw, w1, b1, w2, b2, cast_bf16=False):
    """Faithful double_conv forward. cast_bf16=True mirrors the kernel's bf16
    MXU operands (f32 accumulation), isolating kernel logic from bf16 rounding."""
    cast = (lambda a: a.astype(jnp.bfloat16)) if cast_bf16 else (lambda a: a)

    def block(x, wt, b):
        y = lax.conv_general_dilated(
            cast(x), cast(jnp.transpose(wt, (2, 3, 4, 1, 0))),
            window_strides=(1, 1, 1), padding=((1, 1), (1, 1), (1, 1)),
            dimension_numbers=("NDHWC", "DHWIO", "NDHWC"),
            preferred_element_type=jnp.float32)
        y = y + b.reshape(1, 1, 1, 1, -1)
        mean = jnp.mean(y, axis=(1, 2, 3), keepdims=True)
        var = jnp.mean((y - mean) ** 2, axis=(1, 2, 3), keepdims=True)
        y = (y - mean) / jnp.sqrt(var + 1e-5)
        return jnp.where(y > 0, y, 0.01 * y)

    x = jnp.transpose(x_ncdhw, (0, 2, 3, 4, 1))
    x = block(x, w1, b1)
    x = block(x, w2, b2)
    return jnp.transpose(x, (0, 4, 1, 2, 3))


# ------------------------------------ main ------------------------------------
if __name__ == "__main__":
    def run_case(key, n, in_ch, out_ch, d, h, w):
        k_x, k_w1, k_b1, k_w2, k_b2 = jax.random.split(key, 5)
        x = jax.random.normal(k_x, (n, in_ch, d, h, w), dtype=jnp.float32)
        # PyTorch Conv3d default init: U(-s, s), s = 1/sqrt(fan_in)
        s1 = 1.0 / np.sqrt(in_ch * 27)
        w1 = jax.random.uniform(k_w1, (out_ch, in_ch, 3, 3, 3), jnp.float32, -s1, s1)
        b1 = jax.random.uniform(k_b1, (out_ch,), jnp.float32, -s1, s1)
        s2 = 1.0 / np.sqrt(out_ch * 27)
        w2 = jax.random.uniform(k_w2, (out_ch, out_ch, 3, 3, 3), jnp.float32, -s2, s2)
        b2 = jax.random.uniform(k_b2, (out_ch,), jnp.float32, -s2, s2)

        out = jax.block_until_ready(inconv_forward(x, w1, b1, w2, b2))
        assert out.shape == (n, out_ch, d, h, w), out.shape

        # Tight check vs. a reference that also uses bf16 MXU operands
        # (validates the kernel logic; same rounding as the kernel).
        ref_bf16 = jax.block_until_ready(
            _reference(x, w1, b1, w2, b2, cast_bf16=True))
        np.testing.assert_allclose(np.asarray(out), np.asarray(ref_bf16),
                                   rtol=5e-3, atol=5e-3)
        # Looser check vs. the exact f32 PyTorch-equivalent math (documents the
        # accuracy cost of the intentional bf16 operand cast).
        ref_f32 = jax.block_until_ready(
            _reference(x, w1, b1, w2, b2, cast_bf16=False))
        np.testing.assert_allclose(np.asarray(out), np.asarray(ref_f32),
                                   rtol=2e-2, atol=2e-2)

    root = jax.random.PRNGKey(0)
    key_a, key_b = jax.random.split(root)
    run_case(key_a, n=2, in_ch=4, out_ch=8, d=8, h=8, w=8)    # small cubic volume
    run_case(key_b, n=1, in_ch=4, out_ch=8, d=6, h=8, w=10)   # non-cubic strides
    print("KERNEL_OK")
</pallas_src>

<mosaic_0001>
module attributes {stable_mosaic.version = 11 : i64} {
  func.func @_double_conv_kernel(%arg0: i32, %arg1: memref<1x896xf32, #tpu.memory_space<vmem>>, %arg2: memref<1x4x512xf32, #tpu.memory_space<vmem>>, %arg3: memref<8x112xbf16, #tpu.memory_space<vmem>>, %arg4: memref<8x224xbf16, #tpu.memory_space<vmem>>, %arg5: memref<1x8x896xf32, #tpu.memory_space<vmem>>, %arg6: memref<4x1152xbf16, #tpu.memory_space<vmem>>, %arg7: memref<112x896xbf16, #tpu.memory_space<vmem>>, %arg8: memref<224x896xbf16, #tpu.memory_space<vmem>>, %arg9: memref<8x1152xbf16, #tpu.memory_space<vmem>>) attributes {dimension_semantics = [#tpu.dimension_semantics<arbitrary>], iteration_bounds = array<i64: 2>, scalar_prefetch = 0 : i64, scratch_operands = 4 : i64, tpu.core_type = #tpu.core_type<tc>, window_params = [{pipeline_mode = #tpu.pipeline_mode<synchronous>, transform_indices = @transform_0, window_bounds = array<i64: 1, 896>}, {transform_indices = @transform_1, window_bounds = array<i64: 1, 4, 512>}, {pipeline_mode = #tpu.pipeline_mode<synchronous>, transform_indices = @transform_2, window_bounds = array<i64: 8, 112>}, {pipeline_mode = #tpu.pipeline_mode<synchronous>, transform_indices = @transform_3, window_bounds = array<i64: 8, 224>}, {transform_indices = @transform_4, window_bounds = array<i64: 1, 8, 896>}]} {
    %c0_i32 = arith.constant 0 : i32
    %0 = arith.cmpi eq, %arg0, %c0_i32 : i32
    %1 = arith.extui %0 : i1 to i32
    %c0_i32_0 = arith.constant 0 : i32
    %2 = arith.cmpi ne, %1, %c0_i32_0 : i32
    scf.if %2 {
      %cst_385 = arith.constant 0.000000e+00 : bf16
      %431 = vector.broadcast %cst_385 : bf16 to vector<4x1152xbf16>
      %c0_386 = arith.constant 0 : index
      %c0_387 = arith.constant 0 : index
      %432 = vector.load %arg6[%c0_386, %c0_387] : memref<4x1152xbf16, #tpu.memory_space<vmem>>, vector<4x1152xbf16>
      tpu.vector_store %arg6[%c0_386, %c0_387], %431 {strides = array<i32>} : memref<4x1152xbf16, #tpu.memory_space<vmem>>, vector<4x1152xbf16>,
      %cst_388 = arith.constant 0.000000e+00 : bf16
      %433 = vector.broadcast %cst_388 : bf16 to vector<8x1152xbf16>
      %c0_389 = arith.constant 0 : index
      %c0_390 = arith.constant 0 : index
      %434 = vector.load %arg9[%c0_389, %c0_390] : memref<8x1152xbf16, #tpu.memory_space<vmem>>, vector<8x1152xbf16>
      tpu.vector_store %arg9[%c0_389, %c0_390], %433 {strides = array<i32>} : memref<8x1152xbf16, #tpu.memory_space<vmem>>, vector<8x1152xbf16>,
      %cst_391 = arith.constant 0.000000e+00 : bf16
      %435 = vector.broadcast %cst_391 : bf16 to vector<4x896xbf16>
      %c108 = arith.constant 108 : index
      %c0_392 = arith.constant 0 : index
      %436 = vector.load %arg7[%c108, %c0_392] : memref<112x896xbf16, #tpu.memory_space<vmem>>, vector<4x896xbf16>
      tpu.vector_store %arg7[%c108, %c0_392], %435 {strides = array<i32>} : memref<112x896xbf16, #tpu.memory_space<vmem>>, vector<4x896xbf16>,
      %cst_393 = arith.constant 0.000000e+00 : bf16
      %437 = vector.broadcast %cst_393 : bf16 to vector<8x896xbf16>
      %c216_394 = arith.constant 216 : index
      %c0_395 = arith.constant 0 : index
      %438 = vector.load %arg8[%c216_394, %c0_395] : memref<224x896xbf16, #tpu.memory_space<vmem>>, vector<8x896xbf16>
      tpu.vector_store %arg8[%c216_394, %c0_395], %437 {strides = array<i32>} : memref<224x896xbf16, #tpu.memory_space<vmem>>, vector<8x896xbf16>,
    } else {
    }
    %c0 = arith.constant 0 : index
    %c0_1 = arith.constant 0 : index
    %3 = vector.load %arg1[%c0, %c0_1] : memref<1x896xf32, #tpu.memory_space<vmem>>, vector<1x896xf32>
    %c0_2 = arith.constant 0 : index
    %c0_3 = arith.constant 0 : index
    %c0_4 = arith.constant 0 : index
    %4 = vector.load %arg2[%c0_2, %c0_3, %c0_4] : memref<1x4x512xf32, #tpu.memory_space<vmem>>, vector<1x4x8xf32>
    %5 = vector.shape_cast %4 : vector<1x4x8xf32> to vector<4x8xf32>
    %6 = arith.truncf %5 : vector<4x8xf32> to vector<4x8xbf16>
    %c0_5 = arith.constant 0 : index
    %c111 = arith.constant 111 : index
    %7 = vector.load %arg6[%c0_5, %c111] : memref<4x1152xbf16, #tpu.memory_space<vmem>>, vector<4x8xbf16>
    tpu.vector_store %arg6[%c0_5, %c111], %6 {strides = array<i32>} : memref<4x1152xbf16, #tpu.memory_space<vmem>>, vector<4x8xbf16>,
    %c0_6 = arith.constant 0 : index
    %c0_7 = arith.constant 0 : index
    %c8 = arith.constant 8 : index
    %8 = vector.load %arg2[%c0_6, %c0_7, %c8] : memref<1x4x512xf32, #tpu.memory_space<vmem>>, vector<1x4x8xf32>
    %9 = vector.shape_cast %8 : vector<1x4x8xf32> to vector<4x8xf32>
    %10 = arith.truncf %9 : vector<4x8xf32> to vector<4x8xbf16>
    %c0_8 = arith.constant 0 : index
    %c121 = arith.constant 121 : index
    %11 = vector.load %arg6[%c0_8, %c121] : memref<4x1152xbf16, #tpu.memory_space<vmem>>, vector<4x8xbf16>
    tpu.vector_store %arg6[%c0_8, %c121], %10 {strides = array<i32>} : memref<4x1152xbf16, #tpu.memory_space<vmem>>, vector<4x8xbf16>,
    %c0_9 = arith.constant 0 : index
    %c0_10 = arith.constant 0 : index
    %c16 = arith.constant 16 : index
    %12 = vector.load %arg2[%c0_9, %c0_10, %c16] : memref<1x4x512xf32, #tpu.memory_space<vmem>>, vector<1x4x8xf32>
    %13 = vector.shape_cast %12 : vector<1x4x8xf32> to vector<4x8xf32>
    %14 = arith.truncf %13 : vector<4x8xf32> to vector<4x8xbf16>
    %c0_11 = arith.constant 0 : index
    %c131 = arith.constant 131 : index
    %15 = vector.load %arg6[%c0_11, %c131] : memref<4x1152xbf16, #tpu.memory_space<vmem>>, vector<4x8xbf16>
    tpu.vector_store %arg6[%c0_11, %c131], %14 {strides = array<i32>} : memref<4x1152xbf16, #tpu.memory_space<vmem>>, vector<4x8xbf16>,
    %c0_12 = arith.constant 0 : index
    %c0_13 = arith.constant 0 : index
    %c24 = arith.constant 24 : index
    %16 = vector.load %arg2[%c0_12, %c0_13, %c24] : memref<1x4x512xf32, #tpu.memory_space<vmem>>, vector<1x4x8xf32>
    %17 = vector.shape_cast %16 : vector<1x4x8xf32> to vector<4x8xf32>
    %18 = arith.truncf %17 : vector<4x8xf32> to vector<4x8xbf16>
    %c0_14 = arith.constant 0 : index
    %c141 = arith.constant 141 : index
    %19 = vector.load %arg6[%c0_14, %c141] : memref<4x1152xbf16, #tpu.memory_space<vmem>>, vector<4x8xbf16>
    tpu.vector_store %arg6[%c0_14, %c141], %18 {strides = array<i32>} : memref<4x1152xbf16, #tpu.memory_space<vmem>>, vector<4x8xbf16>,
    %c0_15 = arith.constant 0 : index
    %c0_16 = arith.constant 0 : index
    %c32 = arith.constant 32 : index
    %20 = vector.load %arg2[%c0_15, %c0_16, %c32] : memref<1x4x512xf32, #tpu.memory_space<vmem>>, vector<1x4x8xf32>
    %21 = vector.shape_cast %20 : vector<1x4x8xf32> to vector<4x8xf32>
    %22 = arith.truncf %21 : vector<4x8xf32> to vector<4x8xbf16>
    %c0_17 = arith.constant 0 : index
    %c151 = arith.constant 151 : index
    %23 = vector.load %arg6[%c0_17, %c151] : memref<4x1152xbf16, #tpu.memory_space<vmem>>, vector<4x8xbf16>
    tpu.vector_store %arg6[%c0_17, %c151], %22 {strides = array<i32>} : memref<4x1152xbf16, #tpu.memory_space<vmem>>, vector<4x8xbf16>,
    %c0_18 = arith.constant 0 : index
    %c0_19 = arith.constant 0 : index
    %c40 = arith.constant 40 : index
    %24 = vector.load %arg2[%c0_18, %c0_19, %c40] : memref<1x4x512xf32, #tpu.memory_space<vmem>>, vector<1x4x8xf32>
    %25 = vector.shape_cast %24 : vector<1x4x8xf32> to vector<4x8xf32>
    %26 = arith.truncf %25 : vector<4x8xf32> to vector<4x8xbf16>
    %c0_20 = arith.constant 0 : index
    %c161 = arith.constant 161 : index
    %27 = vector.load %arg6[%c0_20, %c161] : memref<4x1152xbf16, #tpu.memory_space<vmem>>, vector<4x8xbf16>
    tpu.vector_store %arg6[%c0_20, %c161], %26 {strides = array<i32>} : memref<4x1152xbf16, #tpu.memory_space<vmem>>, vector<4x8xbf16>,
    %c0_21 = arith.constant 0 : index
    %c0_22 = arith.constant 0 : index
    %c48 = arith.constant 48 : index
    %28 = vector.load %arg2[%c0_21, %c0_22, %c48] : memref<1x4x512xf32, #tpu.memory_space<vmem>>, vector<1x4x8xf32>
    %29 = vector.shape_cast %28 : vector<1x4x8xf32> to vector<4x8xf32>
    %30 = arith.truncf %29 : vector<4x8xf32> to vector<4x8xbf16>
    %c0_23 = arith.constant 0 : index
    %c171 = arith.constant 171 : index
    %31 = vector.load %arg6[%c0_23, %c171] : memref<4x1152xbf16, #tpu.memory_space<vmem>>, vector<4x8xbf16>
    tpu.vector_store %arg6[%c0_23, %c171], %30 {strides = array<i32>} : memref<4x1152xbf16, #tpu.memory_space<vmem>>, vector<4x8xbf16>,
    %c0_24 = arith.constant 0 : index
    %c0_25 = arith.constant 0 : index
    %c56 = arith.constant 56 : index
    %32 = vector.load %arg2[%c0_24, %c0_25, %c56] : memref<1x4x512xf32, #tpu.memory_space<vmem>>, vector<1x4x8xf32>
    %33 = vector.shape_cast %32 : vector<1x4x8xf32> to vector<4x8xf32>
    %34 = arith.truncf %33 : vector<4x8xf32> to vector<4x8xbf16>
    %c0_26 = arith.constant 0 : index
    %c181 = arith.constant 181 : index
    %35 = vector.load %arg6[%c0_26, %c181] : memref<4x1152xbf16, #tpu.memory_space<vmem>>, vector<4x8xbf16>
    tpu.vector_store %arg6[%c0_26, %c181], %34 {strides = array<i32>} : memref<4x1152xbf16, #tpu.memory_space<vmem>>, vector<4x8xbf16>,
    %c0_27 = arith.constant 0 : index
    %c0_28 = arith.constant 0 : index
    %c64 = arith.constant 64 : index
    %36 = vector.load %arg2[%c0_27, %c0_28, %c64] : memref<1x4x512xf32, #tpu.memory_space<vmem>>, vector<1x4x8xf32>
    %37 = vector.shape_cast %36 : vector<1x4x8xf32> to vector<4x8xf32>
    %38 = arith.truncf %37 : vector<4x8xf32> to vector<4x8xbf16>
    %c0_29 = arith.constant 0 : index
    %c211 = arith.constant 211 : index
    %39 = vector.load %arg6[%c0_29, %c211] : memref<4x1152xbf16, #tpu.memory_space<vmem>>, vector<4x8xbf16>
    tpu.vector_store %arg6[%c0_29, %c211], %38 {strides = array<i32>} : memref<4x1152xbf16, #tpu.memory_space<vmem>>, vector<4x8xbf16>,
    %c0_30 = arith.constant 0 : index
    %c0_31 = arith.constant 0 : index
    %c72 = arith.constant 72 : index
    %40 = vector.load %arg2[%c0_30, %c0_31, %c72] : memref<1x4x512xf32, #tpu.memory_space<vmem>>, vector<1x4x8xf32>
    %41 = vector.shape_cast %40 : vector<1x4x8xf32> to vector<4x8xf32>
    %42 = arith.truncf %41 : vector<4x8xf32> to vector<4x8xbf16>
    %c0_32 = arith.constant 0 : index
    %c221 = arith.constant 221 : index
    %43 = vector.load %arg6[%c0_32, %c221] : memref<4x1152xbf16, #tpu.memory_space<vmem>>, vector<4x8xbf16>
    tpu.vector_store %arg6[%c0_32, %c221], %42 {strides = array<i32>} : memref<4x1152xbf16, #tpu.memory_space<vmem>>, vector<4x8xbf16>,
    %c0_33 = arith.constant 0 : index
    %c0_34 = arith.constant 0 : index
    %c80 = arith.constant 80 : index
    %44 = vector.load %arg2[%c0_33, %c0_34, %c80] : memref<1x4x512xf32, #tpu.memory_space<vmem>>, vector<1x4x8xf32>
    %45 = vector.shape_cast %44 : vector<1x4x8xf32> to vector<4x8xf32>
    %46 = arith.truncf %45 : vector<4x8xf32> to vector<4x8xbf16>
    %c0_35 = arith.constant 0 : index
    %c231 = arith.constant 231 : index
    %47 = vector.load %arg6[%c0_35, %c231] : memref<4x1152xbf16, #tpu.memory_space<vmem>>, vector<4x8xbf16>
    tpu.vector_store %arg6[%c0_35, %c231], %46 {strides = array<i32>} : memref<4x1152xbf16, #tpu.memory_space<vmem>>, vector<4x8xbf16>,
    %c0_36 = arith.constant 0 : index
    %c0_37 = arith.constant 0 : index
    %c88 = arith.constant 88 : index
    %48 = vector.load %arg2[%c0_36, %c0_37, %c88] : memref<1x4x512xf32, #tpu.memory_space<vmem>>, vector<1x4x8xf32>
    %49 = vector.shape_cast %48 : vector<1x4x8xf32> to vector<4x8xf32>
    %50 = arith.truncf %49 : vector<4x8xf32> to vector<4x8xbf16>
    %c0_38 = arith.constant 0 : index
    %c241 = arith.constant 241 : index
    %51 = vector.load %arg6[%c0_38, %c241] : memref<4x1152xbf16, #tpu.memory_space<vmem>>, vector<4x8xbf16>
    tpu.vector_store %arg6[%c0_38, %c241], %50 {strides = array<i32>} : memref<4x1152xbf16, #tpu.memory_space<vmem>>, vector<4x8xbf16>,
    %c0_39 = arith.constant 0 : index
    %c0_40 = arith.constant 0 : index
    %c96 = arith.constant 96 : index
    %52 = vector.load %arg2[%c0_39, %c0_40, %c96] : memref<1x4x512xf32, #tpu.memory_space<vmem>>, vector<1x4x8xf32>
    %53 = vector.shape_cast %52 : vector<1x4x8xf32> to vector<4x8xf32>
    %54 = arith.truncf %53 : vector<4x8xf32> to vector<4x8xbf16>
    %c0_41 = arith.constant 0 : index
    %c251 = arith.constant 251 : index
    %55 = vector.load %arg6[%c0_41, %c251] : memref<4x1152xbf16, #tpu.memory_space<vmem>>, vector<4x8xbf16>
    tpu.vector_store %arg6[%c0_41, %c251], %54 {strides = array<i32>} : memref<4x1152xbf16, #tpu.memory_space<vmem>>, vector<4x8xbf16>,
    %c0_42 = arith.constant 0 : index
    %c0_43 = arith.constant 0 : index
    %c104 = arith.constant 104 : index
    %56 = vector.load %arg2[%c0_42, %c0_43, %c104] : memref<1x4x512xf32, #tpu.memory_space<vmem>>, vector<1x4x8xf32>
    %57 = vector.shape_cast %56 : vector<1x4x8xf32> to vector<4x8xf32>
    %58 = arith.truncf %57 : vector<4x8xf32> to vector<4x8xbf16>
    %c0_44 = arith.constant 0 : index
    %c261 = arith.constant 261 : index
    %59 = vector.load %arg6[%c0_44, %c261] : memref<4x1152xbf16, #tpu.memory_space<vmem>>, vector<4x8xbf16>
    tpu.vector_store %arg6[%c0_44, %c261], %58 {strides = array<i32>} : memref<4x1152xbf16, #tpu.memory_space<vmem>>, vector<4x8xbf16>,
    %c0_45 = arith.constant 0 : index
    %c0_46 = arith.constant 0 : index
    %c112 = arith.constant 112 : index
    %60 = vector.load %arg2[%c0_45, %c0_46, %c112] : memref<1x4x512xf32, #tpu.memory_space<vmem>>, vector<1x4x8xf32>
    %61 = vector.shape_cast %60 : vector<1x4x8xf32> to vector<4x8xf32>
    %62 = arith.truncf %61 : vector<4x8xf32> to vector<4x8xbf16>
    %c0_47 = arith.constant 0 : index
    %c271 = arith.constant 271 : index
    %63 = vector.load %arg6[%c0_47, %c271] : memref<4x1152xbf16, #tpu.memory_space<vmem>>, vector<4x8xbf16>
    tpu.vector_store %arg6[%c0_47, %c271], %62 {strides = array<i32>} : memref<4x1152xbf16, #tpu.memory_space<vmem>>, vector<4x8xbf16>,
    %c0_48 = arith.constant 0 : index
    %c0_49 = arith.constant 0 : index
    %c120 = arith.constant 120 : index
    %64 = vector.load %arg2[%c0_48, %c0_49, %c120] : memref<1x4x512xf32, #tpu.memory_space<vmem>>, vector<1x4x8xf32>
    %65 = vector.shape_cast %64 : vector<1x4x8xf32> to vector<4x8xf32>
    %66 = arith.truncf %65 : vector<4x8xf32> to vector<4x8xbf16>
    %c0_50 = arith.constant 0 : index
    %c281 = arith.constant 281 : index
    %67 = vector.load %arg6[%c0_50, %c281] : memref<4x1152xbf16, #tpu.memory_space<vmem>>, vector<4x8xbf16>
    tpu.vector_store %arg6[%c0_50, %c281], %66 {strides = array<i32>} : memref<4x1152xbf16, #tpu.memory_space<vmem>>, vector<4x8xbf16>,
    %c0_51 = arith.constant 0 : index
    %c0_52 = arith.constant 0 : index
    %c128 = arith.constant 128 : index
    %68 = vector.load %arg2[%c0_51, %c0_52, %c128] : memref<1x4x512xf32, #tpu.memory_space<vmem>>, vector<1x4x8xf32>
    %69 = vector.shape_cast %68 : vector<1x4x8xf32> to vector<4x8xf32>
    %70 = arith.truncf %69 : vector<4x8xf32> to vector<4x8xbf16>
    %c0_53 = arith.constant 0 : index
    %c311 = arith.constant 311 : index
    %71 = vector.load %arg6[%c0_53, %c311] : memref<4x1152xbf16, #tpu.memory_space<vmem>>, vector<4x8xbf16>
    tpu.vector_store %arg6[%c0_53, %c311], %70 {strides = array<i32>} : memref<4x1152xbf16, #tpu.memory_space<vmem>>, vector<4x8xbf16>,
    %c0_54 = arith.constant 0 : index
    %c0_55 = arith.constant 0 : index
    %c136 = arith.constant 136 : index
    %72 = vector.load %arg2[%c0_54, %c0_55, %c136] : memref<1x4x512xf32, #tpu.memory_space<vmem>>, vector<1x4x8xf32>
    %73 = vector.shape_cast %72 : vector<1x4x8xf32> to vector<4x8xf32>
    %74 = arith.truncf %73 : vector<4x8xf32> to vector<4x8xbf16>
    %c0_56 = arith.constant 0 : index
    %c321 = arith.constant 321 : index
    %75 = vector.load %arg6[%c0_56, %c321] : memref<4x1152xbf16, #tpu.memory_space<vmem>>, vector<4x8xbf16>
    tpu.vector_store %arg6[%c0_56, %c321], %74 {strides = array<i32>} : memref<4x1152xbf16, #tpu.memory_space<vmem>>, vector<4x8xbf16>,
    %c0_57 = arith.constant 0 : index
    %c0_58 = arith.constant 0 : index
    %c144 = arith.constant 144 : index
    %76 = vector.load %arg2[%c0_57, %c0_58, %c144] : memref<1x4x512xf32, #tpu.memory_space<vmem>>, vector<1x4x8xf32>
    %77 = vector.shape_cast %76 : vector<1x4x8xf32> to vector<4x8xf32>
    %78 = arith.truncf %77 : vector<4x8xf32> to vector<4x8xbf16>
    %c0_59 = arith.constant 0 : index
    %c331 = arith.constant 331 : index
    %79 = vector.load %arg6[%c0_59, %c331] : memref<4x1152xbf16, #tpu.memory_space<vmem>>, vector<4x8xbf16>
    tpu.vector_store %arg6[%c0_59, %c331], %78 {strides = array<i32>} : memref<4x1152xbf16, #tpu.memory_space<vmem>>, vector<4x8xbf16>,
    %c0_60 = arith.constant 0 : index
    %c0_61 = arith.constant 0 : index
    %c152 = arith.constant 152 : index
    %80 = vector.load %arg2[%c0_60, %c0_61, %c152] : memref<1x4x512xf32, #tpu.memory_space<vmem>>, vector<1x4x8xf32>
    %81 = vector.shape_cast %80 : vector<1x4x8xf32> to vector<4x8xf32>
    %82 = arith.truncf %81 : vector<4x8xf32> to vector<4x8xbf16>
    %c0_62 = arith.constant 0 : index
    %c341 = arith.constant 341 : index
    %83 = vector.load %arg6[%c0_62, %c341] : memref<4x1152xbf16, #tpu.memory_space<vmem>>, vector<4x8xbf16>
    tpu.vector_store %arg6[%c0_62, %c341], %82 {strides = array<i32>} : memref<4x1152xbf16, #tpu.memory_space<vmem>>, vector<4x8xbf16>,
    %c0_63 = arith.constant 0 : index
    %c0_64 = arith.constant 0 : index
    %c160 = arith.constant 160 : index
    %84 = vector.load %arg2[%c0_63, %c0_64, %c160] : memref<1x4x512xf32, #tpu.memory_space<vmem>>, vector<1x4x8xf32>
    %85 = vector.shape_cast %84 : vector<1x4x8xf32> to vector<4x8xf32>
    %86 = arith.truncf %85 : vector<4x8xf32> to vector<4x8xbf16>
    %c0_65 = arith.constant 0 : index
    %c351 = arith.constant 351 : index
    %87 = vector.load %arg6[%c0_65, %c351] : memref<4x1152xbf16, #tpu.memory_space<vmem>>, vector<4x8xbf16>
    tpu.vector_store %arg6[%c0_65, %c351], %86 {strides = array<i32>} : memref<4x1152xbf16, #tpu.memory_space<vmem>>, vector<4x8xbf16>,
    %c0_66 = arith.constant 0 : index
    %c0_67 = arith.constant 0 : index
    %c168 = arith.constant 168 : index
    %88 = vector.load %arg2[%c0_66, %c0_67, %c168] : memref<1x4x512xf32, #tpu.memory_space<vmem>>, vector<1x4x8xf32>
    %89 = vector.shape_cast %88 : vector<1x4x8xf32> to vector<4x8xf32>
    %90 = arith.truncf %89 : vector<4x8xf32> to vector<4x8xbf16>
    %c0_68 = arith.constant 0 : index
    %c361 = arith.constant 361 : index
    %91 = vector.load %arg6[%c0_68, %c361] : memref<4x1152xbf16, #tpu.memory_space<vmem>>, vector<4x8xbf16>
    tpu.vector_store %arg6[%c0_68, %c361], %90 {strides = array<i32>} : memref<4x1152xbf16, #tpu.memory_space<vmem>>, vector<4x8xbf16>,
    %c0_69 = arith.constant 0 : index
    %c0_70 = arith.constant 0 : index
    %c176 = arith.constant 176 : index
    %92 = vector.load %arg2[%c0_69, %c0_70, %c176] : memref<1x4x512xf32, #tpu.memory_space<vmem>>, vector<1x4x8xf32>
    %93 = vector.shape_cast %92 : vector<1x4x8xf32> to vector<4x8xf32>
    %94 = arith.truncf %93 : vector<4x8xf32> to vector<4x8xbf16>
    %c0_71 = arith.constant 0 : index
    %c371 = arith.constant 371 : index
    %95 = vector.load %arg6[%c0_71, %c371] : memref<4x1152xbf16, #tpu.memory_space<vmem>>, vector<4x8xbf16>
    tpu.vector_store %arg6[%c0_71, %c371], %94 {strides = array<i32>} : memref<4x1152xbf16, #tpu.memory_space<vmem>>, vector<4x8xbf16>,
    %c0_72 = arith.constant 0 : index
    %c0_73 = arith.constant 0 : index
    %c184 = arith.constant 184 : index
    %96 = vector.load %arg2[%c0_72, %c0_73, %c184] : memref<1x4x512xf32, #tpu.memory_space<vmem>>, vector<1x4x8xf32>
    %97 = vector.shape_cast %96 : vector<1x4x8xf32> to vector<4x8xf32>
    %98 = arith.truncf %97 : vector<4x8xf32> to vector<4x8xbf16>
    %c0_74 = arith.constant 0 : index
    %c381 = arith.constant 381 : index
    %99 = vector.load %arg6[%c0_74, %c381] : memref<4x1152xbf16, #tpu.memory_space<vmem>>, vector<4x8xbf16>
    tpu.vector_store %arg6[%c0_74, %c381], %98 {strides = array<i32>} : memref<4x1152xbf16, #tpu.memory_space<vmem>>, vector<4x8xbf16>,
    %c0_75 = arith.constant 0 : index
    %c0_76 = arith.constant 0 : index
    %c192 = arith.constant 192 : index
    %100 = vector.load %arg2[%c0_75, %c0_76, %c192] : memref<1x4x512xf32, #tpu.memory_space<vmem>>, vector<1x4x8xf32>
    %101 = vector.shape_cast %100 : vector<1x4x8xf32> to vector<4x8xf32>
    %102 = arith.truncf %101 : vector<4x8xf32> to vector<4x8xbf16>
    %c0_77 = arith.constant 0 : index
    %c411 = arith.constant 411 : index
    %103 = vector.load %arg6[%c0_77, %c411] : memref<4x1152xbf16, #tpu.memory_space<vmem>>, vector<4x8xbf16>
    tpu.vector_store %arg6[%c0_77, %c411], %102 {strides = array<i32>} : memref<4x1152xbf16, #tpu.memory_space<vmem>>, vector<4x8xbf16>,
    %c0_78 = arith.constant 0 : index
    %c0_79 = arith.constant 0 : index
    %c200 = arith.constant 200 : index
    %104 = vector.load %arg2[%c0_78, %c0_79, %c200] : memref<1x4x512xf32, #tpu.memory_space<vmem>>, vector<1x4x8xf32>
    %105 = vector.shape_cast %104 : vector<1x4x8xf32> to vector<4x8xf32>
    %106 = arith.truncf %105 : vector<4x8xf32> to vector<4x8xbf16>
    %c0_80 = arith.constant 0 : index
    %c421 = arith.constant 421 : index
    %107 = vector.load %arg6[%c0_80, %c421] : memref<4x1152xbf16, #tpu.memory_space<vmem>>, vector<4x8xbf16>
    tpu.vector_store %arg6[%c0_80, %c421], %106 {strides = array<i32>} : memref<4x1152xbf16, #tpu.memory_space<vmem>>, vector<4x8xbf16>,
    %c0_81 = arith.constant 0 : index
    %c0_82 = arith.constant 0 : index
    %c208 = arith.constant 208 : index
    %108 = vector.load %arg2[%c0_81, %c0_82, %c208] : memref<1x4x512xf32, #tpu.memory_space<vmem>>, vector<1x4x8xf32>
    %109 = vector.shape_cast %108 : vector<1x4x8xf32> to vector<4x8xf32>
    %110 = arith.truncf %109 : vector<4x8xf32> to vector<4x8xbf16>
    %c0_83 = arith.constant 0 : index
    %c431 = arith.constant 431 : index
    %111 = vector.load %arg6[%c0_83, %c431] : memref<4x1152xbf16, #tpu.memory_space<vmem>>, vector<4x8xbf16>
    tpu.vector_store %arg6[%c0_83, %c431], %110 {strides = array<i32>} : memref<4x1152xbf16, #tpu.memory_space<vmem>>, vector<4x8xbf16>,
    %c0_84 = arith.constant 0 : index
    %c0_85 = arith.constant 0 : index
    %c216 = arith.constant 216 : index
    %112 = vector.load %arg2[%c0_84, %c0_85, %c216] : memref<1x4x512xf32, #tpu.memory_space<vmem>>, vector<1x4x8xf32>
    %113 = vector.shape_cast %112 : vector<1x4x8xf32> to vector<4x8xf32>
    %114 = arith.truncf %113 : vector<4x8xf32> to vector<4x8xbf16>
    %c0_86 = arith.constant 0 : index
    %c441 = arith.constant 441 : index
    %115 = vector.load %arg6[%c0_86, %c441] : memref<4x1152xbf16, #tpu.memory_space<vmem>>, vector<4x8xbf16>
    tpu.vector_store %arg6[%c0_86, %c441], %114 {strides = array<i32>} : memref<4x1152xbf16, #tpu.memory_space<vmem>>, vector<4x8xbf16>,
    %c0_87 = arith.constant 0 : index
    %c0_88 = arith.constant 0 : index
    %c224 = arith.constant 224 : index
    %116 = vector.load %arg2[%c0_87, %c0_88, %c224] : memref<1x4x512xf32, #tpu.memory_space<vmem>>, vector<1x4x8xf32>
    %117 = vector.shape_cast %116 : vector<1x4x8xf32> to vector<4x8xf32>
    %118 = arith.truncf %117 : vector<4x8xf32> to vector<4x8xbf16>
    %c0_89 = arith.constant 0 : index
    %c451 = arith.constant 451 : index
    %119 = vector.load %arg6[%c0_89, %c451] : memref<4x1152xbf16, #tpu.memory_space<vmem>>, vector<4x8xbf16>
    tpu.vector_store %arg6[%c0_89, %c451], %118 {strides = array<i32>} : memref<4x1152xbf16, #tpu.memory_space<vmem>>, vector<4x8xbf16>,
    %c0_90 = arith.constant 0 : index
    %c0_91 = arith.constant 0 : index
    %c232 = arith.constant 232 : index
    %120 = vector.load %arg2[%c0_90, %c0_91, %c232] : memref<1x4x512xf32, #tpu.memory_space<vmem>>, vector<1x4x8xf32>
    %121 = vector.shape_cast %120 : vector<1x4x8xf32> to vector<4x8xf32>
    %122 = arith.truncf %121 : vector<4x8xf32> to vector<4x8xbf16>
    %c0_92 = arith.constant 0 : index
    %c461 = arith.constant 461 : index
    %123 = vector.load %arg6[%c0_92, %c461] : memref<4x1152xbf16, #tpu.memory_space<vmem>>, vector<4x8xbf16>
    tpu.vector_store %arg6[%c0_92, %c461], %122 {strides = array<i32>} : memref<4x1152xbf16, #tpu.memory_space<vmem>>, vector<4x8xbf16>,
    %c0_93 = arith.constant 0 : index
    %c0_94 = arith.constant 0 : index
    %c240 = arith.constant 240 : index
    %124 = vector.load %arg2[%c0_93, %c0_94, %c240] : memref<1x4x512xf32, #tpu.memory_space<vmem>>, vector<1x4x8xf32>
    %125 = vector.shape_cast %124 : vector<1x4x8xf32> to vector<4x8xf32>
    %126 = arith.truncf %125 : vector<4x8xf32> to vector<4x8xbf16>
    %c0_95 = arith.constant 0 : index
    %c471 = arith.constant 471 : index
    %127 = vector.load %arg6[%c0_95, %c471] : memref<4x1152xbf16, #tpu.memory_space<vmem>>, vector<4x8xbf16>
    tpu.vector_store %arg6[%c0_95, %c471], %126 {strides = array<i32>} : memref<4x1152xbf16, #tpu.memory_space<vmem>>, vector<4x8xbf16>,
    %c0_96 = arith.constant 0 : index
    %c0_97 = arith.constant 0 : index
    %c248 = arith.constant 248 : index
    %128 = vector.load %arg2[%c0_96, %c0_97, %c248] : memref<1x4x512xf32, #tpu.memory_space<vmem>>, vector<1x4x8xf32>
    %129 = vector.shape_cast %128 : vector<1x4x8xf32> to vector<4x8xf32>
    %130 = arith.truncf %129 : vector<4x8xf32> to vector<4x8xbf16>
    %c0_98 = arith.constant 0 : index
    %c481 = arith.constant 481 : index
    %131 = vector.load %arg6[%c0_98, %c481] : memref<4x1152xbf16, #tpu.memory_space<vmem>>, vector<4x8xbf16>
    tpu.vector_store %arg6[%c0_98, %c481], %130 {strides = array<i32>} : memref<4x1152xbf16, #tpu.memory_space<vmem>>, vector<4x8xbf16>,
    %c0_99 = arith.constant 0 : index
    %c0_100 = arith.constant 0 : index
    %c256 = arith.constant 256 : index
    %132 = vector.load %arg2[%c0_99, %c0_100, %c256] : memref<1x4x512xf32, #tpu.memory_space<vmem>>, vector<1x4x8xf32>
    %133 = vector.shape_cast %132 : vector<1x4x8xf32> to vector<4x8xf32>
    %134 = arith.truncf %133 : vector<4x8xf32> to vector<4x8xbf16>
    %c0_101 = arith.constant 0 : index
    %c511 = arith.constant 511 : index
    %135 = vector.load %arg6[%c0_101, %c511] : memref<4x1152xbf16, #tpu.memory_space<vmem>>, vector<4x8xbf16>
    tpu.vector_store %arg6[%c0_101, %c511], %134 {strides = array<i32>} : memref<4x1152xbf16, #tpu.memory_space<vmem>>, vector<4x8xbf16>,
    %c0_102 = arith.constant 0 : index
    %c0_103 = arith.constant 0 : index
    %c264 = arith.constant 264 : index
    %136 = vector.load %arg2[%c0_102, %c0_103, %c264] : memref<1x4x512xf32, #tpu.memory_space<vmem>>, vector<1x4x8xf32>
    %137 = vector.shape_cast %136 : vector<1x4x8xf32> to vector<4x8xf32>
    %138 = arith.truncf %137 : vector<4x8xf32> to vector<4x8xbf16>
    %c0_104 = arith.constant 0 : index
    %c521 = arith.constant 521 : index
    %139 = vector.load %arg6[%c0_104, %c521] : memref<4x1152xbf16, #tpu.memory_space<vmem>>, vector<4x8xbf16>
    tpu.vector_store %arg6[%c0_104, %c521], %138 {strides = array<i32>} : memref<4x1152xbf16, #tpu.memory_space<vmem>>, vector<4x8xbf16>,
    %c0_105 = arith.constant 0 : index
    %c0_106 = arith.constant 0 : index
    %c272 = arith.constant 272 : index
    %140 = vector.load %arg2[%c0_105, %c0_106, %c272] : memref<1x4x512xf32, #tpu.memory_space<vmem>>, vector<1x4x8xf32>
    %141 = vector.shape_cast %140 : vector<1x4x8xf32> to vector<4x8xf32>
    %142 = arith.truncf %141 : vector<4x8xf32> to vector<4x8xbf16>
    %c0_107 = arith.constant 0 : index
    %c531 = arith.constant 531 : index
    %143 = vector.load %arg6[%c0_107, %c531] : memref<4x1152xbf16, #tpu.memory_space<vmem>>, vector<4x8xbf16>
    tpu.vector_store %arg6[%c0_107, %c531], %142 {strides = array<i32>} : memref<4x1152xbf16, #tpu.memory_space<vmem>>, vector<4x8xbf16>,
    %c0_108 = arith.constant 0 : index
    %c0_109 = arith.constant 0 : index
    %c280 = arith.constant 280 : index
    %144 = vector.load %arg2[%c0_108, %c0_109, %c280] : memref<1x4x512xf32, #tpu.memory_space<vmem>>, vector<1x4x8xf32>
    %145 = vector.shape_cast %144 : vector<1x4x8xf32> to vector<4x8xf32>
    %146 = arith.truncf %145 : vector<4x8xf32> to vector<4x8xbf16>
    %c0_110 = arith.constant 0 : index
    %c541 = arith.constant 541 : index
    %147 = vector.load %arg6[%c0_110, %c541] : memref<4x1152xbf16, #tpu.memory_space<vmem>>, vector<4x8xbf16>
    tpu.vector_store %arg6[%c0_110, %c541], %146 {strides = array<i32>} : memref<4x1152xbf16, #tpu.memory_space<vmem>>, vector<4x8xbf16>,
    %c0_111 = arith.constant 0 : index
    %c0_112 = arith.constant 0 : index
    %c288 = arith.constant 288 : index
    %148 = vector.load %arg2[%c0_111, %c0_112, %c288] : memref<1x4x512xf32, #tpu.memory_space<vmem>>, vector<1x4x8xf32>
    %149 = vector.shape_cast %148 : vector<1x4x8xf32> to vector<4x8xf32>
    %150 = arith.truncf %149 : vector<4x8xf32> to vector<4x8xbf16>
    %c0_113 = arith.constant 0 : index
    %c551 = arith.constant 551 : index
    %151 = vector.load %arg6[%c0_113, %c551] : memref<4x1152xbf16, #tpu.memory_space<vmem>>, vector<4x8xbf16>
    tpu.vector_store %arg6[%c0_113, %c551], %150 {strides = array<i32>} : memref<4x1152xbf16, #tpu.memory_space<vmem>>, vector<4x8xbf16>,
    %c0_114 = arith.constant 0 : index
    %c0_115 = arith.constant 0 : index
    %c296 = arith.constant 296 : index
    %152 = vector.load %arg2[%c0_114, %c0_115, %c296] : memref<1x4x512xf32, #tpu.memory_space<vmem>>, vector<1x4x8xf32>
    %153 = vector.shape_cast %152 : vector<1x4x8xf32> to vector<4x8xf32>
    %154 = arith.truncf %153 : vector<4x8xf32> to vector<4x8xbf16>
    %c0_116 = arith.constant 0 : index
    %c561 = arith.constant 561 : index
    %155 = vector.load %arg6[%c0_116, %c561] : memref<4x1152xbf16, #tpu.memory_space<vmem>>, vector<4x8xbf16>
    tpu.vector_store %arg6[%c0_116, %c561], %154 {strides = array<i32>} : memref<4x1152xbf16, #tpu.memory_space<vmem>>, vector<4x8xbf16>,
    %c0_117 = arith.constant 0 : index
    %c0_118 = arith.constant 0 : index
    %c304 = arith.constant 304 : index
    %156 = vector.load %arg2[%c0_117, %c0_118, %c304] : memref<1x4x512xf32, #tpu.memory_space<vmem>>, vector<1x4x8xf32>
    %157 = vector.shape_cast %156 : vector<1x4x8xf32> to vector<4x8xf32>
    %158 = arith.truncf %157 : vector<4x8xf32> to vector<4x8xbf16>
    %c0_119 = arith.constant 0 : index
    %c571 = arith.constant 571 : index
    %159 = vector.load %arg6[%c0_119, %c571] : memref<4x1152xbf16, #tpu.memory_space<vmem>>, vector<4x8xbf16>
    tpu.vector_store %arg6[%c0_119, %c571], %158 {strides = array<i32>} : memref<4x1152xbf16, #tpu.memory_space<vmem>>, vector<4x8xbf16>,
    %c0_120 = arith.constant 0 : index
    %c0_121 = arith.constant 0 : index
    %c312 = arith.constant 312 : index
    %160 = vector.load %arg2[%c0_120, %c0_121, %c312] : memref<1x4x512xf32, #tpu.memory_space<vmem>>, vector<1x4x8xf32>
    %161 = vector.shape_cast %160 : vector<1x4x8xf32> to vector<4x8xf32>
    %162 = arith.truncf %161 : vector<4x8xf32> to vector<4x8xbf16>
    %c0_122 = arith.constant 0 : index
    %c581 = arith.constant 581 : index
    %163 = vector.load %arg6[%c0_122, %c581] : memref<4x1152xbf16, #tpu.memory_space<vmem>>, vector<4x8xbf16>
    tpu.vector_store %arg6[%c0_122, %c581], %162 {strides = array<i32>} : memref<4x1152xbf16, #tpu.memory_space<vmem>>, vector<4x8xbf16>,
    %c0_123 = arith.constant 0 : index
    %c0_124 = arith.constant 0 : index
    %c320 = arith.constant 320 : index
    %164 = vector.load %arg2[%c0_123, %c0_124, %c320] : memref<1x4x512xf32, #tpu.memory_space<vmem>>, vector<1x4x8xf32>
    %165 = vector.shape_cast %164 : vector<1x4x8xf32> to vector<4x8xf32>
    %166 = arith.truncf %165 : vector<4x8xf32> to vector<4x8xbf16>
    %c0_125 = arith.constant 0 : index
    %c611 = arith.constant 611 : index
    %167 = vector.load %arg6[%c0_125, %c611] : memref<4x1152xbf16, #tpu.memory_space<vmem>>, vector<4x8xbf16>
    tpu.vector_store %arg6[%c0_125, %c611], %166 {strides = array<i32>} : memref<4x1152xbf16, #tpu.memory_space<vmem>>, vector<4x8xbf16>,
    %c0_126 = arith.constant 0 : index
    %c0_127 = arith.constant 0 : index
    %c328 = arith.constant 328 : index
    %168 = vector.load %arg2[%c0_126, %c0_127, %c328] : memref<1x4x512xf32, #tpu.memory_space<vmem>>, vector<1x4x8xf32>
    %169 = vector.shape_cast %168 : vector<1x4x8xf32> to vector<4x8xf32>
    %170 = arith.truncf %169 : vector<4x8xf32> to vector<4x8xbf16>
    %c0_128 = arith.constant 0 : index
    %c621 = arith.constant 621 : index
    %171 = vector.load %arg6[%c0_128, %c621] : memref<4x1152xbf16, #tpu.memory_space<vmem>>, vector<4x8xbf16>
    tpu.vector_store %arg6[%c0_128, %c621], %170 {strides = array<i32>} : memref<4x1152xbf16, #tpu.memory_space<vmem>>, vector<4x8xbf16>,
    %c0_129 = arith.constant 0 : index
    %c0_130 = arith.constant 0 : index
    %c336 = arith.constant 336 : index
    %172 = vector.load %arg2[%c0_129, %c0_130, %c336] : memref<1x4x512xf32, #tpu.memory_space<vmem>>, vector<1x4x8xf32>
    %173 = vector.shape_cast %172 : vector<1x4x8xf32> to vector<4x8xf32>
    %174 = arith.truncf %173 : vector<4x8xf32> to vector<4x8xbf16>
    %c0_131 = arith.constant 0 : index
    %c631 = arith.constant 631 : index
    %175 = vector.load %arg6[%c0_131, %c631] : memref<4x1152xbf16, #tpu.memory_space<vmem>>, vector<4x8xbf16>
    tpu.vector_store %arg6[%c0_131, %c631], %174 {strides = array<i32>} : memref<4x1152xbf16, #tpu.memory_space<vmem>>, vector<4x8xbf16>,
    %c0_132 = arith.constant 0 : index
    %c0_133 = arith.constant 0 : index
    %c344 = arith.constant 344 : index
    %176 = vector.load %arg2[%c0_132, %c0_133, %c344] : memref<1x4x512xf32, #tpu.memory_space<vmem>>, vector<1x4x8xf32>
    %177 = vector.shape_cast %176 : vector<1x4x8xf32> to vector<4x8xf32>
    %178 = arith.truncf %177 : vector<4x8xf32> to vector<4x8xbf16>
    %c0_134 = arith.constant 0 : index
    %c641 = arith.constant 641 : index
    %179 = vector.load %arg6[%c0_134, %c641] : memref<4x1152xbf16, #tpu.memory_space<vmem>>, vector<4x8xbf16>
    tpu.vector_store %arg6[%c0_134, %c641], %178 {strides = array<i32>} : memref<4x1152xbf16, #tpu.memory_space<vmem>>, vector<4x8xbf16>,
    %c0_135 = arith.constant 0 : index
    %c0_136 = arith.constant 0 : index
    %c352 = arith.constant 352 : index
    %180 = vector.load %arg2[%c0_135, %c0_136, %c352] : memref<1x4x512xf32, #tpu.memory_space<vmem>>, vector<1x4x8xf32>
    %181 = vector.shape_cast %180 : vector<1x4x8xf32> to vector<4x8xf32>
    %182 = arith.truncf %181 : vector<4x8xf32> to vector<4x8xbf16>
    %c0_137 = arith.constant 0 : index
    %c651 = arith.constant 651 : index
    %183 = vector.load %arg6[%c0_137, %c651] : memref<4x1152xbf16, #tpu.memory_space<vmem>>, vector<4x8xbf16>
    tpu.vector_store %arg6[%c0_137, %c651], %182 {strides = array<i32>} : memref<4x1152xbf16, #tpu.memory_space<vmem>>, vector<4x8xbf16>,
    %c0_138 = arith.constant 0 : index
    %c0_139 = arith.constant 0 : index
    %c360 = arith.constant 360 : index
    %184 = vector.load %arg2[%c0_138, %c0_139, %c360] : memref<1x4x512xf32, #tpu.memory_space<vmem>>, vector<1x4x8xf32>
    %185 = vector.shape_cast %184 : vector<1x4x8xf32> to vector<4x8xf32>
    %186 = arith.truncf %185 : vector<4x8xf32> to vector<4x8xbf16>
    %c0_140 = arith.constant 0 : index
    %c661 = arith.constant 661 : index
    %187 = vector.load %arg6[%c0_140, %c661] : memref<4x1152xbf16, #tpu.memory_space<vmem>>, vector<4x8xbf16>
    tpu.vector_store %arg6[%c0_140, %c661], %186 {strides = array<i32>} : memref<4x1152xbf16, #tpu.memory_space<vmem>>, vector<4x8xbf16>,
    %c0_141 = arith.constant 0 : index
    %c0_142 = arith.constant 0 : index
    %c368 = arith.constant 368 : index
    %188 = vector.load %arg2[%c0_141, %c0_142, %c368] : memref<1x4x512xf32, #tpu.memory_space<vmem>>, vector<1x4x8xf32>
    %189 = vector.shape_cast %188 : vector<1x4x8xf32> to vector<4x8xf32>
    %190 = arith.truncf %189 : vector<4x8xf32> to vector<4x8xbf16>
    %c0_143 = arith.constant 0 : index
    %c671 = arith.constant 671 : index
    %191 = vector.load %arg6[%c0_143, %c671] : memref<4x1152xbf16, #tpu.memory_space<vmem>>, vector<4x8xbf16>
    tpu.vector_store %arg6[%c0_143, %c671], %190 {strides = array<i32>} : memref<4x1152xbf16, #tpu.memory_space<vmem>>, vector<4x8xbf16>,
    %c0_144 = arith.constant 0 : index
    %c0_145 = arith.constant 0 : index
    %c376 = arith.constant 376 : index
    %192 = vector.load %arg2[%c0_144, %c0_145, %c376] : memref<1x4x512xf32, #tpu.memory_space<vmem>>, vector<1x4x8xf32>
    %193 = vector.shape_cast %192 : vector<1x4x8xf32> to vector<4x8xf32>
    %194 = arith.truncf %193 : vector<4x8xf32> to vector<4x8xbf16>
    %c0_146 = arith.constant 0 : index
    %c681 = arith.constant 681 : index
    %195 = vector.load %arg6[%c0_146, %c681] : memref<4x1152xbf16, #tpu.memory_space<vmem>>, vector<4x8xbf16>
    tpu.vector_store %arg6[%c0_146, %c681], %194 {strides = array<i32>} : memref<4x1152xbf16, #tpu.memory_space<vmem>>, vector<4x8xbf16>,
    %c0_147 = arith.constant 0 : index
    %c0_148 = arith.constant 0 : index
    %c384 = arith.constant 384 : index
    %196 = vector.load %arg2[%c0_147, %c0_148, %c384] : memref<1x4x512xf32, #tpu.memory_space<vmem>>, vector<1x4x8xf32>
    %197 = vector.shape_cast %196 : vector<1x4x8xf32> to vector<4x8xf32>
    %198 = arith.truncf %197 : vector<4x8xf32> to vector<4x8xbf16>
    %c0_149 = arith.constant 0 : index
    %c711 = arith.constant 711 : index
    %199 = vector.load %arg6[%c0_149, %c711] : memref<4x1152xbf16, #tpu.memory_space<vmem>>, vector<4x8xbf16>
    tpu.vector_store %arg6[%c0_149, %c711], %198 {strides = array<i32>} : memref<4x1152xbf16, #tpu.memory_space<vmem>>, vector<4x8xbf16>,
    %c0_150 = arith.constant 0 : index
    %c0_151 = arith.constant 0 : index
    %c392 = arith.constant 392 : index
    %200 = vector.load %arg2[%c0_150, %c0_151, %c392] : memref<1x4x512xf32, #tpu.memory_space<vmem>>, vector<1x4x8xf32>
    %201 = vector.shape_cast %200 : vector<1x4x8xf32> to vector<4x8xf32>
    %202 = arith.truncf %201 : vector<4x8xf32> to vector<4x8xbf16>
    %c0_152 = arith.constant 0 : index
    %c721 = arith.constant 721 : index
    %203 = vector.load %arg6[%c0_152, %c721] : memref<4x1152xbf16, #tpu.memory_space<vmem>>, vector<4x8xbf16>
    tpu.vector_store %arg6[%c0_152, %c721], %202 {strides = array<i32>} : memref<4x1152xbf16, #tpu.memory_space<vmem>>, vector<4x8xbf16>,
    %c0_153 = arith.constant 0 : index
    %c0_154 = arith.constant 0 : index
    %c400 = arith.constant 400 : index
    %204 = vector.load %arg2[%c0_153, %c0_154, %c400] : memref<1x4x512xf32, #tpu.memory_space<vmem>>, vector<1x4x8xf32>
    %205 = vector.shape_cast %204 : vector<1x4x8xf32> to vector<4x8xf32>
    %206 = arith.truncf %205 : vector<4x8xf32> to vector<4x8xbf16>
    %c0_155 = arith.constant 0 : index
    %c731 = arith.constant 731 : index
    %207 = vector.load %arg6[%c0_155, %c731] : memref<4x1152xbf16, #tpu.memory_space<vmem>>, vector<4x8xbf16>
    tpu.vector_store %arg6[%c0_155, %c731], %206 {strides = array<i32>} : memref<4x1152xbf16, #tpu.memory_space<vmem>>, vector<4x8xbf16>,
    %c0_156 = arith.constant 0 : index
    %c0_157 = arith.constant 0 : index
    %c408 = arith.constant 408 : index
    %208 = vector.load %arg2[%c0_156, %c0_157, %c408] : memref<1x4x512xf32, #tpu.memory_space<vmem>>, vector<1x4x8xf32>
    %209 = vector.shape_cast %208 : vector<1x4x8xf32> to vector<4x8xf32>
    %210 = arith.truncf %209 : vector<4x8xf32> to vector<4x8xbf16>
    %c0_158 = arith.constant 0 : index
    %c741 = arith.constant 741 : index
    %211 = vector.load %arg6[%c0_158, %c741] : memref<4x1152xbf16, #tpu.memory_space<vmem>>, vector<4x8xbf16>
    tpu.vector_store %arg6[%c0_158, %c741], %210 {strides = array<i32>} : memref<4x1152xbf16, #tpu.memory_space<vmem>>, vector<4x8xbf16>,
    %c0_159 = arith.constant 0 : index
    %c0_160 = arith.constant 0 : index
    %c416 = arith.constant 416 : index
    %212 = vector.load %arg2[%c0_159, %c0_160, %c416] : memref<1x4x512xf32, #tpu.memory_space<vmem>>, vector<1x4x8xf32>
    %213 = vector.shape_cast %212 : vector<1x4x8xf32> to vector<4x8xf32>
    %214 = arith.truncf %213 : vector<4x8xf32> to vector<4x8xbf16>
    %c0_161 = arith.constant 0 : index
    %c751 = arith.constant 751 : index
    %215 = vector.load %arg6[%c0_161, %c751] : memref<4x1152xbf16, #tpu.memory_space<vmem>>, vector<4x8xbf16>
    tpu.vector_store %arg6[%c0_161, %c751], %214 {strides = array<i32>} : memref<4x1152xbf16, #tpu.memory_space<vmem>>, vector<4x8xbf16>,
    %c0_162 = arith.constant 0 : index
    %c0_163 = arith.constant 0 : index
    %c424 = arith.constant 424 : index
    %216 = vector.load %arg2[%c0_162, %c0_163, %c424] : memref<1x4x512xf32, #tpu.memory_space<vmem>>, vector<1x4x8xf32>
    %217 = vector.shape_cast %216 : vector<1x4x8xf32> to vector<4x8xf32>
    %218 = arith.truncf %217 : vector<4x8xf32> to vector<4x8xbf16>
    %c0_164 = arith.constant 0 : index
    %c761 = arith.constant 761 : index
    %219 = vector.load %arg6[%c0_164, %c761] : memref<4x1152xbf16, #tpu.memory_space<vmem>>, vector<4x8xbf16>
    tpu.vector_store %arg6[%c0_164, %c761], %218 {strides = array<i32>} : memref<4x1152xbf16, #tpu.memory_space<vmem>>, vector<4x8xbf16>,
    %c0_165 = arith.constant 0 : index
    %c0_166 = arith.constant 0 : index
    %c432 = arith.constant 432 : index
    %220 = vector.load %arg2[%c0_165, %c0_166, %c432] : memref<1x4x512xf32, #tpu.memory_space<vmem>>, vector<1x4x8xf32>
    %221 = vector.shape_cast %220 : vector<1x4x8xf32> to vector<4x8xf32>
    %222 = arith.truncf %221 : vector<4x8xf32> to vector<4x8xbf16>
    %c0_167 = arith.constant 0 : index
    %c771 = arith.constant 771 : index
    %223 = vector.load %arg6[%c0_167, %c771] : memref<4x1152xbf16, #tpu.memory_space<vmem>>, vector<4x8xbf16>
    tpu.vector_store %arg6[%c0_167, %c771], %222 {strides = array<i32>} : memref<4x1152xbf16, #tpu.memory_space<vmem>>, vector<4x8xbf16>,
    %c0_168 = arith.constant 0 : index
    %c0_169 = arith.constant 0 : index
    %c440 = arith.constant 440 : index
    %224 = vector.load %arg2[%c0_168, %c0_169, %c440] : memref<1x4x512xf32, #tpu.memory_space<vmem>>, vector<1x4x8xf32>
    %225 = vector.shape_cast %224 : vector<1x4x8xf32> to vector<4x8xf32>
    %226 = arith.truncf %225 : vector<4x8xf32> to vector<4x8xbf16>
    %c0_170 = arith.constant 0 : index
    %c781 = arith.constant 781 : index
    %227 = vector.load %arg6[%c0_170, %c781] : memref<4x1152xbf16, #tpu.memory_space<vmem>>, vector<4x8xbf16>
    tpu.vector_store %arg6[%c0_170, %c781], %226 {strides = array<i32>} : memref<4x1152xbf16, #tpu.memory_space<vmem>>, vector<4x8xbf16>,
    %c0_171 = arith.constant 0 : index
    %c0_172 = arith.constant 0 : index
    %c448 = arith.constant 448 : index
    %228 = vector.load %arg2[%c0_171, %c0_172, %c448] : memref<1x4x512xf32, #tpu.memory_space<vmem>>, vector<1x4x8xf32>
    %229 = vector.shape_cast %228 : vector<1x4x8xf32> to vector<4x8xf32>
    %230 = arith.truncf %229 : vector<4x8xf32> to vector<4x8xbf16>
    %c0_173 = arith.constant 0 : index
    %c811 = arith.constant 811 : index
    %231 = vector.load %arg6[%c0_173, %c811] : memref<4x1152xbf16, #tpu.memory_space<vmem>>, vector<4x8xbf16>
    tpu.vector_store %arg6[%c0_173, %c811], %230 {strides = array<i32>} : memref<4x1152xbf16, #tpu.memory_space<vmem>>, vector<4x8xbf16>,
    %c0_174 = arith.constant 0 : index
    %c0_175 = arith.constant 0 : index
    %c456 = arith.constant 456 : index
    %232 = vector.load %arg2[%c0_174, %c0_175, %c456] : memref<1x4x512xf32, #tpu.memory_space<vmem>>, vector<1x4x8xf32>
    %233 = vector.shape_cast %232 : vector<1x4x8xf32> to vector<4x8xf32>
    %234 = arith.truncf %233 : vector<4x8xf32> to vector<4x8xbf16>
    %c0_176 = arith.constant 0 : index
    %c821 = arith.constant 821 : index
    %235 = vector.load %arg6[%c0_176, %c821] : memref<4x1152xbf16, #tpu.memory_space<vmem>>, vector<4x8xbf16>
    tpu.vector_store %arg6[%c0_176, %c821], %234 {strides = array<i32>} : memref<4x1152xbf16, #tpu.memory_space<vmem>>, vector<4x8xbf16>,
    %c0_177 = arith.constant 0 : index
    %c0_178 = arith.constant 0 : index
    %c464 = arith.constant 464 : index
    %236 = vector.load %arg2[%c0_177, %c0_178, %c464] : memref<1x4x512xf32, #tpu.memory_space<vmem>>, vector<1x4x8xf32>
    %237 = vector.shape_cast %236 : vector<1x4x8xf32> to vector<4x8xf32>
    %238 = arith.truncf %237 : vector<4x8xf32> to vector<4x8xbf16>
    %c0_179 = arith.constant 0 : index
    %c831 = arith.constant 831 : index
    %239 = vector.load %arg6[%c0_179, %c831] : memref<4x1152xbf16, #tpu.memory_space<vmem>>, vector<4x8xbf16>
    tpu.vector_store %arg6[%c0_179, %c831], %238 {strides = array<i32>} : memref<4x1152xbf16, #tpu.memory_space<vmem>>, vector<4x8xbf16>,
    %c0_180 = arith.constant 0 : index
    %c0_181 = arith.constant 0 : index
    %c472 = arith.constant 472 : index
    %240 = vector.load %arg2[%c0_180, %c0_181, %c472] : memref<1x4x512xf32, #tpu.memory_space<vmem>>, vector<1x4x8xf32>
    %241 = vector.shape_cast %240 : vector<1x4x8xf32> to vector<4x8xf32>
    %242 = arith.truncf %241 : vector<4x8xf32> to vector<4x8xbf16>
    %c0_182 = arith.constant 0 : index
    %c841 = arith.constant 841 : index
    %243 = vector.load %arg6[%c0_182, %c841] : memref<4x1152xbf16, #tpu.memory_space<vmem>>, vector<4x8xbf16>
    tpu.vector_store %arg6[%c0_182, %c841], %242 {strides = array<i32>} : memref<4x1152xbf16, #tpu.memory_space<vmem>>, vector<4x8xbf16>,
    %c0_183 = arith.constant 0 : index
    %c0_184 = arith.constant 0 : index
    %c480 = arith.constant 480 : index
    %244 = vector.load %arg2[%c0_183, %c0_184, %c480] : memref<1x4x512xf32, #tpu.memory_space<vmem>>, vector<1x4x8xf32>
    %245 = vector.shape_cast %244 : vector<1x4x8xf32> to vector<4x8xf32>
    %246 = arith.truncf %245 : vector<4x8xf32> to vector<4x8xbf16>
    %c0_185 = arith.constant 0 : index
    %c851 = arith.constant 851 : index
    %247 = vector.load %arg6[%c0_185, %c851] : memref<4x1152xbf16, #tpu.memory_space<vmem>>, vector<4x8xbf16>
    tpu.vector_store %arg6[%c0_185, %c851], %246 {strides = array<i32>} : memref<4x1152xbf16, #tpu.memory_space<vmem>>, vector<4x8xbf16>,
    %c0_186 = arith.constant 0 : index
    %c0_187 = arith.constant 0 : index
    %c488 = arith.constant 488 : index
    %248 = vector.load %arg2[%c0_186, %c0_187, %c488] : memref<1x4x512xf32, #tpu.memory_space<vmem>>, vector<1x4x8xf32>
    %249 = vector.shape_cast %248 : vector<1x4x8xf32> to vector<4x8xf32>
    %250 = arith.truncf %249 : vector<4x8xf32> to vector<4x8xbf16>
    %c0_188 = arith.constant 0 : index
    %c861 = arith.constant 861 : index
    %251 = vector.load %arg6[%c0_188, %c861] : memref<4x1152xbf16, #tpu.memory_space<vmem>>, vector<4x8xbf16>
    tpu.vector_store %arg6[%c0_188, %c861], %250 {strides = array<i32>} : memref<4x1152xbf16, #tpu.memory_space<vmem>>, vector<4x8xbf16>,
    %c0_189 = arith.constant 0 : index
    %c0_190 = arith.constant 0 : index
    %c496 = arith.constant 496 : index
    %252 = vector.load %arg2[%c0_189, %c0_190, %c496] : memref<1x4x512xf32, #tpu.memory_space<vmem>>, vector<1x4x8xf32>
    %253 = vector.shape_cast %252 : vector<1x4x8xf32> to vector<4x8xf32>
    %254 = arith.truncf %253 : vector<4x8xf32> to vector<4x8xbf16>
    %c0_191 = arith.constant 0 : index
    %c871 = arith.constant 871 : index
    %255 = vector.load %arg6[%c0_191, %c871] : memref<4x1152xbf16, #tpu.memory_space<vmem>>, vector<4x8xbf16>
    tpu.vector_store %arg6[%c0_191, %c871], %254 {strides = array<i32>} : memref<4x1152xbf16, #tpu.memory_space<vmem>>, vector<4x8xbf16>,
    %c0_192 = arith.constant 0 : index
    %c0_193 = arith.constant 0 : index
    %c504 = arith.constant 504 : index
    %256 = vector.load %arg2[%c0_192, %c0_193, %c504] : memref<1x4x512xf32, #tpu.memory_space<vmem>>, vector<1x4x8xf32>
    %257 = vector.shape_cast %256 : vector<1x4x8xf32> to vector<4x8xf32>
    %258 = arith.truncf %257 : vector<4x8xf32> to vector<4x8xbf16>
    %c0_194 = arith.constant 0 : index
    %c881 = arith.constant 881 : index
    %259 = vector.load %arg6[%c0_194, %c881] : memref<4x1152xbf16, #tpu.memory_space<vmem>>, vector<4x8xbf16>
    tpu.vector_store %arg6[%c0_194, %c881], %258 {strides = array<i32>} : memref<4x1152xbf16, #tpu.memory_space<vmem>>, vector<4x8xbf16>,
    %c0_195 = arith.constant 0 : index
    %c0_196 = arith.constant 0 : index
    %260 = vector.load %arg6[%c0_195, %c0_196] : memref<4x1152xbf16, #tpu.memory_space<vmem>>, vector<4x896xbf16>
    %c0_197 = arith.constant 0 : index
    %c0_198 = arith.constant 0 : index
    %261 = vector.load %arg7[%c0_197, %c0_198] : memref<112x896xbf16, #tpu.memory_space<vmem>>, vector<4x896xbf16>
    tpu.vector_store %arg7[%c0_197, %c0_198], %260 {strides = array<i32>} : memref<112x896xbf16, #tpu.memory_space<vmem>>, vector<4x896xbf16>,
    %c0_199 = arith.constant 0 : index
    %c1 = arith.constant 1 : index
    %262 = vector.load %arg6[%c0_199, %c1] : memref<4x1152xbf16, #tpu.memory_space<vmem>>, vector<4x896xbf16>
    %c4 = arith.constant 4 : index
    %c0_200 = arith.constant 0 : index
    %263 = vector.load %arg7[%c4, %c0_200] : memref<112x896xbf16, #tpu.memory_space<vmem>>, vector<4x896xbf16>
    tpu.vector_store %arg7[%c4, %c0_200], %262 {strides = array<i32>} : memref<112x896xbf16, #tpu.memory_space<vmem>>, vector<4x896xbf16>,
    %c0_201 = arith.constant 0 : index
    %c2 = arith.constant 2 : index
    %264 = vector.load %arg6[%c0_201, %c2] : memref<4x1152xbf16, #tpu.memory_space<vmem>>, vector<4x896xbf16>
    %c8_202 = arith.constant 8 : index
    %c0_203 = arith.constant 0 : index
    %265 = vector.load %arg7[%c8_202, %c0_203] : memref<112x896xbf16, #tpu.memory_space<vmem>>, vector<4x896xbf16>
    tpu.vector_store %arg7[%c8_202, %c0_203], %264 {strides = array<i32>} : memref<112x896xbf16, #tpu.memory_space<vmem>>, vector<4x896xbf16>,
    %c0_204 = arith.constant 0 : index
    %c10 = arith.constant 10 : index
    %266 = vector.load %arg6[%c0_204, %c10] : memref<4x1152xbf16, #tpu.memory_space<vmem>>, vector<4x896xbf16>
    %c12 = arith.constant 12 : index
    %c0_205 = arith.constant 0 : index
    %267 = vector.load %arg7[%c12, %c0_205] : memref<112x896xbf16, #tpu.memory_space<vmem>>, vector<4x896xbf16>
    tpu.vector_store %arg7[%c12, %c0_205], %266 {strides = array<i32>} : memref<112x896xbf16, #tpu.memory_space<vmem>>, vector<4x896xbf16>,
    %c0_206 = arith.constant 0 : index
    %c11 = arith.constant 11 : index
    %268 = vector.load %arg6[%c0_206, %c11] : memref<4x1152xbf16, #tpu.memory_space<vmem>>, vector<4x896xbf16>
    %c16_207 = arith.constant 16 : index
    %c0_208 = arith.constant 0 : index
    %269 = vector.load %arg7[%c16_207, %c0_208] : memref<112x896xbf16, #tpu.memory_space<vmem>>, vector<4x896xbf16>
    tpu.vector_store %arg7[%c16_207, %c0_208], %268 {strides = array<i32>} : memref<112x896xbf16, #tpu.memory_space<vmem>>, vector<4x896xbf16>,
    %c0_209 = arith.constant 0 : index
    %c12_210 = arith.constant 12 : index
    %270 = vector.load %arg6[%c0_209, %c12_210] : memref<4x1152xbf16, #tpu.memory_space<vmem>>, vector<4x896xbf16>
    %c20 = arith.constant 20 : index
    %c0_211 = arith.constant 0 : index
    %271 = vector.load %arg7[%c20, %c0_211] : memref<112x896xbf16, #tpu.memory_space<vmem>>, vector<4x896xbf16>
    tpu.vector_store %arg7[%c20, %c0_211], %270 {strides = array<i32>} : memref<112x896xbf16, #tpu.memory_space<vmem>>, vector<4x896xbf16>,
    %c0_212 = arith.constant 0 : index
    %c20_213 = arith.constant 20 : index
    %272 = vector.load %arg6[%c0_212, %c20_213] : memref<4x1152xbf16, #tpu.memory_space<vmem>>, vector<4x896xbf16>
    %c24_214 = arith.constant 24 : index
    %c0_215 = arith.constant 0 : index
    %273 = vector.load %arg7[%c24_214, %c0_215] : memref<112x896xbf16, #tpu.memory_space<vmem>>, vector<4x896xbf16>
    tpu.vector_store %arg7[%c24_214, %c0_215], %272 {strides = array<i32>} : memref<112x896xbf16, #tpu.memory_space<vmem>>, vector<4x896xbf16>,
    %c0_216 = arith.constant 0 : index
    %c21 = arith.constant 21 : index
    %274 = vector.load %arg6[%c0_216, %c21] : memref<4x1152xbf16, #tpu.memory_space<vmem>>, vector<4x896xbf16>
    %c28 = arith.constant 28 : index
    %c0_217 = arith.constant 0 : index
    %275 = vector.load %arg7[%c28, %c0_217] : memref<112x896xbf16, #tpu.memory_space<vmem>>, vector<4x896xbf16>
    tpu.vector_store %arg7[%c28, %c0_217], %274 {strides = array<i32>} : memref<112x896xbf16, #tpu.memory_space<vmem>>, vector<4x896xbf16>,
    %c0_218 = arith.constant 0 : index
    %c22 = arith.constant 22 : index
    %276 = vector.load %arg6[%c0_218, %c22] : memref<4x1152xbf16, #tpu.memory_space<vmem>>, vector<4x896xbf16>
    %c32_219 = arith.constant 32 : index
    %c0_220 = arith.constant 0 : index
    %277 = vector.load %arg7[%c32_219, %c0_220] : memref<112x896xbf16, #tpu.memory_space<vmem>>, vector<4x896xbf16>
    tpu.vector_store %arg7[%c32_219, %c0_220], %276 {strides = array<i32>} : memref<112x896xbf16, #tpu.memory_space<vmem>>, vector<4x896xbf16>,
    %c0_221 = arith.constant 0 : index
    %c100 = arith.constant 100 : index
    %278 = vector.load %arg6[%c0_221, %c100] : memref<4x1152xbf16, #tpu.memory_space<vmem>>, vector<4x896xbf16>
    %c36 = arith.constant 36 : index
    %c0_222 = arith.constant 0 : index
    %279 = vector.load %arg7[%c36, %c0_222] : memref<112x896xbf16, #tpu.memory_space<vmem>>, vector<4x896xbf16>
    tpu.vector_store %arg7[%c36, %c0_222], %278 {strides = array<i32>} : memref<112x896xbf16, #tpu.memory_space<vmem>>, vector<4x896xbf16>,
    %c0_223 = arith.constant 0 : index
    %c101 = arith.constant 101 : index
    %280 = vector.load %arg6[%c0_223, %c101] : memref<4x1152xbf16, #tpu.memory_space<vmem>>, vector<4x896xbf16>
    %c40_224 = arith.constant 40 : index
    %c0_225 = arith.constant 0 : index
    %281 = vector.load %arg7[%c40_224, %c0_225] : memref<112x896xbf16, #tpu.memory_space<vmem>>, vector<4x896xbf16>
    tpu.vector_store %arg7[%c40_224, %c0_225], %280 {strides = array<i32>} : memref<112x896xbf16, #tpu.memory_space<vmem>>, vector<4x896xbf16>,
    %c0_226 = arith.constant 0 : index
    %c102 = arith.constant 102 : index
    %282 = vector.load %arg6[%c0_226, %c102] : memref<4x1152xbf16, #tpu.memory_space<vmem>>, vector<4x896xbf16>
    %c44 = arith.constant 44 : index
    %c0_227 = arith.constant 0 : index
    %283 = vector.load %arg7[%c44, %c0_227] : memref<112x896xbf16, #tpu.memory_space<vmem>>, vector<4x896xbf16>
    tpu.vector_store %arg7[%c44, %c0_227], %282 {strides = array<i32>} : memref<112x896xbf16, #tpu.memory_space<vmem>>, vector<4x896xbf16>,
    %c0_228 = arith.constant 0 : index
    %c110 = arith.constant 110 : index
    %284 = vector.load %arg6[%c0_228, %c110] : memref<4x1152xbf16, #tpu.memory_space<vmem>>, vector<4x896xbf16>
    %c48_229 = arith.constant 48 : index
    %c0_230 = arith.constant 0 : index
    %285 = vector.load %arg7[%c48_229, %c0_230] : memref<112x896xbf16, #tpu.memory_space<vmem>>, vector<4x896xbf16>
    tpu.vector_store %arg7[%c48_229, %c0_230], %284 {strides = array<i32>} : memref<112x896xbf16, #tpu.memory_space<vmem>>, vector<4x896xbf16>,
    %c0_231 = arith.constant 0 : index
    %c111_232 = arith.constant 111 : index
    %286 = vector.load %arg6[%c0_231, %c111_232] : memref<4x1152xbf16, #tpu.memory_space<vmem>>, vector<4x896xbf16>
    %c52 = arith.constant 52 : index
    %c0_233 = arith.constant 0 : index
    %287 = vector.load %arg7[%c52, %c0_233] : memref<112x896xbf16, #tpu.memory_space<vmem>>, vector<4x896xbf16>
    tpu.vector_store %arg7[%c52, %c0_233], %286 {strides = array<i32>} : memref<112x896xbf16, #tpu.memory_space<vmem>>, vector<4x896xbf16>,
    %c0_234 = arith.constant 0 : index
    %c112_235 = arith.constant 112 : index
    %288 = vector.load %arg6[%c0_234, %c112_235] : memref<4x1152xbf16, #tpu.memory_space<vmem>>, vector<4x896xbf16>
    %c56_236 = arith.constant 56 : index
    %c0_237 = arith.constant 0 : index
    %289 = vector.load %arg7[%c56_236, %c0_237] : memref<112x896xbf16, #tpu.memory_space<vmem>>, vector<4x896xbf16>
    tpu.vector_store %arg7[%c56_236, %c0_237], %288 {strides = array<i32>} : memref<112x896xbf16, #tpu.memory_space<vmem>>, vector<4x896xbf16>,
    %c0_238 = arith.constant 0 : index
    %c120_239 = arith.constant 120 : index
    %290 = vector.load %arg6[%c0_238, %c120_239] : memref<4x1152xbf16, #tpu.memory_space<vmem>>, vector<4x896xbf16>
    %c60 = arith.constant 60 : index
    %c0_240 = arith.constant 0 : index
    %291 = vector.load %arg7[%c60, %c0_240] : memref<112x896xbf16, #tpu.memory_space<vmem>>, vector<4x896xbf16>
    tpu.vector_store %arg7[%c60, %c0_240], %290 {strides = array<i32>} : memref<112x896xbf16, #tpu.memory_space<vmem>>, vector<4x896xbf16>,
    %c0_241 = arith.constant 0 : index
    %c121_242 = arith.constant 121 : index
    %292 = vector.load %arg6[%c0_241, %c121_242] : memref<4x1152xbf16, #tpu.memory_space<vmem>>, vector<4x896xbf16>
    %c64_243 = arith.constant 64 : index
    %c0_244 = arith.constant 0 : index
    %293 = vector.load %arg7[%c64_243, %c0_244] : memref<112x896xbf16, #tpu.memory_space<vmem>>, vector<4x896xbf16>
    tpu.vector_store %arg7[%c64_243, %c0_244], %292 {strides = array<i32>} : memref<112x896xbf16, #tpu.memory_space<vmem>>, vector<4x896xbf16>,
    %c0_245 = arith.constant 0 : index
    %c122 = arith.constant 122 : index
    %294 = vector.load %arg6[%c0_245, %c122] : memref<4x1152xbf16, #tpu.memory_space<vmem>>, vector<4x896xbf16>
    %c68 = arith.constant 68 : index
    %c0_246 = arith.constant 0 : index
    %295 = vector.load %arg7[%c68, %c0_246] : memref<112x896xbf16, #tpu.memory_space<vmem>>, vector<4x896xbf16>
    tpu.vector_store %arg7[%c68, %c0_246], %294 {strides = array<i32>} : memref<112x896xbf16, #tpu.memory_space<vmem>>, vector<4x896xbf16>,
    %c0_247 = arith.constant 0 : index
    %c200_248 = arith.constant 200 : index
    %296 = vector.load %arg6[%c0_247, %c200_248] : memref<4x1152xbf16, #tpu.memory_space<vmem>>, vector<4x896xbf16>
    %c72_249 = arith.constant 72 : index
    %c0_250 = arith.constant 0 : index
    %297 = vector.load %arg7[%c72_249, %c0_250] : memref<112x896xbf16, #tpu.memory_space<vmem>>, vector<4x896xbf16>
    tpu.vector_store %arg7[%c72_249, %c0_250], %296 {strides = array<i32>} : memref<112x896xbf16, #tpu.memory_space<vmem>>, vector<4x896xbf16>,
    %c0_251 = arith.constant 0 : index
    %c201 = arith.constant 201 : index
    %298 = vector.load %arg6[%c0_251, %c201] : memref<4x1152xbf16, #tpu.memory_space<vmem>>, vector<4x896xbf16>
    %c76 = arith.constant 76 : index
    %c0_252 = arith.constant 0 : index
    %299 = vector.load %arg7[%c76, %c0_252] : memref<112x896xbf16, #tpu.memory_space<vmem>>, vector<4x896xbf16>
    tpu.vector_store %arg7[%c76, %c0_252], %298 {strides = array<i32>} : memref<112x896xbf16, #tpu.memory_space<vmem>>, vector<4x896xbf16>,
    %c0_253 = arith.constant 0 : index
    %c202 = arith.constant 202 : index
    %300 = vector.load %arg6[%c0_253, %c202] : memref<4x1152xbf16, #tpu.memory_space<vmem>>, vector<4x896xbf16>
    %c80_254 = arith.constant 80 : index
    %c0_255 = arith.constant 0 : index
    %301 = vector.load %arg7[%c80_254, %c0_255] : memref<112x896xbf16, #tpu.memory_space<vmem>>, vector<4x896xbf16>
    tpu.vector_store %arg7[%c80_254, %c0_255], %300 {strides = array<i32>} : memref<112x896xbf16, #tpu.memory_space<vmem>>, vector<4x896xbf16>,
    %c0_256 = arith.constant 0 : index
    %c210 = arith.constant 210 : index
    %302 = vector.load %arg6[%c0_256, %c210] : memref<4x1152xbf16, #tpu.memory_space<vmem>>, vector<4x896xbf16>
    %c84 = arith.constant 84 : index
    %c0_257 = arith.constant 0 : index
    %303 = vector.load %arg7[%c84, %c0_257] : memref<112x896xbf16, #tpu.memory_space<vmem>>, vector<4x896xbf16>
    tpu.vector_store %arg7[%c84, %c0_257], %302 {strides = array<i32>} : memref<112x896xbf16, #tpu.memory_space<vmem>>, vector<4x896xbf16>,
    %c0_258 = arith.constant 0 : index
    %c211_259 = arith.constant 211 : index
    %304 = vector.load %arg6[%c0_258, %c211_259] : memref<4x1152xbf16, #tpu.memory_space<vmem>>, vector<4x896xbf16>
    %c88_260 = arith.constant 88 : index
    %c0_261 = arith.constant 0 : index
    %305 = vector.load %arg7[%c88_260, %c0_261] : memref<112x896xbf16, #tpu.memory_space<vmem>>, vector<4x896xbf16>
    tpu.vector_store %arg7[%c88_260, %c0_261], %304 {strides = array<i32>} : memref<112x896xbf16, #tpu.memory_space<vmem>>, vector<4x896xbf16>,
    %c0_262 = arith.constant 0 : index
    %c212 = arith.constant 212 : index
    %306 = vector.load %arg6[%c0_262, %c212] : memref<4x1152xbf16, #tpu.memory_space<vmem>>, vector<4x896xbf16>
    %c92 = arith.constant 92 : index
    %c0_263 = arith.constant 0 : index
    %307 = vector.load %arg7[%c92, %c0_263] : memref<112x896xbf16, #tpu.memory_space<vmem>>, vector<4x896xbf16>
    tpu.vector_store %arg7[%c92, %c0_263], %306 {strides = array<i32>} : memref<112x896xbf16, #tpu.memory_space<vmem>>, vector<4x896xbf16>,
    %c0_264 = arith.constant 0 : index
    %c220 = arith.constant 220 : index
    %308 = vector.load %arg6[%c0_264, %c220] : memref<4x1152xbf16, #tpu.memory_space<vmem>>, vector<4x896xbf16>
    %c96_265 = arith.constant 96 : index
    %c0_266 = arith.constant 0 : index
    %309 = vector.load %arg7[%c96_265, %c0_266] : memref<112x896xbf16, #tpu.memory_space<vmem>>, vector<4x896xbf16>
    tpu.vector_store %arg7[%c96_265, %c0_266], %308 {strides = array<i32>} : memref<112x896xbf16, #tpu.memory_space<vmem>>, vector<4x896xbf16>,
    %c0_267 = arith.constant 0 : index
    %c221_268 = arith.constant 221 : index
    %310 = vector.load %arg6[%c0_267, %c221_268] : memref<4x1152xbf16, #tpu.memory_space<vmem>>, vector<4x896xbf16>
    %c100_269 = arith.constant 100 : index
    %c0_270 = arith.constant 0 : index
    %311 = vector.load %arg7[%c100_269, %c0_270] : memref<112x896xbf16, #tpu.memory_space<vmem>>, vector<4x896xbf16>
    tpu.vector_store %arg7[%c100_269, %c0_270], %310 {strides = array<i32>} : memref<112x896xbf16, #tpu.memory_space<vmem>>, vector<4x896xbf16>,
    %c0_271 = arith.constant 0 : index
    %c222 = arith.constant 222 : index
    %312 = vector.load %arg6[%c0_271, %c222] : memref<4x1152xbf16, #tpu.memory_space<vmem>>, vector<4x896xbf16>
    %c104_272 = arith.constant 104 : index
    %c0_273 = arith.constant 0 : index
    %313 = vector.load %arg7[%c104_272, %c0_273] : memref<112x896xbf16, #tpu.memory_space<vmem>>, vector<4x896xbf16>
    tpu.vector_store %arg7[%c104_272, %c0_273], %312 {strides = array<i32>} : memref<112x896xbf16, #tpu.memory_space<vmem>>, vector<4x896xbf16>,
    %c0_274 = arith.constant 0 : index
    %c0_275 = arith.constant 0 : index
    %314 = vector.load %arg3[%c0_274, %c0_275] : memref<8x112xbf16, #tpu.memory_space<vmem>>, vector<8x112xbf16>
    %c0_276 = arith.constant 0 : index
    %c0_277 = arith.constant 0 : index
    %315 = vector.load %arg7[%c0_276, %c0_277] : memref<112x896xbf16, #tpu.memory_space<vmem>>, vector<112x896xbf16>
    %cst = arith.constant dense<0.000000e+00> : vector<8x896xf32>
    %316 = tpu.matmul %314, %315, %cst {dimension_numbers = #tpu.dot_dimension_numbers<[1], [0], [0], [1], [0, 0, 1, 1], [], []>} : vector<8x112xbf16>, vector<112x896xbf16>, vector<8x896xf32> -> vector<8x896xf32>
    %317 = vector.broadcast %3 : vector<1x896xf32> to vector<8x896xf32>
    %318 = arith.mulf %316, %317 : vector<8x896xf32>
    %cst_278 = arith.constant dense<0.000000e+00> : vector<8xf32>
    %319 = vector.multi_reduction <add>, %318, %cst_278 [1] : vector<8x896xf32> to vector<8xf32>
    %320 = vector.shape_cast %319 : vector<8xf32> to vector<8x1xf32>
    %cst_279 = arith.constant 0.001953125 : f32
    %321 = vector.broadcast %cst_279 : f32 to vector<8x1xf32>
    %322 = arith.mulf %320, %321 : vector<8x1xf32>
    %323 = vector.broadcast %322 : vector<8x1xf32> to vector<8x896xf32>
    %324 = arith.subf %316, %323 : vector<8x896xf32>
    %325 = vector.broadcast %3 : vector<1x896xf32> to vector<8x896xf32>
    %326 = arith.mulf %324, %325 : vector<8x896xf32>
    %327 = arith.mulf %326, %326 : vector<8x896xf32>
    %cst_280 = arith.constant dense<0.000000e+00> : vector<8xf32>
    %328 = vector.multi_reduction <add>, %327, %cst_280 [1] : vector<8x896xf32> to vector<8xf32>
    %329 = vector.shape_cast %328 : vector<8xf32> to vector<8x1xf32>
    %cst_281 = arith.constant 0.001953125 : f32
    %330 = vector.broadcast %cst_281 : f32 to vector<8x1xf32>
    %331 = arith.mulf %329, %330 : vector<8x1xf32>
    %cst_282 = arith.constant 9.99999974E-6 : f32
    %332 = vector.broadcast %cst_282 : f32 to vector<8x1xf32>
    %333 = arith.addf %331, %332 : vector<8x1xf32>
    %334 = math.rsqrt %333 : vector<8x1xf32>
    %335 = vector.broadcast %334 : vector<8x1xf32> to vector<8x896xf32>
    %336 = arith.mulf %324, %335 : vector<8x896xf32>
    %cst_283 = arith.constant 0.000000e+00 : f32
    %337 = vector.broadcast %cst_283 : f32 to vector<8x896xf32>
    %338 = arith.cmpf ogt, %336, %337 : vector<8x896xf32>
    %cst_284 = arith.constant 0.00999999977 : f32
    %339 = vector.broadcast %cst_284 : f32 to vector<8x896xf32>
    %340 = arith.mulf %339, %336 : vector<8x896xf32>
    %341 = arith.select %338, %336, %340 : vector<8x896xi1>, vector<8x896xf32>
    %342 = vector.broadcast %3 : vector<1x896xf32> to vector<8x896xf32>
    %343 = arith.mulf %341, %342 : vector<8x896xf32>
    %344 = arith.truncf %343 : vector<8x896xf32> to vector<8x896xbf16>
    %c0_285 = arith.constant 0 : index
    %c128_286 = arith.constant 128 : index
    %345 = vector.load %arg9[%c0_285, %c128_286] : memref<8x1152xbf16, #tpu.memory_space<vmem>>, vector<8x896xbf16>
    tpu.vector_store %arg9[%c0_285, %c128_286], %344 {strides = array<i32>} : memref<8x1152xbf16, #tpu.memory_space<vmem>>, vector<8x896xbf16>,
    %c0_287 = arith.constant 0 : index
    %c17 = arith.constant 17 : index
    %346 = vector.load %arg9[%c0_287, %c17] : memref<8x1152xbf16, #tpu.memory_space<vmem>>, vector<8x896xbf16>
    %c0_288 = arith.constant 0 : index
    %c0_289 = arith.constant 0 : index
    %347 = vector.load %arg8[%c0_288, %c0_289] : memref<224x896xbf16, #tpu.memory_space<vmem>>, vector<8x896xbf16>
    tpu.vector_store %arg8[%c0_288, %c0_289], %346 {strides = array<i32>} : memref<224x896xbf16, #tpu.memory_space<vmem>>, vector<8x896xbf16>,
    %c0_290 = arith.constant 0 : index
    %c18 = arith.constant 18 : index
    %348 = vector.load %arg9[%c0_290, %c18] : memref<8x1152xbf16, #tpu.memory_space<vmem>>, vector<8x896xbf16>
    %c8_291 = arith.constant 8 : index
    %c0_292 = arith.constant 0 : index
    %349 = vector.load %arg8[%c8_291, %c0_292] : memref<224x896xbf16, #tpu.memory_space<vmem>>, vector<8x896xbf16>
    tpu.vector_store %arg8[%c8_291, %c0_292], %348 {strides = array<i32>} : memref<224x896xbf16, #tpu.memory_space<vmem>>, vector<8x896xbf16>,
    %c0_293 = arith.constant 0 : index
    %c19 = arith.constant 19 : index
    %350 = vector.load %arg9[%c0_293, %c19] : memref<8x1152xbf16, #tpu.memory_space<vmem>>, vector<8x896xbf16>
    %c16_294 = arith.constant 16 : index
    %c0_295 = arith.constant 0 : index
    %351 = vector.load %arg8[%c16_294, %c0_295] : memref<224x896xbf16, #tpu.memory_space<vmem>>, vector<8x896xbf16>
    tpu.vector_store %arg8[%c16_294, %c0_295], %350 {strides = array<i32>} : memref<224x896xbf16, #tpu.memory_space<vmem>>, vector<8x896xbf16>,
    %c0_296 = arith.constant 0 : index
    %c27 = arith.constant 27 : index
    %352 = vector.load %arg9[%c0_296, %c27] : memref<8x1152xbf16, #tpu.memory_space<vmem>>, vector<8x896xbf16>
    %c24_297 = arith.constant 24 : index
    %c0_298 = arith.constant 0 : index
    %353 = vector.load %arg8[%c24_297, %c0_298] : memref<224x896xbf16, #tpu.memory_space<vmem>>, vector<8x896xbf16>
    tpu.vector_store %arg8[%c24_297, %c0_298], %352 {strides = array<i32>} : memref<224x896xbf16, #tpu.memory_space<vmem>>, vector<8x896xbf16>,
    %c0_299 = arith.constant 0 : index
    %c28_300 = arith.constant 28 : index
    %354 = vector.load %arg9[%c0_299, %c28_300] : memref<8x1152xbf16, #tpu.memory_space<vmem>>, vector<8x896xbf16>
    %c32_301 = arith.constant 32 : index
    %c0_302 = arith.constant 0 : index
    %355 = vector.load %arg8[%c32_301, %c0_302] : memref<224x896xbf16, #tpu.memory_space<vmem>>, vector<8x896xbf16>
    tpu.vector_store %arg8[%c32_301, %c0_302], %354 {strides = array<i32>} : memref<224x896xbf16, #tpu.memory_space<vmem>>, vector<8x896xbf16>,
    %c0_303 = arith.constant 0 : index
    %c29 = arith.constant 29 : index
    %356 = vector.load %arg9[%c0_303, %c29] : memref<8x1152xbf16, #tpu.memory_space<vmem>>, vector<8x896xbf16>
    %c40_304 = arith.constant 40 : index
    %c0_305 = arith.constant 0 : index
    %357 = vector.load %arg8[%c40_304, %c0_305] : memref<224x896xbf16, #tpu.memory_space<vmem>>, vector<8x896xbf16>
    tpu.vector_store %arg8[%c40_304, %c0_305], %356 {strides = array<i32>} : memref<224x896xbf16, #tpu.memory_space<vmem>>, vector<8x896xbf16>,
    %c0_306 = arith.constant 0 : index
    %c37 = arith.constant 37 : index
    %358 = vector.load %arg9[%c0_306, %c37] : memref<8x1152xbf16, #tpu.memory_space<vmem>>, vector<8x896xbf16>
    %c48_307 = arith.constant 48 : index
    %c0_308 = arith.constant 0 : index
    %359 = vector.load %arg8[%c48_307, %c0_308] : memref<224x896xbf16, #tpu.memory_space<vmem>>, vector<8x896xbf16>
    tpu.vector_store %arg8[%c48_307, %c0_308], %358 {strides = array<i32>} : memref<224x896xbf16, #tpu.memory_space<vmem>>, vector<8x896xbf16>,
    %c0_309 = arith.constant 0 : index
    %c38 = arith.constant 38 : index
    %360 = vector.load %arg9[%c0_309, %c38] : memref<8x1152xbf16, #tpu.memory_space<vmem>>, vector<8x896xbf16>
    %c56_310 = arith.constant 56 : index
    %c0_311 = arith.constant 0 : index
    %361 = vector.load %arg8[%c56_310, %c0_311] : memref<224x896xbf16, #tpu.memory_space<vmem>>, vector<8x896xbf16>
    tpu.vector_store %arg8[%c56_310, %c0_311], %360 {strides = array<i32>} : memref<224x896xbf16, #tpu.memory_space<vmem>>, vector<8x896xbf16>,
    %c0_312 = arith.constant 0 : index
    %c39 = arith.constant 39 : index
    %362 = vector.load %arg9[%c0_312, %c39] : memref<8x1152xbf16, #tpu.memory_space<vmem>>, vector<8x896xbf16>
    %c64_313 = arith.constant 64 : index
    %c0_314 = arith.constant 0 : index
    %363 = vector.load %arg8[%c64_313, %c0_314] : memref<224x896xbf16, #tpu.memory_space<vmem>>, vector<8x896xbf16>
    tpu.vector_store %arg8[%c64_313, %c0_314], %362 {strides = array<i32>} : memref<224x896xbf16, #tpu.memory_space<vmem>>, vector<8x896xbf16>,
    %c0_315 = arith.constant 0 : index
    %c117 = arith.constant 117 : index
    %364 = vector.load %arg9[%c0_315, %c117] : memref<8x1152xbf16, #tpu.memory_space<vmem>>, vector<8x896xbf16>
    %c72_316 = arith.constant 72 : index
    %c0_317 = arith.constant 0 : index
    %365 = vector.load %arg8[%c72_316, %c0_317] : memref<224x896xbf16, #tpu.memory_space<vmem>>, vector<8x896xbf16>
    tpu.vector_store %arg8[%c72_316, %c0_317], %364 {strides = array<i32>} : memref<224x896xbf16, #tpu.memory_space<vmem>>, vector<8x896xbf16>,
    %c0_318 = arith.constant 0 : index
    %c118 = arith.constant 118 : index
    %366 = vector.load %arg9[%c0_318, %c118] : memref<8x1152xbf16, #tpu.memory_space<vmem>>, vector<8x896xbf16>
    %c80_319 = arith.constant 80 : index
    %c0_320 = arith.constant 0 : index
    %367 = vector.load %arg8[%c80_319, %c0_320] : memref<224x896xbf16, #tpu.memory_space<vmem>>, vector<8x896xbf16>
    tpu.vector_store %arg8[%c80_319, %c0_320], %366 {strides = array<i32>} : memref<224x896xbf16, #tpu.memory_space<vmem>>, vector<8x896xbf16>,
    %c0_321 = arith.constant 0 : index
    %c119 = arith.constant 119 : index
    %368 = vector.load %arg9[%c0_321, %c119] : memref<8x1152xbf16, #tpu.memory_space<vmem>>, vector<8x896xbf16>
    %c88_322 = arith.constant 88 : index
    %c0_323 = arith.constant 0 : index
    %369 = vector.load %arg8[%c88_322, %c0_323] : memref<224x896xbf16, #tpu.memory_space<vmem>>, vector<8x896xbf16>
    tpu.vector_store %arg8[%c88_322, %c0_323], %368 {strides = array<i32>} : memref<224x896xbf16, #tpu.memory_space<vmem>>, vector<8x896xbf16>,
    %c0_324 = arith.constant 0 : index
    %c127 = arith.constant 127 : index
    %370 = vector.load %arg9[%c0_324, %c127] : memref<8x1152xbf16, #tpu.memory_space<vmem>>, vector<8x896xbf16>
    %c96_325 = arith.constant 96 : index
    %c0_326 = arith.constant 0 : index
    %371 = vector.load %arg8[%c96_325, %c0_326] : memref<224x896xbf16, #tpu.memory_space<vmem>>, vector<8x896xbf16>
    tpu.vector_store %arg8[%c96_325, %c0_326], %370 {strides = array<i32>} : memref<224x896xbf16, #tpu.memory_space<vmem>>, vector<8x896xbf16>,
    %c0_327 = arith.constant 0 : index
    %c128_328 = arith.constant 128 : index
    %372 = vector.load %arg9[%c0_327, %c128_328] : memref<8x1152xbf16, #tpu.memory_space<vmem>>, vector<8x896xbf16>
    %c104_329 = arith.constant 104 : index
    %c0_330 = arith.constant 0 : index
    %373 = vector.load %arg8[%c104_329, %c0_330] : memref<224x896xbf16, #tpu.memory_space<vmem>>, vector<8x896xbf16>
    tpu.vector_store %arg8[%c104_329, %c0_330], %372 {strides = array<i32>} : memref<224x896xbf16, #tpu.memory_space<vmem>>, vector<8x896xbf16>,
    %c0_331 = arith.constant 0 : index
    %c129 = arith.constant 129 : index
    %374 = vector.load %arg9[%c0_331, %c129] : memref<8x1152xbf16, #tpu.memory_space<vmem>>, vector<8x896xbf16>
    %c112_332 = arith.constant 112 : index
    %c0_333 = arith.constant 0 : index
    %375 = vector.load %arg8[%c112_332, %c0_333] : memref<224x896xbf16, #tpu.memory_space<vmem>>, vector<8x896xbf16>
    tpu.vector_store %arg8[%c112_332, %c0_333], %374 {strides = array<i32>} : memref<224x896xbf16, #tpu.memory_space<vmem>>, vector<8x896xbf16>,
    %c0_334 = arith.constant 0 : index
    %c137 = arith.constant 137 : index
    %376 = vector.load %arg9[%c0_334, %c137] : memref<8x1152xbf16, #tpu.memory_space<vmem>>, vector<8x896xbf16>
    %c120_335 = arith.constant 120 : index
    %c0_336 = arith.constant 0 : index
    %377 = vector.load %arg8[%c120_335, %c0_336] : memref<224x896xbf16, #tpu.memory_space<vmem>>, vector<8x896xbf16>
    tpu.vector_store %arg8[%c120_335, %c0_336], %376 {strides = array<i32>} : memref<224x896xbf16, #tpu.memory_space<vmem>>, vector<8x896xbf16>,
    %c0_337 = arith.constant 0 : index
    %c138 = arith.constant 138 : index
    %378 = vector.load %arg9[%c0_337, %c138] : memref<8x1152xbf16, #tpu.memory_space<vmem>>, vector<8x896xbf16>
    %c128_338 = arith.constant 128 : index
    %c0_339 = arith.constant 0 : index
    %379 = vector.load %arg8[%c128_338, %c0_339] : memref<224x896xbf16, #tpu.memory_space<vmem>>, vector<8x896xbf16>
    tpu.vector_store %arg8[%c128_338, %c0_339], %378 {strides = array<i32>} : memref<224x896xbf16, #tpu.memory_space<vmem>>, vector<8x896xbf16>,
    %c0_340 = arith.constant 0 : index
    %c139 = arith.constant 139 : index
    %380 = vector.load %arg9[%c0_340, %c139] : memref<8x1152xbf16, #tpu.memory_space<vmem>>, vector<8x896xbf16>
    %c136_341 = arith.constant 136 : index
    %c0_342 = arith.constant 0 : index
    %381 = vector.load %arg8[%c136_341, %c0_342] : memref<224x896xbf16, #tpu.memory_space<vmem>>, vector<8x896xbf16>
    tpu.vector_store %arg8[%c136_341, %c0_342], %380 {strides = array<i32>} : memref<224x896xbf16, #tpu.memory_space<vmem>>, vector<8x896xbf16>,
    %c0_343 = arith.constant 0 : index
    %c217 = arith.constant 217 : index
    %382 = vector.load %arg9[%c0_343, %c217] : memref<8x1152xbf16, #tpu.memory_space<vmem>>, vector<8x896xbf16>
    %c144_344 = arith.constant 144 : index
    %c0_345 = arith.constant 0 : index
    %383 = vector.load %arg8[%c144_344, %c0_345] : memref<224x896xbf16, #tpu.memory_space<vmem>>, vector<8x896xbf16>
    tpu.vector_store %arg8[%c144_344, %c0_345], %382 {strides = array<i32>} : memref<224x896xbf16, #tpu.memory_space<vmem>>, vector<8x896xbf16>,
    %c0_346 = arith.constant 0 : index
    %c218 = arith.constant 218 : index
    %384 = vector.load %arg9[%c0_346, %c218] : memref<8x1152xbf16, #tpu.memory_space<vmem>>, vector<8x896xbf16>
    %c152_347 = arith.constant 152 : index
    %c0_348 = arith.constant 0 : index
    %385 = vector.load %arg8[%c152_347, %c0_348] : memref<224x896xbf16, #tpu.memory_space<vmem>>, vector<8x896xbf16>
    tpu.vector_store %arg8[%c152_347, %c0_348], %384 {strides = array<i32>} : memref<224x896xbf16, #tpu.memory_space<vmem>>, vector<8x896xbf16>,
    %c0_349 = arith.constant 0 : index
    %c219 = arith.constant 219 : index
    %386 = vector.load %arg9[%c0_349, %c219] : memref<8x1152xbf16, #tpu.memory_space<vmem>>, vector<8x896xbf16>
    %c160_350 = arith.constant 160 : index
    %c0_351 = arith.constant 0 : index
    %387 = vector.load %arg8[%c160_350, %c0_351] : memref<224x896xbf16, #tpu.memory_space<vmem>>, vector<8x896xbf16>
    tpu.vector_store %arg8[%c160_350, %c0_351], %386 {strides = array<i32>} : memref<224x896xbf16, #tpu.memory_space<vmem>>, vector<8x896xbf16>,
    %c0_352 = arith.constant 0 : index
    %c227 = arith.constant 227 : index
    %388 = vector.load %arg9[%c0_352, %c227] : memref<8x1152xbf16, #tpu.memory_space<vmem>>, vector<8x896xbf16>
    %c168_353 = arith.constant 168 : index
    %c0_354 = arith.constant 0 : index
    %389 = vector.load %arg8[%c168_353, %c0_354] : memref<224x896xbf16, #tpu.memory_space<vmem>>, vector<8x896xbf16>
    tpu.vector_store %arg8[%c168_353, %c0_354], %388 {strides = array<i32>} : memref<224x896xbf16, #tpu.memory_space<vmem>>, vector<8x896xbf16>,
    %c0_355 = arith.constant 0 : index
    %c228 = arith.constant 228 : index
    %390 = vector.load %arg9[%c0_355, %c228] : memref<8x1152xbf16, #tpu.memory_space<vmem>>, vector<8x896xbf16>
    %c176_356 = arith.constant 176 : index
    %c0_357 = arith.constant 0 : index
    %391 = vector.load %arg8[%c176_356, %c0_357] : memref<224x896xbf16, #tpu.memory_space<vmem>>, vector<8x896xbf16>
    tpu.vector_store %arg8[%c176_356, %c0_357], %390 {strides = array<i32>} : memref<224x896xbf16, #tpu.memory_space<vmem>>, vector<8x896xbf16>,
    %c0_358 = arith.constant 0 : index
    %c229 = arith.constant 229 : index
    %392 = vector.load %arg9[%c0_358, %c229] : memref<8x1152xbf16, #tpu.memory_space<vmem>>, vector<8x896xbf16>
    %c184_359 = arith.constant 184 : index
    %c0_360 = arith.constant 0 : index
    %393 = vector.load %arg8[%c184_359, %c0_360] : memref<224x896xbf16, #tpu.memory_space<vmem>>, vector<8x896xbf16>
    tpu.vector_store %arg8[%c184_359, %c0_360], %392 {strides = array<i32>} : memref<224x896xbf16, #tpu.memory_space<vmem>>, vector<8x896xbf16>,
    %c0_361 = arith.constant 0 : index
    %c237 = arith.constant 237 : index
    %394 = vector.load %arg9[%c0_361, %c237] : memref<8x1152xbf16, #tpu.memory_space<vmem>>, vector<8x896xbf16>
    %c192_362 = arith.constant 192 : index
    %c0_363 = arith.constant 0 : index
    %395 = vector.load %arg8[%c192_362, %c0_363] : memref<224x896xbf16, #tpu.memory_space<vmem>>, vector<8x896xbf16>
    tpu.vector_store %arg8[%c192_362, %c0_363], %394 {strides = array<i32>} : memref<224x896xbf16, #tpu.memory_space<vmem>>, vector<8x896xbf16>,
    %c0_364 = arith.constant 0 : index
    %c238 = arith.constant 238 : index
    %396 = vector.load %arg9[%c0_364, %c238] : memref<8x1152xbf16, #tpu.memory_space<vmem>>, vector<8x896xbf16>
    %c200_365 = arith.constant 200 : index
    %c0_366 = arith.constant 0 : index
    %397 = vector.load %arg8[%c200_365, %c0_366] : memref<224x896xbf16, #tpu.memory_space<vmem>>, vector<8x896xbf16>
    tpu.vector_store %arg8[%c200_365, %c0_366], %396 {strides = array<i32>} : memref<224x896xbf16, #tpu.memory_space<vmem>>, vector<8x896xbf16>,
    %c0_367 = arith.constant 0 : index
    %c239 = arith.constant 239 : index
    %398 = vector.load %arg9[%c0_367, %c239] : memref<8x1152xbf16, #tpu.memory_space<vmem>>, vector<8x896xbf16>
    %c208_368 = arith.constant 208 : index
    %c0_369 = arith.constant 0 : index
    %399 = vector.load %arg8[%c208_368, %c0_369] : memref<224x896xbf16, #tpu.memory_space<vmem>>, vector<8x896xbf16>
    tpu.vector_store %arg8[%c208_368, %c0_369], %398 {strides = array<i32>} : memref<224x896xbf16, #tpu.memory_space<vmem>>, vector<8x896xbf16>,
    %c0_370 = arith.constant 0 : index
    %c0_371 = arith.constant 0 : index
    %400 = vector.load %arg4[%c0_370, %c0_371] : memref<8x224xbf16, #tpu.memory_space<vmem>>, vector<8x224xbf16>
    %c0_372 = arith.constant 0 : index
    %c0_373 = arith.constant 0 : index
    %401 = vector.load %arg8[%c0_372, %c0_373] : memref<224x896xbf16, #tpu.memory_space<vmem>>, vector<224x896xbf16>
    %cst_374 = arith.constant dense<0.000000e+00> : vector<8x896xf32>
    %402 = tpu.matmul %400, %401, %cst_374 {dimension_numbers = #tpu.dot_dimension_numbers<[1], [0], [0], [1], [0, 0, 1, 1], [], []>} : vector<8x224xbf16>, vector<224x896xbf16>, vector<8x896xf32> -> vector<8x896xf32>
    %403 = vector.broadcast %3 : vector<1x896xf32> to vector<8x896xf32>
    %404 = arith.mulf %402, %403 : vector<8x896xf32>
    %cst_375 = arith.constant dense<0.000000e+00> : vector<8xf32>
    %405 = vector.multi_reduction <add>, %404, %cst_375 [1] : vector<8x896xf32> to vector<8xf32>
    %406 = vector.shape_cast %405 : vector<8xf32> to vector<8x1xf32>
    %cst_376 = arith.constant 0.001953125 : f32
    %407 = vector.broadcast %cst_376 : f32 to vector<8x1xf32>
    %408 = arith.mulf %406, %407 : vector<8x1xf32>
    %409 = vector.broadcast %408 : vector<8x1xf32> to vector<8x896xf32>
    %410 = arith.subf %402, %409 : vector<8x896xf32>
    %411 = vector.broadcast %3 : vector<1x896xf32> to vector<8x896xf32>
    %412 = arith.mulf %410, %411 : vector<8x896xf32>
    %413 = arith.mulf %412, %412 : vector<8x896xf32>
    %cst_377 = arith.constant dense<0.000000e+00> : vector<8xf32>
    %414 = vector.multi_reduction <add>, %413, %cst_377 [1] : vector<8x896xf32> to vector<8xf32>
    %415 = vector.shape_cast %414 : vector<8xf32> to vector<8x1xf32>
    %cst_378 = arith.constant 0.001953125 : f32
    %416 = vector.broadcast %cst_378 : f32 to vector<8x1xf32>
    %417 = arith.mulf %415, %416 : vector<8x1xf32>
    %cst_379 = arith.constant 9.99999974E-6 : f32
    %418 = vector.broadcast %cst_379 : f32 to vector<8x1xf32>
    %419 = arith.addf %417, %418 : vector<8x1xf32>
    %420 = math.rsqrt %419 : vector<8x1xf32>
    %421 = vector.broadcast %420 : vector<8x1xf32> to vector<8x896xf32>
    %422 = arith.mulf %410, %421 : vector<8x896xf32>
    %cst_380 = arith.constant 0.000000e+00 : f32
    %423 = vector.broadcast %cst_380 : f32 to vector<8x896xf32>
    %424 = arith.cmpf ogt, %422, %423 : vector<8x896xf32>
    %cst_381 = arith.constant 0.00999999977 : f32
    %425 = vector.broadcast %cst_381 : f32 to vector<8x896xf32>
    %426 = arith.mulf %425, %422 : vector<8x896xf32>
    %427 = arith.select %424, %422, %426 : vector<8x896xi1>, vector<8x896xf32>
    %c0_382 = arith.constant 0 : index
    %c0_383 = arith.constant 0 : index
    %c0_384 = arith.constant 0 : index
    %428 = vector.load %arg5[%c0_382, %c0_383, %c0_384] : memref<1x8x896xf32, #tpu.memory_space<vmem>>, vector<1x8x896xf32>
    %429 = vector.shape_cast %428 : vector<1x8x896xf32> to vector<8x896xf32>
    %430 = vector.shape_cast %427 : vector<8x896xf32> to vector<1x8x896xf32>
    tpu.vector_store %arg5[%c0_382, %c0_383, %c0_384], %430 {strides = array<i32>} : memref<1x8x896xf32, #tpu.memory_space<vmem>>, vector<1x8x896xf32>,
    return
  }
  func.func @transform_0(%arg0: i32) -> (i32, i32) {
    %c0_i32 = arith.constant 0 : i32
    %c0_i32_0 = arith.constant 0 : i32
    %c0_i32_1 = arith.constant 0 : i32
    return %c0_i32, %c0_i32_0 : i32, i32
  }
  func.func @transform_1(%arg0: i32) -> (i32, i32, i32) {
    %c0_i32 = arith.constant 0 : i32
    %c0_i32_0 = arith.constant 0 : i32
    %c0_i32_1 = arith.constant 0 : i32
    return %arg0, %c0_i32, %c0_i32_0 : i32, i32, i32
  }
  func.func @transform_2(%arg0: i32) -> (i32, i32) {
    %c0_i32 = arith.constant 0 : i32
    %c0_i32_0 = arith.constant 0 : i32
    %c0_i32_1 = arith.constant 0 : i32
    return %c0_i32, %c0_i32_0 : i32, i32
  }
  func.func @transform_3(%arg0: i32) -> (i32, i32) {
    %c0_i32 = arith.constant 0 : i32
    %c0_i32_0 = arith.constant 0 : i32
    %c0_i32_1 = arith.constant 0 : i32
    return %c0_i32, %c0_i32_0 : i32, i32
  }
  func.func @transform_4(%arg0: i32) -> (i32, i32, i32) {
    %c0_i32 = arith.constant 0 : i32
    %c0_i32_0 = arith.constant 0 : i32
    %c0_i32_1 = arith.constant 0 : i32
    return %arg0, %c0_i32, %c0_i32_0 : i32, i32, i32
  }
}

</mosaic_0001>

<bundles_post_ra>
// kernel: inconv_forward.1
= control target key start
LH: loop header
LB: loop body
LE: loop exit
PB: predicated region body
PF: predicated region fallthrough
CT: control target
= control target key end

     0   :  { %s5861_s15 = smov 0   ;;  %s7568_s0 = inlined_call_operand.vmem [shape: f32[1,896], index: 0, kind: input, shape index: {}]   ;;  %s7569_s1 = inlined_call_operand.vmem [shape: f32[2,4,512], index: 1, kind: input, shape index: {}]   ;;  %s7570_s2 = inlined_call_operand.vmem [shape: bf16[8,112], index: 2, kind: input, shape index: {}]   ;;  %s7571_s3 = inlined_call_operand.vmem [shape: bf16[8,224], index: 3, kind: input, shape index: {}]   ;;  %s7572_s4 = inlined_call_operand.vmem [shape: f32[2,8,896], index: 4, kind: output, shape index: {}]  }
   0x1 LB: > { %s5339_s16 = sadd.s32 4294967295, %s5747_s15   ;;  %p5343_p0 = scmp.ge.s32.totalorder %s5747_s15, 1  ;;  %s5747_s15 = sphi %s5861_s15, %s14_s15  }
   0x2   : > { %p162_p1 = scmp.lt.s32.totalorder %s5747_s15, 3 }
   0x4   : > { %p163_p2 = pnand %p5343_p0, %p162_p1 }
   0x5   : > { %p188_p3 = scmp.lt.s32.totalorder (!%p163_p2), %s5339_s16, 1  ;;  %p5347_p4 = scmp.ne.s32.totalorder (!%p163_p2), %s5339_s16, 0 }
   0x6   : > { %166 = sbr.rel (%p163_p2) target bundleno = 2007 (0x7d7), region = 36 }
   0xb   : > { %s189_s17 = scalar_select %p188_p3, %s5339_s16, 1 }
   0xc   : > { %202 = sbr.rel (%p5347_p4) target bundleno = 26 (0x1a), region = 40 }
   0xd   : > { %s5515_s18 = sshll.u32 %s189_s17, 4  ;;  %s5546_s19 = smul.u32 56, %s189_s17 }
   0xe   : > { %s5872_s22 = scalar_lea.vmem %s7569_s1, %s5515_s18 }
   0xf   : > { %s5877_s25 = scalar_lea.vmem %s7572_s4, %s5546_s19 }
  0x11   : > { %v5749_v0 = vmov 0  }
  0x12   : > { %203 = vst [vmem:[#allocation2] sm:$0xff] %v5749_v0  ;;  %204 = vst [vmem:[#allocation2 + $0x8] sm:$0xff] %v5749_v0 }
  0x13   : > { %205 = vst [vmem:[#allocation2 + $0x10] sm:$0x3] %v5749_v0  ;;  %206 = vst [vmem:[#allocation5] sm:$0xff] %v5749_v0 }
  0x14   : > { %207 = vst [vmem:[#allocation5 + $0x8] sm:$0xff] %v5749_v0  ;;  %208 = vst [vmem:[#allocation5 + $0x10] sm:$0xff] %v5749_v0 }
  0x15   : > { %209 = vst [vmem:[#allocation5 + $0x18] sm:$0xff] %v5749_v0  ;;  %210 = vst [vmem:[#allocation5 + $0x20] sm:$0xf] %v5749_v0 }
  0x16   : > { %211 = vst [vmem:[#allocation3 + $0x16c] sm:$0xcc] %v5749_v0  ;;  %212 = vst [vmem:[#allocation3 + $0x174] sm:$0xcc] %v5749_v0 }
  0x17   : > { %213 = vst [vmem:[#allocation3 + $0x17c] sm:$0xcc] %v5749_v0  ;;  %214 = vst [vmem:[#allocation3 + $0x184] sm:$0xc] %v5749_v0 }
  0x18   : > { %215 = vst [vmem:[#allocation4 + $0x2f4] sm:$0xff] %v5749_v0  ;;  %216 = vst [vmem:[#allocation4 + $0x2fc] sm:$0xff] %v5749_v0 }
  0x19   : > { %217 = vst [vmem:[#allocation4 + $0x304] sm:$0xff] %v5749_v0  ;;  %218 = vst [vmem:[#allocation4 + $0x30c] sm:$0xf] %v5749_v0 }
  0x1a PF: > { %v226_v1 = vlaneseq  ;;  %v255_v2 = vld [vmem:[%s5872_s22] sm:$0xf]  ;;  %v5750_v3 = vmov 1983009808   ;;  %s5751_s26 = smov 115   ;;  %s5752_s27 = smov 113  }
  0x1b   : > { %v224_v4 = vunpack.c.l.s4 %v5750_v3  ;;  %v235_v5 = vld [vmem:[%s5872_s22] sm:$0xf]  ;;  %v256_v10 = vpack.c.bf16 %v255_v2, %v255_v2  ;;  %s5753_s28 = smov 117   ;;  %s7588_s29 = smov 111   ;;  %v485_v53 = vld [vmem:[%s5872_s22 + $0x4] sm:$0xf] }
  0x1c   : > { %v5881_v6 = vshrl.u32 %v226_v1, 7  ;;  %v270_v7 = vld [vmem:[%s5872_s22] sm:$0xf]  ;;  %v236_v11 = vpack.c.bf16 %v235_v5, %v235_v5  ;;  %s5755_s30 = smov 121   ;;  %s7604_s5 = smov 119   ;;  %v486_v55 = vpack.c.bf16 %v485_v53, %v485_v53  ;;  %vm251_vm0 = vcmask 1042376  }
  0x1d   : > { %v220_v8 = vld [vmem:[%s5872_s22] sm:$0xf]  ;;  %v225_v9 = vunpack.c.0.s8 %v224_v4  ;;  %v271_v13 = vpack.c.bf16 %v270_v7, %v270_v7  ;;  %s5757_s6 = smov 125   ;;  %s5758_s7 = smov 123   ;;  %v470_v54 = vld [vmem:[%s5872_s22 + $0x4] sm:$0xf] }
  0x1e   : > { %v221_v14 = vpack.c.bf16 %v220_v8, %v220_v8  ;;  %v300_v15 = vld [vmem:[%s5872_s22] sm:$0xf]  ;;  %s5759_s8 = smov 21   ;;  %s7586_s9 = smov 19   ;;  %v471_v58 = vpack.c.bf16 %v470_v54, %v470_v54  ;;  %v515_v59 = vld [vmem:[%s5872_s22 + $0x4] sm:$0xf] }
  0x1f   : > { %v5886_v12 = vsub.s32 %v225_v9, %v5881_v6  ;;  %v285_v16 = vld [vmem:[%s5872_s22] sm:$0xf]  ;;  %v301_v19 = vpack.c.bf16 %v300_v15, %v300_v15  ;;  %s5761_s10 = smov 23   ;;  %s7606_s11 = smov 27   ;;  %v500_v60 = vld [vmem:[%s5872_s22 + $0x4] sm:$0xf]  ;;  %v516_v61 = vpack.c.bf16 %v515_v59, %v515_v59 }
  0x20   : > { %v286_v22 = vpack.c.bf16 %v285_v16, %v285_v16  ;;  %v330_v23 = vld [vmem:[%s5872_s22] sm:$0xf]  ;;  %s7573_s12 = smov 29   ;;  %s5764_s13 = smov 25   ;;  %v501_v0 = vpack.c.bf16 %v500_v60, %v500_v60  ;;  %v575_v1 = vld [vmem:[%s5872_s22 + $0x4] sm:$0xf] }
  0x21   : > { %v264_v17 = vrot.slane %v256_v10, %v5886_v12  ;;  %v244_v18 = vrot.slane %v236_v11, %v5886_v12  ;;  %v279_v20 = vrot.slane %v271_v13, %v5886_v12  ;;  %v229_v21 = vrot.slane %v221_v14, %v5886_v12  ;;  %v315_v24 = vld [vmem:[%s5872_s22] sm:$0xf]  ;;  %s5765_s14 = smov 33   ;;  %s5766_s16 = smov 31   ;;  %v530_v2 = vld [vmem:[%s5872_s22 + $0x4] sm:$0xf] }
  0x22   : > { %v331_v25 = vpack.c.bf16 %v330_v23, %v330_v23  ;;  %v309_v26 = vrot.slane %v301_v19, %v5886_v12  ;;  %v294_v27 = vrot.slane %v286_v22, %v5886_v12  ;;  %v316_v28 = vpack.c.bf16 %v315_v24, %v315_v24  ;;  %v360_v29 = vld [vmem:[%s5872_s22] sm:$0xf]  ;;  %s5767_s17 = smov 57   ;;  %s5768_s18 = smov 55   ;;  %v560_v8 = vld [vmem:[%s5872_s22 + $0x4] sm:$0xf] }
  0x23   : > { %265 = vrot.lane.b32.xlu1 %v264_v17, %s5751_s26  ;;  %245 = vrot.lane.b32.xlu0 %v244_v18, %s5752_s27  ;;  %v345_v30 = vld [vmem:[%s5872_s22] sm:$0xf]  ;;  %v361_v31 = vpack.c.bf16 %v360_v29, %v360_v29  ;;  %v494_v62 = vrot.slane %v486_v55, %v5886_v12  ;;  %v479_v63 = vrot.slane %v471_v58, %v5886_v12  ;;  %v545_v9 = vld [vmem:[%s5872_s22 + $0x4] sm:$0xf]  ;;  %s5769_s19 = smov 61   ;;  %s5770_s20 = smov 59  }
  0x24   : > { %v339_v32 = vrot.slane %v331_v25, %v5886_v12  ;;  %v324_v33 = vrot.slane %v316_v28, %v5886_v12  ;;  %v346_v34 = vpack.c.bf16 %v345_v30, %v345_v30  ;;  %v375_v35 = vld [vmem:[%s5872_s22] sm:$0xf]  ;;  %v524_v3 = vrot.slane %v516_v61, %v5886_v12  ;;  %v610_v15 = vld [vmem:[%s5872_s22 + $0x4] sm:$0xf]  ;;  %s5771_s21 = smov 69   ;;  %s5772_s23 = smov 63  }
  0x25   : > { %v405_v36 = vld [vmem:[%s5872_s22] sm:$0xf]  ;;  %v376_v37 = vpack.c.bf16 %v375_v35, %v375_v35  ;;  %v369_v38 = vrot.slane %v361_v31, %v5886_v12  ;;  %v509_v4 = vrot.slane %v501_v0, %v5886_v12  ;;  %v576_v5 = vpack.c.bf16 %v575_v1, %v575_v1  ;;  %v595_v16 = vld [vmem:[%s5872_s22 + $0x4] sm:$0xf]  ;;  %s5773_s24 = smov 67  }
  0x26   : > { %v354_v39 = vrot.slane %v346_v34, %v5886_v12  ;;  %v406_v40 = vpack.c.bf16 %v405_v36, %v405_v36  ;;  %v425_v41 = vld [vmem:[%s5872_s22] sm:$0xf]  ;;  %v531_v7 = vpack.c.bf16 %v530_v2, %v530_v2  ;;  %v561_v10 = vpack.c.bf16 %v560_v8, %v560_v8  ;;  %v625_v22 = vld [vmem:[%s5872_s22 + $0x4] sm:$0xf]  ;;  %v975_v58 = vld [vmem:[%s5872_s22 + $0xc] sm:$0xf] }
  0x27   : > { %280 = vrot.lane.b32.xlu1 %v279_v20, %s5753_s28  ;;  %230 = vrot.lane.b32.xlu0 %v229_v21, %s7588_s29  ;;  %v390_v42 = vld [vmem:[%s5872_s22] sm:$0xf]  ;;  %v384_v43 = vrot.slane %v376_v37, %v5886_v12  ;;  %v426_v45 = vpack.c.bf16 %v425_v41, %v425_v41  ;;  %v584_v11 = vrot.slane %v576_v5, %v5886_v12  ;;  %v885_v21 = vld [vmem:[%s5872_s22 + $0x8] sm:$0xf]  ;;  %vm252_vm1 = vcmask 3074  }
  0x28   : > { %v414_v44 = vrot.slane %v406_v40, %v5886_v12  ;;  %v391_v46 = vpack.c.bf16 %v390_v42, %v390_v42  ;;  %v455_v47 = vld [vmem:[%s5872_s22] sm:$0xf]  ;;  %v539_v13 = vrot.slane %v531_v7, %v5886_v12  ;;  %v546_v14 = vpack.c.bf16 %v545_v9, %v545_v9  ;;  %v640_v28 = vld [vmem:[%s5872_s22 + $0x4] sm:$0xf]  ;;  %v990_v0 = vld [vmem:[%s5872_s22 + $0xc] sm:$0xf] }
  0x29   : > { %v440_v48 = vld [vmem:[%s5872_s22] sm:$0xf]  ;;  %v456_v49 = vpack.c.bf16 %v455_v47, %v455_v47  ;;  %v434_v50 = vrot.slane %v426_v45, %v5886_v12  ;;  %v611_v17 = vpack.c.bf16 %v610_v15, %v610_v15  ;;  %v569_v18 = vrot.slane %v561_v10, %v5886_v12  ;;  %v655_v34 = vld [vmem:[%s5872_s22 + $0x4] sm:$0xf]  ;;  %v1034_v5 = vld [vmem:[%s5872_s22 + $0xc] sm:$0xf] }
  0x2a   : > { %v399_v51 = vrot.slane %v391_v46, %v5886_v12  ;;  %v441_v52 = vpack.c.bf16 %v440_v48, %v440_v48  ;;  %v554_v19 = vrot.slane %v546_v14, %v5886_v12  ;;  %v596_v20 = vpack.c.bf16 %v595_v16, %v595_v16  ;;  %v670_v40 = vld [vmem:[%s5872_s22 + $0x4] sm:$0xf]  ;;  %v930_v46 = vld [vmem:[%s5872_s22 + $0x8] sm:$0xf]  ;;  %vm6036_vm4 = vmor %vm252_vm1, %vm251_vm0 }
  0x2b   : > { %310 = vrot.lane.b32.xlu1 %v309_v26, %s5755_s30  ;;  %295 = vrot.lane.b32.xlu0 %v294_v27, %s7604_s5  ;;  %v464_v56 = vrot.slane %v456_v49, %v5886_v12  ;;  %v886_v23 = vpack.c.bf16 %v885_v21, %v885_v21  ;;  %v619_v24 = vrot.slane %v611_v17, %v5886_v12  ;;  %v900_v27 = vld [vmem:[%s5872_s22 + $0x8] sm:$0xf]  ;;  %v685_v45 = vld [vmem:[%s5872_s22 + $0x4] sm:$0xf]  ;;  %vm248_vm2 = vcmask 924672  }
  0x2c   : > { %v449_v57 = vrot.slane %v441_v52, %v5886_v12  ;;  %v604_v25 = vrot.slane %v596_v20, %v5886_v12  ;;  %v626_v26 = vpack.c.bf16 %v625_v22, %v625_v22  ;;  %v901_v31 = vpack.c.bf16 %v900_v27, %v900_v27  ;;  %v945_v52 = vld [vmem:[%s5872_s22 + $0x8] sm:$0xf] }
  0x2d   : > { %v894_v29 = vrot.slane %v886_v23, %v5886_v12  ;;  %v686_v47 = vpack.c.bf16 %v685_v45, %v685_v45  ;;  %v750_v7 = vld [vmem:[%s5872_s22 + $0x8] sm:$0xf]  ;;  %v1035_v8 = vpack.c.bf16 %v1034_v5, %v1034_v5  ;;  %vm233_vm3 = vcmask 968568  }
  0x2e   : > { %v634_v30 = vrot.slane %v626_v26, %v5886_v12  ;;  %v909_v36 = vrot.slane %v901_v31, %v5886_v12  ;;  %v765_v14 = vld [vmem:[%s5872_s22 + $0x8] sm:$0xf]  ;;  %v1051_v26 = vld [vmem:[%s5872_s22 + $0xc] sm:$0xf]  ;;  %vm268_vm5 = vcmask 82968   ;;  %vm283_vm6 = vcmask 164968  }
  0x2f   : > { %340 = vrot.lane.b32.xlu1 %v339_v32, %s5757_s6  ;;  %325 = vrot.lane.b32.xlu0 %v324_v33, %s5758_s7  ;;  %s5774_s6 = smov 65   ;;  %s5775_s7 = smov 93   ;;  %v641_v32 = vpack.c.bf16 %v640_v28, %v640_v28  ;;  %v915_v33 = vld [vmem:[%s5872_s22 + $0x8] sm:$0xf]  ;;  %v694_v53 = vrot.slane %v686_v47, %v5886_v12  ;;  %v1043_v15 = vrot.slane %v1035_v8, %v5886_v12  ;;  %vm298_vm7 = vcmask 246968  }
  0x30   : > { %v916_v35 = vpack.c.bf16 %v915_v33, %v915_v33  ;;  %v780_v20 = vld [vmem:[%s5872_s22 + $0x8] sm:$0xf]  ;;  %vm313_vm8 = vcmask 328968   ;;  %vm7581_vm9 = vcmask 410968   ;;  %vm7580_vm10 = vcmask 492968  }
  0x31   : > { %v649_v37 = vrot.slane %v641_v32, %v5886_v12  ;;  %v810_v31 = vld [vmem:[%s5872_s22 + $0x8] sm:$0xf]  ;;  %v1065_v32 = vld [vmem:[%s5872_s22 + $0xc] sm:$0xf]  ;;  %vm7577_vm11 = vcmask 738968   ;;  %vm7575_vm12 = vcmask 820968  }
  0x32   : > { %v924_v42 = vrot.slane %v916_v35, %v5886_v12  ;;  %v811_v33 = vpack.c.bf16 %v810_v31, %v810_v31  ;;  %vm7576_vm13 = vcmask 902968   ;;  %vm421_vm14 = vcmask 1042392  }
  0x33   : > { %370 = vrot.lane.b32.xlu1 %v369_v38, %s5759_s8  ;;  %355 = vrot.lane.b32.xlu0 %v354_v39, %s7586_s9  ;;  %s7596_s8 = smov 91   ;;  %v656_v38 = vpack.c.bf16 %v655_v34, %v655_v34  ;;  %v715_v39 = vld [vmem:[%s5872_s22 + $0x8] sm:$0xf]  ;;  %vm422_vm15 = vcmask 19458   ;;  %vm7578_vm0 = vcmask 220160   ;;  %vm7579_vm1 = vcmask 984968  }
  0x34   : > { %v716_v41 = vpack.c.bf16 %v715_v39, %v715_v39  ;;  %v819_v39 = vrot.slane %v811_v33, %v5886_v12  ;;  %s5815_s9 = smov 56  }
  0x36   : > { %v724_v48 = vrot.slane %v716_v41, %v5886_v12 }
  0x37   : > { %385 = vrot.lane.b32.xlu1 %v384_v43, %s5761_s10  ;;  %415 = vrot.lane.b32.xlu0 %v414_v44, %s7606_s11  ;;  %s5777_s10 = smov 41   ;;  %v664_v43 = vrot.slane %v656_v38, %v5886_v12  ;;  %v671_v44 = vpack.c.bf16 %v670_v40, %v670_v40  ;;  %v1079_v38 = vld [vmem:[%s5872_s22 + $0xc] sm:$0xf] }
  0x39   : > { %v679_v49 = vrot.slane %v671_v44, %v5886_v12  ;;  %v1093_v44 = vld [vmem:[%s5872_s22 + $0xc] sm:$0xf] }
  0x3b   : > { %435 = vrot.lane.b32.xlu1 %v434_v50, %s7573_s12  ;;  %400 = vrot.lane.b32.xlu0 %v399_v51, %s5764_s13  ;;  %s5778_s13 = smov 95   ;;  %v931_v50 = vpack.c.bf16 %v930_v46, %v930_v46  ;;  %v700_v51 = vld [vmem:[%s5872_s22 + $0x4] sm:$0xf]  ;;  %s7582_s12 = smov 39  }
  0x3c   : > { %v701_v55 = vpack.c.bf16 %v700_v51, %v700_v51 }
  0x3d   : > { %v939_v54 = vrot.slane %v931_v50, %v5886_v12  ;;  %v1107_v50 = vld [vmem:[%s5872_s22 + $0xc] sm:$0xf] }
  0x3e   : > { %v709_v60 = vrot.slane %v701_v55, %v5886_v12  ;;  %v870_v55 = vld [vmem:[%s5872_s22 + $0x8] sm:$0xf] }
  0x3f   : > { %465 = vrot.lane.b32.xlu1 %v464_v56, %s5765_s14  ;;  %450 = vrot.lane.b32.xlu0 %v449_v57, %s5766_s16  ;;  %s5779_s14 = smov 43   ;;  %s5780_s16 = smov 97   ;;  %v946_v56 = vpack.c.bf16 %v945_v52, %v945_v52  ;;  %v960_v57 = vld [vmem:[%s5872_s22 + $0xc] sm:$0xf] }
  0x40   : > { %v961_v59 = vpack.c.bf16 %v960_v57, %v960_v57 }
  0x41   : > { %v954_v61 = vrot.slane %v946_v56, %v5886_v12  ;;  %v1122_v56 = vld [vmem:[%s5872_s22 + $0xc] sm:$0xf] }
  0x42   : > { %v969_v2 = vrot.slane %v961_v59, %v5886_v12  ;;  %v871_v59 = vpack.c.bf16 %v870_v55, %v870_v55 }
  0x43   : > { %495 = vrot.lane.b32.xlu1 %v494_v62, %s5767_s17  ;;  %480 = vrot.lane.b32.xlu0 %v479_v63, %s5768_s18  ;;  %s5781_s17 = smov 45   ;;  %v976_v62 = vpack.c.bf16 %v975_v58, %v975_v58  ;;  %v735_v63 = vld [vmem:[%s5872_s22 + $0x8] sm:$0xf] }
  0x44   : > { %v736_v1 = vpack.c.bf16 %v735_v63, %v735_v63 }
  0x46   : > { %v744_v9 = vrot.slane %v736_v1, %v5886_v12 }
  0x47   : > { %525 = vrot.lane.b32.xlu1 %v524_v3, %s5769_s19  ;;  %510 = vrot.lane.b32.xlu0 %v509_v4, %s5770_s20  ;;  %s7594_s19 = smov 99   ;;  %s5783_s20 = smov 127   ;;  %v984_v3 = vrot.slane %v976_v62, %v5886_v12  ;;  %v991_v4 = vpack.c.bf16 %v990_v0, %v990_v0  ;;  %v1151_v62 = vld [vmem:[%s5872_s22 + $0xc] sm:$0xf]  ;;  %v879_v0 = vrot.slane %v871_v59, %v5886_v12 }
  0x49   : > { %v999_v10 = vrot.slane %v991_v4, %v5886_v12  ;;  %v1179_v4 = vld [vmem:[%s5872_s22 + $0xc] sm:$0xf] }
  0x4b   : > { %585 = vrot.lane.b32.xlu1 %v584_v11, %s5771_s21  ;;  %540 = vrot.lane.b32.xlu0 %v539_v13, %s5772_s23  ;;  %s7590_s21 = smov 101   ;;  %s5785_s23 = smov 103   ;;  %v751_v11 = vpack.c.bf16 %v750_v7, %v750_v7  ;;  %v1005_v13 = vld [vmem:[%s5872_s22 + $0xc] sm:$0xf] }
  0x4c   : > { %v1006_v17 = vpack.c.bf16 %v1005_v13, %v1005_v13  ;;  %v1180_v13 = vpack.c.bf16 %v1179_v4, %v1179_v4 }
  0x4d   : > { %v759_v16 = vrot.slane %v751_v11, %v5886_v12 }
  0x4e   : > { %v1014_v22 = vrot.slane %v1006_v17, %v5886_v12 }
  0x4f   : > { %570 = vrot.lane.b32.xlu1 %v569_v18, %s5773_s24  ;;  %555 = vrot.lane.b32.xlu0 %v554_v19, %s5774_s6  ;;  %s5786_s24 = smov 47   ;;  %s5787_s6 = smov 105   ;;  %v766_v18 = vpack.c.bf16 %v765_v14, %v765_v14  ;;  %v1020_v19 = vld [vmem:[%s5872_s22 + $0xc] sm:$0xf] }
  0x50   : > { %v1021_v21 = vpack.c.bf16 %v1020_v19, %v1020_v19  ;;  %v1188_v19 = vrot.slane %v1180_v13, %v5886_v12 }
  0x51   : > { %v774_v23 = vrot.slane %v766_v18, %v5886_v12 }
  0x52   : > { %v1029_v28 = vrot.slane %v1021_v21, %v5886_v12 }
  0x53   : > { %620 = vrot.lane.b32.xlu1 %v619_v24, %s5775_s7  ;;  %605 = vrot.lane.b32.xlu0 %v604_v25, %s7596_s8  ;;  %s5788_s7 = smov 49   ;;  %v781_v24 = vpack.c.bf16 %v780_v20, %v780_v20  ;;  %v795_v25 = vld [vmem:[%s5872_s22 + $0x8] sm:$0xf]  ;;  %s5820_s8 = smov 106  }
  0x54   : > { %v796_v27 = vpack.c.bf16 %v795_v25, %v795_v25 }
  0x56   : > { %v804_v34 = vrot.slane %v796_v27, %v5886_v12 }
  0x57   : > { %895 = vrot.lane.b32.xlu1 %v894_v29, %s5777_s10  ;;  %635 = vrot.lane.b32.xlu0 %v634_v30, %s5778_s13  ;;  %s5789_s10 = smov 71   ;;  %s5790_s13 = smov 73   ;;  %v789_v29 = vrot.slane %v781_v24, %v5886_v12  ;;  %v1052_v30 = vpack.c.bf16 %v1051_v26, %v1051_v26 }
  0x59   : > { %v1060_v35 = vrot.slane %v1052_v30, %v5886_v12 }
  0x5b   : > { %910 = vrot.lane.b32.xlu1 %v909_v36, %s5779_s14  ;;  %650 = vrot.lane.b32.xlu0 %v649_v37, %s5780_s16  ;;  %s7602_s14 = smov 1   ;;  %s5792_s16 = smov 75   ;;  %v1066_v36 = vpack.c.bf16 %v1065_v32, %v1065_v32  ;;  %v825_v37 = vld [vmem:[%s5872_s22 + $0x8] sm:$0xf] }
  0x5c   : > { %v826_v41 = vpack.c.bf16 %v825_v37, %v825_v37 }
  0x5d   : > { %v1074_v40 = vrot.slane %v1066_v36, %v5886_v12 }
  0x5e   : > { %v834_v46 = vrot.slane %v826_v41, %v5886_v12 }
  0x5f   : > { %925 = vrot.lane.b32.xlu1 %v924_v42, %s5781_s17  ;;  %665 = vrot.lane.b32.xlu0 %v664_v43, %s7594_s19  ;;  %v1080_v42 = vpack.c.bf16 %v1079_v38, %v1079_v38  ;;  %v840_v43 = vld [vmem:[%s5872_s22 + $0x8] sm:$0xf]  ;;  %s5819_s19 = smov 8  }
  0x60   : > { %v841_v45 = vpack.c.bf16 %v840_v43, %v840_v43 }
  0x61   : > { %v1088_v47 = vrot.slane %v1080_v42, %v5886_v12 }
  0x62   : > { %v849_v52 = vrot.slane %v841_v45, %v5886_v12 }
  0x63   : > { %725 = vrot.lane.b32.xlu1 %v724_v48, %s5783_s20  ;;  %680 = vrot.lane.b32.xlu0 %v679_v49, %s7590_s21  ;;  %v1094_v48 = vpack.c.bf16 %v1093_v44, %v1093_v44  ;;  %v855_v49 = vld [vmem:[%s5872_s22 + $0x8] sm:$0xf]  ;;  %s7626_s21 = smov 17  }
  0x64   : > { %v856_v51 = vpack.c.bf16 %v855_v49, %v855_v49 }
  0x66   : > { %v864_v57 = vrot.slane %v856_v51, %v5886_v12 }
  0x67   : > { %695 = vrot.lane.b32.xlu1 %v694_v53, %s5785_s23  ;;  %940 = vrot.lane.b32.xlu0 %v939_v54, %s5786_s24  ;;  %s5793_s23 = smov 81   ;;  %s5794_s24 = smov 3   ;;  %v1102_v53 = vrot.slane %v1094_v48, %v5886_v12  ;;  %v1108_v54 = vpack.c.bf16 %v1107_v50, %v1107_v50 }
  0x69   : > { %v1116_v58 = vrot.slane %v1108_v54, %v5886_v12 }
  0x6b   : > { %710 = vrot.lane.b32.xlu1 %v709_v60, %s5787_s6  ;;  %955 = vrot.lane.b32.xlu0 %v954_v61, %s5788_s7  ;;  %s5795_s6 = smov 77   ;;  %s5796_s7 = smov 5   ;;  %v1123_v60 = vpack.c.bf16 %v1122_v56, %v1122_v56  ;;  %v1137_v61 = vld [vmem:[%s5872_s22 + $0xc] sm:$0xf] }
  0x6c   : > { %v1138_v63 = vpack.c.bf16 %v1137_v61, %v1137_v61 }
  0x6d   : > { %v1131_v1 = vrot.slane %v1123_v60, %v5886_v12 }
  0x6f   : > { %970 = vrot.lane.b32.xlu0 %v969_v2, %s5789_s10  ;;  %985 = vrot.lane.b32.xlu1 %v984_v3, %s5790_s13  ;;  %s5797_s10 = smov 79   ;;  %s5798_s13 = smov 7   ;;  %v1152_v2 = vpack.c.bf16 %v1151_v62, %v1151_v62  ;;  %v1165_v3 = vld [vmem:[%s5872_s22 + $0xc] sm:$0xf] }
  0x70   : > { %s5809_s22 = smov 36  }
  0x71   : > { %v1160_v11 = vrot.slane %v1152_v2, %v5886_v12 }
  0x73   : > { %745 = vrot.lane.b32.xlu0 %v744_v9, %s7602_s14  ;;  %1000 = vrot.lane.b32.xlu1 %v999_v10, %s5792_s16  ;;  %s7600_s16 = smov 9   ;;  %v1166_v9 = vpack.c.bf16 %v1165_v3, %v1165_v3  ;;  %v1146_v10 = vrot.slane %v1138_v63, %v5886_v12  ;;  %s5823_s14 = smov 116  }
  0x75   : > { %v1174_v18 = vrot.slane %v1166_v9, %v5886_v12 }
  0x77   : > { %1044 = vrot.lane.b32.xlu0 %v1043_v15, %s5793_s23  ;;  %760 = vrot.lane.b32.xlu1 %v759_v16, %s5794_s24  ;;  %s5800_s23 = smov 83   ;;  %s7598_s24 = smov 11  }
  0x7b   : > { %1015 = vrot.lane.b32.xlu0 %v1014_v22, %s5795_s6  ;;  %775 = vrot.lane.b32.xlu1 %v774_v23, %s5796_s7  ;;  %s5802_s6 = smov 85   ;;  %s5803_s7 = smov 13  }
  0x7f   : > { %1030 = vrot.lane.b32.xlu0 %v1029_v28, %s5797_s10  ;;  %790 = vrot.lane.b32.xlu1 %v789_v29, %s5798_s13  ;;  %s5804_s10 = smov 107  }
  0x83   : > { %805 = vrot.lane.b32.xlu0 %v804_v34, %s7600_s16  ;;  %1061 = vrot.lane.b32.xlu1 %v1060_v35, %s5800_s23  ;;  %s5805_s23 = smov 35   ;;  %s7608_s16 = smov 26  }
  0x87   : > { %820 = vrot.lane.b32.xlu0 %v819_v39, %s7598_s24  ;;  %1075 = vrot.lane.b32.xlu1 %v1074_v40, %s5802_s6  ;;  %s7592_s6 = smov 109   ;;  %s7624_s24 = smov 28  }
  0x8b   : > { %835 = vrot.lane.b32.xlu0 %v834_v46, %s5803_s7  ;;  %1089 = vrot.lane.b32.xlu1 %v1088_v47, %s5804_s10  ;;  %s7584_s7 = smov 37  }
  0x8f   : > { %850 = vrot.lane.b32.xlu0 %v849_v52, %s5805_s23  ;;  %1103 = vrot.lane.b32.xlu1 %v1102_v53, %s7592_s6  ;;  %s5818_s6 = smov 16  }
  0x93   : > { %865 = vrot.lane.b32.xlu0 %v864_v57, %s7584_s7  ;;  %1117 = vrot.lane.b32.xlu1 %v1116_v58, %s7588_s29  ;;  %s5814_s7 = smov 44   ;;  %s7625_s29 = smov 18  }
  0x95   : > { %v266_v5 = vpop.permute.xlu1 %265  ;;  %v246_v7 = vpop.permute.xlu0 %245 }
  0x96   : > { %v247_v8 = vrot.slane %v246_v7, 6 }
  0x97   : > { %880 = vrot.lane.b32.xlu0 %v879_v0, %s7582_s12  ;;  %1132 = vrot.lane.b32.xlu1 %v1131_v1, %s5752_s27  ;;  %s5811_s27 = smov 34   ;;  %s5813_s12 = smov 6  }
  0x98   : > { %v249_v17 = vsel %vm248_vm2, %v247_v8, %v246_v7  ;;  %vm423_vm2 = vmor %vm422_vm15, %vm421_vm14  ;;  %vm513_vm14 = vcmask 673368   ;;  %vm528_vm15 = vcmask 755368  }
  0x99   : > { %v281_v15 = vpop.permute.xlu1 %280  ;;  %v231_v16 = vpop.permute.xlu0 %230 }
  0x9a   : > { %234 = vst.msk [vmem:[#allocation2] sm:$0x3] %vm233_vm3, %v231_v16 }
  0x9b   : > { %254 = vst.msk [vmem:[#allocation2] sm:$0xf] %vm6036_vm4, %v249_v17  ;;  %1147 = vrot.lane.b32.xlu0 %v1146_v10, %s5751_s26  ;;  %1161 = vrot.lane.b32.xlu1 %v1160_v11, %s5753_s28  ;;  %s5810_s26 = smov 54  }
  0x9c   : > { %269 = vst.msk [vmem:[#allocation2 + $0x2] sm:$0x3] %vm268_vm5, %v266_v5 }
  0x9d   : > { %v311_v20 = vpop.permute.xlu1 %310  ;;  %284 = vst.msk [vmem:[#allocation2 + $0x2] sm:$0x3] %vm283_vm6, %v281_v15  ;;  %v296_v21 = vpop.permute.xlu0 %295 }
  0x9e   : > { %299 = vst.msk [vmem:[#allocation2 + $0x2] sm:$0x3] %vm298_vm7, %v296_v21  ;;  %vm438_vm7 = vcmask 99368  }
  0x9f   : > { %1175 = vrot.lane.b32.xlu0 %v1174_v18, %s7604_s5  ;;  %1189 = vrot.lane.b32.xlu1 %v1188_v19, %s5755_s30  ;;  %314 = vst.msk [vmem:[#allocation2 + $0x2] sm:$0x3] %vm313_vm8, %v311_v20  ;;  %vm453_vm8 = vcmask 181368   ;;  %s5812_s30 = smov 46   ;;  %s5824_s5 = smov 108  }
  0xa1   : > { %v341_v22 = vpop.permute.xlu1 %340  ;;  %v326_v23 = vpop.permute.xlu0 %325 }
  0xa2   : > { %329 = vst.msk [vmem:[#allocation2 + $0x2] sm:$0x3] %vm7581_vm9, %v326_v23  ;;  %vm653_vm9 = vcmask 525768  }
  0xa3   : > { %344 = vst.msk [vmem:[#allocation2 + $0x2] sm:$0x3] %vm7580_vm10, %v341_v22 }
  0xa5   : > { %v371_v24 = vpop.permute.xlu1 %370  ;;  %v356_v25 = vpop.permute.xlu0 %355 }
  0xa6   : > { %359 = vst.msk [vmem:[#allocation2 + $0x2] sm:$0x3] %vm7577_vm11, %v356_v25  ;;  %vm498_vm11 = vcmask 591368  }
  0xa7   : > { %374 = vst.msk [vmem:[#allocation2 + $0x2] sm:$0x3] %vm7575_vm12, %v371_v24  ;;  %vm468_vm12 = vcmask 263368  }
  0xa9   : > { %v386_v26 = vpop.permute.xlu1 %385  ;;  %v416_v27 = vpop.permute.xlu0 %415 }
  0xaa   : > { %389 = vst.msk [vmem:[#allocation2 + $0x2] sm:$0x3] %vm7576_vm13, %v386_v26  ;;  %v417_v28 = vrot.slane %v416_v27, 6  ;;  %vm483_vm13 = vcmask 509368  }
  0xac   : > { %v419_v31 = vsel %vm7578_vm0, %v417_v28, %v416_v27  ;;  %vm592_vm0 = vcmask 35842  }
  0xad   : > { %v436_v29 = vpop.permute.xlu1 %435  ;;  %v401_v30 = vpop.permute.xlu0 %400 }
  0xae   : > { %404 = vst.msk [vmem:[#allocation2 + $0x2] sm:$0x3] %vm7579_vm1, %v401_v30  ;;  %vm573_vm1 = vcmask 1001368  }
  0xaf   : > { %424 = vst.msk [vmem:[#allocation2 + $0x2] sm:$0xf] %vm423_vm2, %v419_v31  ;;  %vm543_vm2 = vcmask 837368  }
  0xb0   : > { %439 = vst.msk [vmem:[#allocation2 + $0x4] sm:$0x3] %vm438_vm7, %v436_v29  ;;  %vm591_vm7 = vcmask 1042408  }
  0xb1   : > { %v466_v32 = vpop.permute.xlu1 %465  ;;  %v451_v33 = vpop.permute.xlu0 %450  ;;  %vm593_vm10 = vmor %vm592_vm0, %vm591_vm7  ;;  %vm928_vm0 = vcmask 230568   ;;  %vm698_vm7 = vcmask 771768  }
  0xb2   : > { %454 = vst.msk [vmem:[#allocation2 + $0x4] sm:$0x3] %vm453_vm8, %v451_v33  ;;  %vm588_vm8 = vcmask 564224  }
  0xb3   : > { %469 = vst.msk [vmem:[#allocation2 + $0x4] sm:$0x3] %vm468_vm12, %v466_v32  ;;  %vm558_vm12 = vcmask 919368  }
  0xb5   : > { %v496_v34 = vpop.permute.xlu1 %495  ;;  %v481_v35 = vpop.permute.xlu0 %480 }
  0xb6   : > { %484 = vst.msk [vmem:[#allocation2 + $0x4] sm:$0x3] %vm483_vm13, %v481_v35  ;;  %vm623_vm13 = vcmask 361768  }
  0xb7   : > { %499 = vst.msk [vmem:[#allocation2 + $0x4] sm:$0x3] %vm498_vm11, %v496_v34  ;;  %vm608_vm11 = vcmask 279768  }
  0xb9   : > { %v526_v36 = vpop.permute.xlu1 %525  ;;  %v511_v37 = vpop.permute.xlu0 %510 }
  0xba   : > { %514 = vst.msk [vmem:[#allocation2 + $0x4] sm:$0x3] %vm513_vm14, %v511_v37  ;;  %vm898_vm14 = vcmask 66568  }
  0xbb   : > { %529 = vst.msk [vmem:[#allocation2 + $0x4] sm:$0x3] %vm528_vm15, %v526_v36  ;;  %vm638_vm15 = vcmask 443768  }
  0xbd   : > { %v586_v38 = vpop.permute.xlu1 %585  ;;  %v541_v39 = vpop.permute.xlu0 %540 }
  0xbe   : > { %544 = vst.msk [vmem:[#allocation2 + $0x4] sm:$0x3] %vm543_vm2, %v541_v39  ;;  %v587_v40 = vrot.slane %v586_v38, 6  ;;  %vm913_vm2 = vcmask 148568  }
  0xc0   : > { %v589_v43 = vsel %vm588_vm8, %v587_v40, %v586_v38  ;;  %vm731_vm8 = vcmask 1042424  }
  0xc1   : > { %v571_v41 = vpop.permute.xlu1 %570  ;;  %v556_v42 = vpop.permute.xlu0 %555 }
  0xc2   : > { %559 = vst.msk [vmem:[#allocation2 + $0x4] sm:$0x3] %vm558_vm12, %v556_v42  ;;  %vm943_vm12 = vcmask 312568  }
  0xc3   : > { %574 = vst.msk [vmem:[#allocation2 + $0x4] sm:$0x3] %vm573_vm1, %v571_v41  ;;  %vm668_vm1 = vcmask 607768  }
  0xc4   : > { %594 = vst.msk [vmem:[#allocation2 + $0x4] sm:$0xf] %vm593_vm10, %v589_v43  ;;  %vm683_vm10 = vcmask 689768  }
  0xc5   : > { %v621_v44 = vpop.permute.xlu1 %620  ;;  %v606_v45 = vpop.permute.xlu0 %605 }
  0xc6   : > { %609 = vst.msk [vmem:[#allocation2 + $0x6] sm:$0x3] %vm608_vm11, %v606_v45  ;;  %vm732_vm11 = vcmask 52226  }
  0xc7   : > { %624 = vst.msk [vmem:[#allocation2 + $0x6] sm:$0x3] %vm623_vm13, %v621_v44  ;;  %vm713_vm13 = vcmask 853768  }
  0xc9   : > { %v896_v46 = vpop.permute.xlu1 %895  ;;  %v636_v47 = vpop.permute.xlu0 %635 }
  0xca   : > { %899 = vst.msk [vmem:[#allocation2 + $0xa] sm:$0x3] %vm898_vm14, %v896_v46  ;;  %vm958_vm14 = vcmask 394568  }
  0xcb   : > { %639 = vst.msk [vmem:[#allocation2 + $0x6] sm:$0x3] %vm638_vm15, %v636_v47  ;;  %vm733_vm15 = vmor %vm732_vm11, %vm731_vm8  ;;  %vm778_vm8 = vcmask 296168   ;;  %vm1047_vm11 = vcmask 662528  }
  0xcd   : > { %v911_v48 = vpop.permute.xlu1 %910  ;;  %v651_v49 = vpop.permute.xlu0 %650 }
  0xce   : > { %914 = vst.msk [vmem:[#allocation2 + $0xa] sm:$0x3] %vm913_vm2, %v911_v48  ;;  %vm973_vm2 = vcmask 640568  }
  0xcf   : > { %654 = vst.msk [vmem:[#allocation2 + $0x6] sm:$0x3] %vm653_vm9, %v651_v49  ;;  %vm7623_vm9 = vcmask 1039360  }
  0xd1   : > { %v926_v50 = vpop.permute.xlu1 %925  ;;  %v666_v51 = vpop.permute.xlu0 %665 }
  0xd2   : > { %929 = vst.msk [vmem:[#allocation2 + $0xa] sm:$0x3] %vm928_vm0, %v926_v50  ;;  %vm988_vm0 = vcmask 722568  }
  0xd3   : > { %669 = vst.msk [vmem:[#allocation2 + $0x6] sm:$0x3] %vm668_vm1, %v666_v51  ;;  %vm748_vm1 = vcmask 132168  }
  0xd5   : > { %v726_v52 = vpop.permute.xlu1 %725  ;;  %v681_v53 = vpop.permute.xlu0 %680 }
  0xd6   : > { %684 = vst.msk [vmem:[#allocation2 + $0x6] sm:$0x3] %vm683_vm10, %v681_v53  ;;  %v727_v56 = vrot.slane %v726_v52, 6  ;;  %vm1003_vm10 = vcmask 804568  }
  0xd8   : > { %v729_v59 = vsel %vm7623_vm9, %v727_v56, %v726_v52 }
  0xd9   : > { %v696_v54 = vpop.permute.xlu1 %695  ;;  %v941_v55 = vpop.permute.xlu0 %940 }
  0xda   : > { %699 = vst.msk [vmem:[#allocation2 + $0x6] sm:$0x3] %vm698_vm7, %v696_v54  ;;  %vm763_vm7 = vcmask 214168  }
  0xdb   : > { %944 = vst.msk [vmem:[#allocation2 + $0xa] sm:$0x3] %vm943_vm12, %v941_v55  ;;  %vm1018_vm12 = vcmask 886568  }
  0xdd   : > { %v711_v57 = vpop.permute.xlu1 %710  ;;  %v956_v58 = vpop.permute.xlu0 %955 }
  0xde   : > { %714 = vst.msk [vmem:[#allocation2 + $0x6] sm:$0x3] %vm713_vm13, %v711_v57  ;;  %vm793_vm13 = vcmask 378168  }
  0xdf   : > { %959 = vst.msk [vmem:[#allocation2 + $0xa] sm:$0x3] %vm958_vm14, %v956_v58  ;;  %vm808_vm14 = vcmask 460168  }
  0xe0   : > { %734 = vst.msk [vmem:[#allocation2 + $0x6] sm:$0xf] %vm733_vm15, %v729_v59  ;;  %vm823_vm15 = vcmask 542168  }
  0xe1   : > { %v971_v60 = vpop.permute.xlu0 %970  ;;  %v986_v61 = vpop.permute.xlu1 %985 }
  0xe2   : > { %974 = vst.msk [vmem:[#allocation2 + $0xa] sm:$0x3] %vm973_vm2, %v971_v60  ;;  %vm838_vm2 = vcmask 624168  }
  0xe3   : > { %989 = vst.msk [vmem:[#allocation2 + $0xa] sm:$0x3] %vm988_vm0, %v986_v61  ;;  %vm853_vm0 = vcmask 870168  }
  0xe5   : > { %v746_v62 = vpop.permute.xlu0 %745  ;;  %v1001_v63 = vpop.permute.xlu1 %1000 }
  0xe6   : > { %749 = vst.msk [vmem:[#allocation2 + $0x8] sm:$0x3] %vm748_vm1, %v746_v62  ;;  %vm868_vm1 = vcmask 952168  }
  0xe7   : > { %v6059_v0 = vld [vmem:[#allocation2] sm:$0xff]  ;;  %1004 = vst.msk [vmem:[#allocation2 + $0xa] sm:$0x3] %vm1003_vm10, %v1001_v63  ;;  %vm883_vm10 = vcmask 1034168  }
  0xe8   : > { %v6063_v1 = vcombine.high %v6059_v0, %v6059_v0  ;;  %5348 = vst.sshfl [vmem:[#allocation3] sm:$0xf pattern:$0x76325410] %v6059_v0  ;;  %v6099_v34 = vrot.slane %v6059_v0, %v5886_v12  ;;  %v2230_v35 = vcombine.low %v6059_v0, %v6059_v0 }
  0xe9   : > { %v1045_v2 = vpop.permute.xlu0 %1044  ;;  %v761_v3 = vpop.permute.xlu1 %760 }
  0xea   : > { %5349 = vst.sshfl [vmem:[#allocation3 + $0x8] sm:$0xf pattern:$0x76325410] %v6063_v1  ;;  %764 = vst.msk [vmem:[#allocation2 + $0x8] sm:$0x3] %vm763_vm7, %v761_v3  ;;  %v6109_v36 = vrot.slane %v6063_v1, %v5886_v12  ;;  %v6112_v37 = vrot.slane %v2230_v35, %v5886_v12 }
  0xeb   : > { %v1046_v7 = vrot.slane %v1045_v2, 6  ;;  %vm7657_vm7 = vcmask 738968  }
  0xed   : > { %v1016_v4 = vpop.permute.xlu0 %1015  ;;  %v776_v5 = vpop.permute.xlu1 %775  ;;  %v1048_v10 = vsel %vm1047_vm11, %v1046_v7, %v1045_v2  ;;  %vm7660_vm11 = vcmask 984968  }
  0xee   : > { %1019 = vst.msk [vmem:[#allocation2 + $0xa] sm:$0x3] %vm1018_vm12, %v1016_v4  ;;  %vm7658_vm12 = vcmask 820968  }
  0xef   : > { %779 = vst.msk [vmem:[#allocation2 + $0x8] sm:$0x3] %vm778_vm8, %v776_v5  ;;  %vm7659_vm8 = vcmask 902968  }
  0xf1   : > { %v1031_v8 = vpop.permute.xlu0 %1030  ;;  %v791_v9 = vpop.permute.xlu1 %790 }
  0xf2   : > { %1033 = vst.msk [vmem:[#allocation2 + $0xa] sm:$0x3] %vm233_vm3, %v1031_v8  ;;  %vm7655_vm3 = vcmask 410968  }
  0xf3   : > { %794 = vst.msk [vmem:[#allocation2 + $0x8] sm:$0x3] %vm793_vm13, %v791_v9  ;;  %vm1281_vm13 = vcmask 1043456  }
  0xf4   : > { %1050 = vst.msk [vmem:[#allocation2 + $0xa] sm:$0xf] %vm6036_vm4, %v1048_v10  ;;  %vm7656_vm4 = vcmask 492968  }
  0xf5   : > { %v806_v11 = vpop.permute.xlu0 %805  ;;  %v1062_v13 = vpop.permute.xlu1 %1061 }
  0xf6   : > { %809 = vst.msk [vmem:[#allocation2 + $0x8] sm:$0x3] %vm808_vm14, %v806_v11  ;;  %vm7613_vm14 = vcmask 56320  }
  0xf7   : > { %1064 = vst.msk [vmem:[#allocation2 + $0xc] sm:$0x3] %vm268_vm5, %v1062_v13  ;;  %vm1120_vm5 = vcmask 574968  }
  0xf9   : > { %v821_v15 = vpop.permute.xlu0 %820  ;;  %v1076_v16 = vpop.permute.xlu1 %1075 }
  0xfa   : > { %824 = vst.msk [vmem:[#allocation2 + $0x8] sm:$0x3] %vm823_vm15, %v821_v15  ;;  %vm7612_vm15 = vcmask 48128  }
  0xfb   : > { %1078 = vst.msk [vmem:[#allocation2 + $0xc] sm:$0x3] %vm283_vm6, %v1076_v16  ;;  %vm1135_vm6 = vcmask 656968  }
  0xfd   : > { %v836_v17 = vpop.permute.xlu0 %835  ;;  %v1090_v18 = vpop.permute.xlu1 %1089 }
  0xfe   : > { %839 = vst.msk [vmem:[#allocation2 + $0x8] sm:$0x3] %vm838_vm2, %v836_v17  ;;  %vm2769_vm2 = vcmask 285696  }
  0xff   : > { %1092 = vst.msk [vmem:[#allocation2 + $0xc] sm:$0x3] %vm7655_vm3, %v1090_v18  ;;  %vm2521_vm3 = vcmask 375808  }
 0x101   : > { %v851_v14 = vpop.permute.xlu0 %850  ;;  %v1104_v19 = vpop.permute.xlu1 %1103 }
 0x102   : > { %854 = vst.msk [vmem:[#allocation2 + $0x8] sm:$0x3] %vm853_vm0, %v851_v14  ;;  %vm2707_vm0 = vcmask 293888  }
 0x103   : > { %1106 = vst.msk [vmem:[#allocation2 + $0xc] sm:$0x3] %vm7656_vm4, %v1104_v19  ;;  %vm2831_vm4 = vcmask 277504  }
 0x105   : > { %v866_v20 = vpop.permute.xlu0 %865  ;;  %v1118_v21 = vpop.permute.xlu1 %1117 }
 0x106   : > { %869 = vst.msk [vmem:[#allocation2 + $0x8] sm:$0x3] %vm868_vm1, %v866_v20  ;;  %vm2459_vm1 = vcmask 441344  }
 0x107   : > { %1121 = vst.msk [vmem:[#allocation2 + $0xc] sm:$0x3] %vm1120_vm5, %v1118_v21  ;;  %vm7609_vm5 = vcmask 359424  }
 0x109   : > { %v881_v22 = vpop.permute.xlu0 %880  ;;  %v1133_v23 = vpop.permute.xlu1 %1132 }
 0x10a   : > { %884 = vst.msk [vmem:[#allocation2 + $0x8] sm:$0x3] %vm883_vm10, %v881_v22  ;;  %vm2583_vm10 = vcmask 367616  }
 0x10b   : > { %1136 = vst.msk [vmem:[#allocation2 + $0xc] sm:$0x3] %vm1135_vm6, %v1133_v23  ;;  %vm7610_vm6 = vcmask 457728  }
 0x10d   : > { %v1148_v24 = vpop.permute.xlu0 %1147  ;;  %v1162_v25 = vpop.permute.xlu1 %1161 }
 0x10e   : > { %1150 = vst.msk [vmem:[#allocation2 + $0xc] sm:$0x3] %vm7657_vm7, %v1148_v24  ;;  %vm7611_vm7 = vcmask 449536  }
 0x10f   : > { %1164 = vst.msk [vmem:[#allocation2 + $0xc] sm:$0x3] %vm7658_vm12, %v1162_v25  ;;  %vm7639_vm12 = vcmask 146432  }
 0x111   : > { %v1176_v26 = vpop.permute.xlu0 %1175  ;;  %v1190_v27 = vpop.permute.xlu1 %1189  ;;  %v2660_v38 = vld [vmem:[#allocation2 + $0x2] sm:$0xff] }
 0x112   : > { %1178 = vst.msk [vmem:[#allocation2 + $0xc] sm:$0x3] %vm7659_vm8, %v1176_v26  ;;  %v2671_v39 = vrot.slane %v2660_v38, %v5886_v12  ;;  %v2664_v40 = vcombine.high %v2660_v38, %v2660_v38  ;;  %v2726_v42 = vcombine.low %v2660_v38, %v2660_v38  ;;  %vm7616_vm8 = vcmask 138240  }
 0x113   : > { %1192 = vst.msk [vmem:[#allocation2 + $0xc] sm:$0x3] %vm7660_vm11, %v1190_v27  ;;  %vm7615_vm11 = vcmask 130048  }
 0x114   : > { %v2678_v41 = vrot.slane %v2664_v40, %v5886_v12  ;;  %v2733_v43 = vrot.slane %v2726_v42, %v5886_v12 }
 0x11a   : > { %v1194_v28 = vld [vmem:[#allocation2 + $0x8] sm:$0x3f] }
 0x11b   : > { %v6078_v29 = vld [vmem:[#allocation2 + $0xa] sm:$0xff]  ;;  %v1212_v30 = vcombine.high %v1194_v28, %v1194_v28  ;;  %5350 = vst.sshfl [vmem:[#allocation3 + $0x10] sm:$0xf pattern:$0x76325410] %v1194_v28 }
 0x11c   : > { %v6082_v31 = vrot.slane %v6078_v29, %v5886_v12  ;;  %v2493_v32 = vcombine.low %v6078_v29, %v6078_v29  ;;  %v6150_v44 = vld [vmem:[#allocation2 + $0x8] sm:$0xff]  ;;  %v2679_v20 = vcombine.high %v6078_v29, %v6078_v29 }
 0x11d   : > { %5351 = vst.sshfl [vmem:[#allocation3 + $0x18] sm:$0x3 pattern:$0x76325410] %v1212_v30  ;;  %v6158_v45 = vrot.slane %v6150_v44, %v5886_v12  ;;  %v2245_v46 = vcombine.low %v6150_v44, %v6150_v44 }
 0x11e   : > { %2698 = vrot.lane.b32.xlu0 %v6082_v31, %s5809_s22  ;;  %2450 = vrot.lane.b32.xlu1 %v6082_v31, %s5810_s26  ;;  %v2500_v33 = vrot.slane %v2493_v32, %v5886_v12 }
 0x11f   : > { %v6167_v47 = vrot.slane %v2245_v46, %v5886_v12 }
 0x122   : > { %2822 = vrot.lane.b32.xlu0 %v6082_v31, %s5811_s27  ;;  %2574 = vrot.lane.b32.xlu1 %v6082_v31, %s5781_s17 }
 0x126   : > { %2512 = vrot.lane.b32.xlu0 %v2500_v33, %s5812_s30  ;;  %2760 = vrot.lane.b32.xlu1 %v2500_v33, %s5805_s23 }
 0x12a   : > { %2262 = vrot.lane.b32.xlu0 %v6099_v34, %s5813_s12  ;;  %2198 = vrot.lane.b32.xlu1 %v6099_v34, %s5798_s13 }
 0x12e   : > { %2200 = vrot.lane.b32.xlu0 %v6109_v36, %s5798_s13  ;;  %2260 = vrot.lane.b32.xlu1 %v6112_v37, %s5813_s12 }
 0x132   : > { %2694 = vrot.lane.b32.xlu0 %v2671_v39, %s5809_s22  ;;  %2758 = vrot.lane.b32.xlu1 %v2671_v39, %s5805_s23 }
 0x136   : > { %2818 = vrot.lane.b32.xlu0 %v2671_v39, %s5811_s27  ;;  %2510 = vrot.lane.b32.xlu1 %v2671_v39, %s5812_s30 }
 0x13a   : > { %2446 = vrot.lane.b32.xlu0 %v2671_v39, %s5810_s26  ;;  %2634 = vrot.lane.b32.xlu1 %v2671_v39, %s5814_s7 }
 0x13e   : > { %2570 = vrot.lane.b32.xlu0 %v2671_v39, %s5781_s17  ;;  %2322 = vrot.lane.b32.xlu1 %v2671_v39, %s5815_s9 }
 0x142   : > { %2386 = vrot.lane.b32.xlu0 %v2671_v39, %s5768_s18  ;;  %2696 = vrot.lane.b32.xlu1 %v2678_v41, %s5809_s22 }
 0x146   : > { %2756 = vrot.lane.b32.xlu0 %v2733_v43, %s5805_s23  ;;  %2820 = vrot.lane.b32.xlu1 %v2678_v41, %s5811_s27 }
 0x14a   : > { %2508 = vrot.lane.b32.xlu0 %v2733_v43, %s5812_s30  ;;  %2448 = vrot.lane.b32.xlu1 %v2678_v41, %s5810_s26 }
 0x14e   : > { %2632 = vrot.lane.b32.xlu0 %v2733_v43, %s5814_s7  ;;  %2572 = vrot.lane.b32.xlu1 %v2678_v41, %s5781_s17 }
 0x152   : > { %2324 = vrot.lane.b32.xlu0 %v2678_v41, %s5815_s9  ;;  %2384 = vrot.lane.b32.xlu1 %v2733_v43, %s5768_s18 }
 0x156   : > { %2636 = vrot.lane.b32.xlu0 %v2500_v33, %s5814_s7  ;;  %1950 = vrot.lane.b32.xlu1 %v6099_v34, %s7625_s29 }
 0x15a   : > { %1952 = vrot.lane.b32.xlu0 %v6109_v36, %s7625_s29  ;;  %2012 = vrot.lane.b32.xlu1 %v6112_v37, %s7626_s21 }
 0x15e   : > { %2014 = vrot.lane.b32.xlu0 %v6099_v34, %s7626_s21  ;;  %2074 = vrot.lane.b32.xlu1 %v6099_v34, %s5818_s6 }
 0x162   : > { %2076 = vrot.lane.b32.xlu0 %v6109_v36, %s5818_s6  ;;  %2136 = vrot.lane.b32.xlu1 %v6112_v37, %s5819_s19 }
 0x166   : > { %2138 = vrot.lane.b32.xlu0 %v6099_v34, %s5819_s19  ;;  %2202 = vrot.lane.b32.xlu1 %v6158_v45, %s5798_s13 }
 0x16a   : > { %2264 = vrot.lane.b32.xlu0 %v6167_v47, %s5813_s12  ;;  %2326 = vrot.lane.b32.xlu1 %v6082_v31, %s5815_s9 }
 0x16e   : > { %2388 = vrot.lane.b32.xlu0 %v2500_v33, %s5768_s18  ;;  %1703 = vrot.lane.b32.xlu1 %v6099_v34, %s5820_s8  ;;  %v6308_v33 = vrot.slane %v2679_v20, %v5886_v12 }
 0x172   : > { %1705 = vrot.lane.b32.xlu0 %v6109_v36, %s5820_s8  ;;  %1765 = vrot.lane.b32.xlu1 %v6112_v37, %s7624_s24 }
 0x176   : > { %1767 = vrot.lane.b32.xlu0 %v6099_v34, %s7624_s24  ;;  %1827 = vrot.lane.b32.xlu1 %v6099_v34, %s7606_s11 }
 0x17a   : > { %1829 = vrot.lane.b32.xlu0 %v6109_v36, %s7606_s11  ;;  %1888 = vrot.lane.b32.xlu1 %v6112_v37, %s7608_s16 }
 0x17e   : > { %1890 = vrot.lane.b32.xlu0 %v6099_v34, %s7608_s16  ;;  %1954 = vrot.lane.b32.xlu1 %v6158_v45, %s7625_s29 }
 0x182   : > { %2016 = vrot.lane.b32.xlu0 %v6167_v47, %s7626_s21  ;;  %2078 = vrot.lane.b32.xlu1 %v6158_v45, %s5818_s6 }
 0x186   : > { %2140 = vrot.lane.b32.xlu0 %v6167_v47, %s5819_s19  ;;  %1455 = vrot.lane.b32.xlu1 %v6099_v34, %s5753_s28 }
 0x18a   : > { %1457 = vrot.lane.b32.xlu0 %v6109_v36, %s5753_s28  ;;  %1517 = vrot.lane.b32.xlu1 %v6112_v37, %s5823_s14 }
 0x18e   : > { %1519 = vrot.lane.b32.xlu0 %v6099_v34, %s5823_s14  ;;  %1579 = vrot.lane.b32.xlu1 %v6099_v34, %s5824_s5 }
 0x190   : > { %v6208_v48 = vpop.permute.xlu0 %2698  ;;  %v6210_v49 = vpop.permute.xlu1 %2450 }
 0x191   : > { %v2704_v23 = vrot.slane %v6208_v48, 4  ;;  %v2456_v41 = vrot.slane %v6210_v49, 4 }
 0x192   : > { %1581 = vrot.lane.b32.xlu0 %v6109_v36, %s5824_s5  ;;  %1641 = vrot.lane.b32.xlu1 %v6112_v37, %s5804_s10 }
 0x194   : > { %v6216_v50 = vpop.permute.xlu0 %2822  ;;  %v6218_v51 = vpop.permute.xlu1 %2574 }
 0x196   : > { %1643 = vrot.lane.b32.xlu0 %v6099_v34, %s5804_s10  ;;  %1707 = vrot.lane.b32.xlu1 %v6158_v45, %s5820_s8 }
 0x198   : > { %v6224_v52 = vpop.permute.xlu0 %2512  ;;  %v6226_v53 = vpop.permute.xlu1 %2760 }
 0x199   : > { %v2766_v4 = vrot.slane %v6226_v53, 4  ;;  %v2518_v11 = vrot.slane %v6224_v52, 4 }
 0x19a   : > { %1769 = vrot.lane.b32.xlu0 %v6167_v47, %s7624_s24  ;;  %1831 = vrot.lane.b32.xlu1 %v6158_v45, %s7606_s11  ;;  %s5825_s11 = smov 126  }
 0x19c   : > { %v6232_v54 = vpop.permute.xlu0 %2262  ;;  %v2199_v55 = vpop.permute.xlu1 %2198 }
 0x19d   : > { %v2269_v58 = vrot.slane %v6232_v54, 4  ;;  %v2206_v59 = vrot.slane %v2199_v55, 4 }
 0x19e   : > { %1892 = vrot.lane.b32.xlu0 %v6167_v47, %s7608_s16  ;;  %1269 = vrot.lane.b32.xlu1 %v6112_v37, %s5783_s20  ;;  %s5826_s16 = smov 118  }
 0x1a0   : > { %v6238_v56 = vpop.permute.xlu0 %2200  ;;  %v2261_v57 = vpop.permute.xlu1 %2260 }
 0x1a1   : > { %v2207_v60 = vrot.slane %v6238_v56, 4  ;;  %v2268_v61 = vrot.slane %v2261_v57, 4 }
 0x1a2   : > { %1271 = vrot.lane.b32.xlu0 %v6099_v34, %s5783_s20  ;;  %1331 = vrot.lane.b32.xlu1 %v6099_v34, %s5825_s11 }
 0x1a3   : > { %v2210_v62 = vsel %vm1281_vm13, %v2206_v59, %v2207_v60  ;;  %v2272_v63 = vsel %vm1281_vm13, %v2268_v61, %v2269_v58 }
 0x1a4   : > { %v2212_v0 = vsel %vm7613_vm14, %v2199_v55, %v2210_v62  ;;  %v2274_v1 = vsel %vm7612_vm15, %v2261_v57, %v2272_v63  ;;  %v2695_v2 = vpop.permute.xlu0 %2694  ;;  %v2759_v3 = vpop.permute.xlu1 %2758  ;;  %v2183_v62 = vcombine.high %v6150_v44, %v6150_v44 }
 0x1a5   : > { %2222 = vst [vmem:[#allocation3 + $0xe0] sm:$0x33] %v2212_v0  ;;  %2284 = vst [vmem:[#allocation3 + $0xe0] sm:$0xcc] %v2274_v1  ;;  %v2765_v5 = vrot.slane %v2759_v3, 4  ;;  %v2702_v24 = vrot.slane %v2695_v2, 4 }
 0x1a6   : > { %1333 = vrot.lane.b32.xlu0 %v6109_v36, %s5825_s11  ;;  %1393 = vrot.lane.b32.xlu1 %v6112_v37, %s5826_s16 }
 0x1a7   : > { %v2771_v7 = vsel %vm1281_vm13, %v2765_v5, %v2766_v4 }
 0x1a8   : > { %v2772_v8 = vsel %vm2769_vm2, %v2759_v3, %v2771_v7  ;;  %v2819_v9 = vpop.permute.xlu0 %2818  ;;  %v6263_v10 = vpop.permute.xlu1 %2510  ;;  %v2580_v3 = vrot.slane %v6218_v51, 4 }
 0x1a9   : > { %2781 = vst [vmem:[#allocation3 + $0x158] sm:$0xcc] %v2772_v8  ;;  %v2517_v13 = vrot.slane %v6263_v10, 4  ;;  %v2826_v35 = vrot.slane %v2819_v9, 4 }
 0x1aa   : > { %1395 = vrot.lane.b32.xlu0 %v6099_v34, %s5826_s16  ;;  %1459 = vrot.lane.b32.xlu1 %v6158_v45, %s5753_s28  ;;  %v2828_v34 = vrot.slane %v6216_v50, 4 }
 0x1ab   : > { %v2523_v15 = vsel %vm1281_vm13, %v2517_v13, %v2518_v11 }
 0x1ac   : > { %v2524_v16 = vsel %vm2521_vm3, %v6263_v10, %v2523_v15  ;;  %v6276_v17 = vpop.permute.xlu0 %2446  ;;  %v6278_v18 = vpop.permute.xlu1 %2634 }
 0x1ad   : > { %2533 = vst [vmem:[#allocation3 + $0x120] sm:$0xcc] %v2524_v16  ;;  %v2454_v57 = vrot.slane %v6276_v17, 4  ;;  %v2641_v10 = vrot.slane %v6278_v18, 4 }
 0x1ae   : > { %1521 = vrot.lane.b32.xlu0 %v6167_v47, %s5823_s14  ;;  %1583 = vrot.lane.b32.xlu1 %v6158_v45, %s5824_s5 }
 0x1b0   : > { %v6284_v14 = vpop.permute.xlu0 %2570  ;;  %v6286_v19 = vpop.permute.xlu1 %2322 }
 0x1b2   : > { %1645 = vrot.lane.b32.xlu0 %v6167_v47, %s5804_s10  ;;  %1273 = vrot.lane.b32.xlu1 %v6167_v47, %s5783_s20 }
 0x1b4   : > { %v6294_v21 = vpop.permute.xlu0 %2386  ;;  %v2697_v22 = vpop.permute.xlu1 %2696 }
 0x1b5   : > { %v2703_v25 = vrot.slane %v2697_v22, 4 }
 0x1b6   : > { %1335 = vrot.lane.b32.xlu0 %v6158_v45, %s5825_s11  ;;  %1397 = vrot.lane.b32.xlu1 %v6167_v47, %s5826_s16 }
 0x1b7   : > { %v2706_v26 = vsel %vm1281_vm13, %v2702_v24, %v2703_v25  ;;  %v2709_v27 = vsel %vm1281_vm13, %v2703_v25, %v2704_v23  ;;  %v2330_v25 = vrot.slane %v6286_v19, 4 }
 0x1b8   : > { %v2708_v28 = vsel %vm2707_vm0, %v2695_v2, %v2706_v26  ;;  %v2710_v29 = vsel %vm2707_vm0, %v2697_v22, %v2709_v27  ;;  %v2757_v30 = vpop.permute.xlu0 %2756  ;;  %v2821_v32 = vpop.permute.xlu1 %2820  ;;  %v5827_v2 = vmov 0  }
 0x1b9   : > { %2718 = vst [vmem:[#allocation3 + $0x150] sm:$0x33] %v2708_v28  ;;  %2719 = vst [vmem:[#allocation3 + $0x158] sm:$0x33] %v2710_v29  ;;  %v2764_v36 = vrot.slane %v2757_v30, 4  ;;  %v2827_v37 = vrot.slane %v2821_v32, 4  ;;  %3232 = vmatprep.mubr.bf16.mxu1 %v5827_v2  ;;  %3191 = vmatprep.mubr.bf16.mxu0 %v5827_v2 }
 0x1ba   : > { %2700 = vrot.lane.b32.xlu0 %v6308_v33, %s5809_s22  ;;  %2762 = vrot.lane.b32.xlu1 %v6082_v31, %s5805_s23  ;;  %s7696_s23 = smov 11   ;;  %s5833_s22 = smov 100  }
 0x1bb   : > { %v2768_v38 = vsel %vm1281_vm13, %v2764_v36, %v2765_v5  ;;  %v2830_v39 = vsel %vm1281_vm13, %v2826_v35, %v2827_v37  ;;  %v2833_v40 = vsel %vm1281_vm13, %v2827_v37, %v2828_v34 }
 0x1bc   : > { %v2770_v42 = vsel %vm2769_vm2, %v2757_v30, %v2768_v38  ;;  %v2832_v43 = vsel %vm2831_vm4, %v2819_v9, %v2830_v39  ;;  %v2834_v46 = vsel %vm2831_vm4, %v2821_v32, %v2833_v40  ;;  %v2509_v47 = vpop.permute.xlu0 %2508  ;;  %v2449_v55 = vpop.permute.xlu1 %2448  ;;  %v2393_v32 = vrot.slane %v6294_v21, 4 }
 0x1bd   : > { %2780 = vst [vmem:[#allocation3 + $0x150] sm:$0xcc] %v2770_v42  ;;  %2842 = vst [vmem:[#allocation3 + $0x16c] sm:$0x33] %v2832_v43  ;;  %v2516_v59 = vrot.slane %v2509_v47, 4  ;;  %v2455_v61 = vrot.slane %v2449_v55, 4 }
 0x1be   : > { %2843 = vst [vmem:[#allocation3 + $0x174] sm:$0x33] %v2834_v46  ;;  %2824 = vrot.lane.b32.xlu0 %v6308_v33, %s5811_s27  ;;  %2452 = vrot.lane.b32.xlu1 %v6308_v33, %s5810_s26  ;;  %s7698_s26 = smov 99   ;;  %s7699_s27 = smov 109  }
 0x1bf   : > { %v2520_v63 = vsel %vm1281_vm13, %v2516_v59, %v2517_v13  ;;  %v2458_v0 = vsel %vm1281_vm13, %v2454_v57, %v2455_v61  ;;  %v2461_v1 = vsel %vm1281_vm13, %v2455_v61, %v2456_v41  ;;  %v2578_v13 = vrot.slane %v6284_v14, 4 }
 0x1c0   : > { %v2522_v5 = vsel %vm2521_vm3, %v2509_v47, %v2520_v63  ;;  %v2460_v44 = vsel %vm2459_vm1, %v6276_v17, %v2458_v0  ;;  %v2462_v7 = vsel %vm2459_vm1, %v2449_v55, %v2461_v1  ;;  %v2633_v8 = vpop.permute.xlu0 %2632  ;;  %v2573_v9 = vpop.permute.xlu1 %2572  ;;  %v6350_v17 = vrot.slane %v2183_v62, %v5886_v12 }
 0x1c1   : > { %2532 = vst [vmem:[#allocation3 + $0x118] sm:$0xcc] %v2522_v5  ;;  %2470 = vst [vmem:[#allocation3 + $0x118] sm:$0x33] %v2460_v44  ;;  %v2640_v15 = vrot.slane %v2633_v8, 4  ;;  %v2579_v16 = vrot.slane %v2573_v9, 4 }
 0x1c2   : > { %2471 = vst [vmem:[#allocation3 + $0x120] sm:$0x33] %v2462_v7  ;;  %2514 = vrot.lane.b32.xlu0 %v6082_v31, %s5812_s30  ;;  %2576 = vrot.lane.b32.xlu1 %v6308_v33, %s5781_s17  ;;  %s7693_s17 = smov 119   ;;  %s7700_s30 = smov 101  }
 0x1c3   : > { %v2644_v20 = vsel %vm1281_vm13, %v2640_v15, %v2641_v10  ;;  %v2582_v22 = vsel %vm1281_vm13, %v2578_v13, %v2579_v16  ;;  %v2585_v24 = vsel %vm1281_vm13, %v2579_v16, %v2580_v3 }
 0x1c4   : > { %v2646_v26 = vsel %vm7609_vm5, %v2633_v8, %v2644_v20  ;;  %v2584_v27 = vsel %vm2583_vm10, %v6284_v14, %v2582_v22  ;;  %v2586_v28 = vsel %vm2583_vm10, %v2573_v9, %v2585_v24  ;;  %v6362_v12 = vpop.permute.xlu0 %2324  ;;  %v2385_v29 = vpop.permute.xlu1 %2384  ;;  %v5650_v30 = vld [vmem:[#allocation3 + $0x154] ss:$28 sps:$4 sm:$0xff]  }
 0x1c5   : > { %2656 = vst [vmem:[#allocation3 + $0x134] sm:$0xcc] %v2646_v26  ;;  %2594 = vst [vmem:[#allocation3 + $0x134] sm:$0x33] %v2584_v27  ;;  %v2331_v35 = vrot.slane %v6362_v12, 4  ;;  %v2392_v36 = vrot.slane %v2385_v29, 4  ;;  %3161 = vmatprep.subr.bf16.mxu0 %v5650_v30 }
 0x1c6   : > { %2595 = vst [vmem:[#allocation3 + $0x13c] sm:$0x33] %v2586_v28  ;;  %v5652_v37 = vld [vmem:[#allocation3 + $0x15c] ss:$28 sps:$4 sm:$0xff]   ;;  %2638 = vrot.lane.b32.xlu0 %v6082_v31, %s5814_s7  ;;  %2204 = vrot.lane.b32.xlu1 %v6350_v17, %s5798_s13  ;;  %v5654_v14 = vld [vmem:[#allocation3 + $0x150] ss:$28 sps:$4 sm:$0xff]  }
 0x1c7   : > { %v5655_v38 = vld [vmem:[#allocation3 + $0x158] ss:$28 sps:$4 sm:$0xff]   ;;  %v2334_v39 = vsel %vm1281_vm13, %v2330_v25, %v2331_v35  ;;  %v2396_v40 = vsel %vm1281_vm13, %v2392_v36, %v2393_v32  ;;  %3202 = vmatprep.subr.bf16.mxu1 %v5652_v37  ;;  %3162 = vmatpush1.bf16.msra.mxu0 %v5654_v14  ;;  %s7695_s13 = smov 9   ;;  %s5832_s7 = smov 90  }
 0x1c8   : > { %v2336_v42 = vsel %vm7610_vm6, %v6286_v19, %v2334_v39  ;;  %v2398_v43 = vsel %vm7611_vm7, %v2385_v29, %v2396_v40  ;;  %v6379_v46 = vpop.permute.xlu0 %2636  ;;  %3203 = vmatpush1.bf16.msra.mxu1 %v5655_v38  ;;  %v1951_v47 = vpop.permute.xlu1 %1950 }
 0x1c9   : > { %2346 = vst [vmem:[#allocation3 + $0xfc] sm:$0x33] %v2336_v42  ;;  %2408 = vst [vmem:[#allocation3 + $0xfc] sm:$0xcc] %v2398_v43  ;;  %v2642_v55 = vrot.slane %v6379_v46, 4  ;;  %v1958_v0 = vrot.slane %v1951_v47, 4 }
 0x1ca   : > { %2266 = vrot.lane.b32.xlu0 %v6158_v45, %s5813_s12  ;;  %2328 = vrot.lane.b32.xlu1 %v6308_v33, %s5815_s9  ;;  %s7661_s9 = smov 27   ;;  %s7662_s12 = smov 26  }
 0x1cb   : > { %v2647_v19 = vsel %vm1281_vm13, %v2641_v10, %v2642_v55 }
 0x1cc   : > { %v2648_v57 = vsel %vm7609_vm5, %v6278_v18, %v2647_v19  ;;  %v6391_v59 = vpop.permute.xlu0 %1952  ;;  %v2013_v61 = vpop.permute.xlu1 %2012  ;;  %v5656_v62 = vld [vmem:[#allocation3 + $0x11c] ss:$28 sps:$4 sm:$0xff]   ;;  %vm7614_vm5 = vcmask 64512  }
 0x1cd   : > { %v5658_v63 = vld [vmem:[#allocation3 + $0x118] ss:$28 sps:$4 sm:$0xff]   ;;  %2657 = vst [vmem:[#allocation3 + $0x13c] sm:$0xcc] %v2648_v57  ;;  %v1959_v1 = vrot.slane %v6391_v59, 4  ;;  %3163 = vmatprep.subr.bf16.mxu0 %v5656_v62  ;;  %v2020_v9 = vrot.slane %v2013_v61, 4 }
 0x1ce   : > { %2390 = vrot.lane.b32.xlu0 %v6082_v31, %s5768_s18  ;;  %1956 = vrot.lane.b32.xlu1 %v6350_v17, %s7625_s29  ;;  %s7703_s18 = smov 37  }
 0x1cf   : > { %v1962_v18 = vsel %vm1281_vm13, %v1958_v0, %v1959_v1  ;;  %3164 = vmatpush1.bf16.msra.mxu0 %v5658_v63 }
 0x1d0   : > { %v1964_v33 = vsel %vm7639_vm12, %v1951_v47, %v1962_v18  ;;  %v6402_v5 = vpop.permute.xlu0 %2014  ;;  %v2075_v44 = vpop.permute.xlu1 %2074  ;;  %v5659_v7 = vld [vmem:[#allocation3 + $0xe4] ss:$28 sps:$4 sm:$0xff]  }
 0x1d1   : > { %v5661_v8 = vld [vmem:[#allocation3 + $0xe0] ss:$28 sps:$4 sm:$0xff]   ;;  %1974 = vst [vmem:[#allocation3 + $0xa8] sm:$0x33] %v1964_v33  ;;  %v2021_v31 = vrot.slane %v6402_v5, 4  ;;  %3165 = vmatprep.subr.bf16.mxu0 %v5659_v7  ;;  %v2082_v24 = vrot.slane %v2075_v44, 4 }
 0x1d2   : > { %2018 = vrot.lane.b32.xlu0 %v6158_v45, %s7626_s21  ;;  %2080 = vrot.lane.b32.xlu1 %v6350_v17, %s5818_s6  ;;  %s7697_s6 = smov 91  }
 0x1d3   : > { %v2024_v10 = vsel %vm1281_vm13, %v2020_v9, %v2021_v31  ;;  %3166 = vmatpush1.bf16.msra.mxu0 %v5661_v8 }
 0x1d4   : > { %v2026_v13 = vsel %vm7616_vm8, %v2013_v61, %v2024_v10  ;;  %v6413_v15 = vpop.permute.xlu0 %2076  ;;  %v2137_v16 = vpop.permute.xlu1 %2136  ;;  %v5662_v20 = vld [vmem:[#allocation3 + $0x124] ss:$28 sps:$4 sm:$0xff]  }
 0x1d5   : > { %v5664_v22 = vld [vmem:[#allocation3 + $0x120] ss:$28 sps:$4 sm:$0xff]   ;;  %2036 = vst [vmem:[#allocation3 + $0xa8] sm:$0xcc] %v2026_v13  ;;  %v2083_v25 = vrot.slane %v6413_v15, 4  ;;  %3204 = vmatprep.subr.bf16.mxu1 %v5662_v20  ;;  %v2144_v30 = vrot.slane %v2137_v16, 4 }
 0x1d6   : > { %2142 = vrot.lane.b32.xlu0 %v6158_v45, %s5819_s19  ;;  %1709 = vrot.lane.b32.xlu1 %v6350_v17, %s5820_s8  ;;  %s7694_s19 = smov 1   ;;  %s7705_s8 = smov 29  }
 0x1d7   : > { %v2086_v26 = vsel %vm1281_vm13, %v2082_v24, %v2083_v25  ;;  %3205 = vmatpush1.bf16.msra.mxu1 %v5664_v22 }
 0x1d8   : > { %v2088_v27 = vsel %vm7615_vm11, %v2075_v44, %v2086_v26  ;;  %v6424_v28 = vpop.permute.xlu0 %2138  ;;  %v6426_v29 = vpop.permute.xlu1 %2202 }
 0x1d9   : > { %2098 = vst [vmem:[#allocation3 + $0xc4] sm:$0x33] %v2088_v27  ;;  %v2145_v36 = vrot.slane %v6424_v28, 4  ;;  %v2208_v37 = vrot.slane %v6426_v29, 4 }
 0x1da   : > { %1771 = vrot.lane.b32.xlu0 %v6158_v45, %s7624_s24  ;;  %1833 = vrot.lane.b32.xlu1 %v6350_v17, %s7661_s9 }
 0x1db   : > { %v2148_v14 = vsel %vm1281_vm13, %v2144_v30, %v2145_v36  ;;  %v2213_v38 = vsel %vm1281_vm13, %v2207_v60, %v2208_v37 }
 0x1dc   : > { %v2150_v39 = vsel %vm7614_vm5, %v2137_v16, %v2148_v14  ;;  %v2214_v40 = vsel %vm7613_vm14, %v6238_v56, %v2213_v38  ;;  %v6445_v42 = vpop.permute.xlu0 %2264  ;;  %v6447_v43 = vpop.permute.xlu1 %2326  ;;  %vm7620_vm14 = vcmask 211968  }
 0x1dd   : > { %2160 = vst [vmem:[#allocation3 + $0xc4] sm:$0xcc] %v2150_v39  ;;  %2223 = vst [vmem:[#allocation3 + $0xe8] sm:$0x33] %v2214_v40  ;;  %v2270_v47 = vrot.slane %v6445_v42, 4  ;;  %v2332_v19 = vrot.slane %v6447_v43, 4 }
 0x1de   : > { %1894 = vrot.lane.b32.xlu0 %v6158_v45, %s7662_s12  ;;  %1461 = vrot.lane.b32.xlu1 %v6350_v17, %s5753_s28  ;;  %s7701_s12 = smov 111  }
 0x1df   : > { %v2275_v56 = vsel %vm1281_vm13, %v2269_v58, %v2270_v47  ;;  %v2337_v60 = vsel %vm1281_vm13, %v2331_v35, %v2332_v19 }
 0x1e0   : > { %v2276_v57 = vsel %vm7612_vm15, %v6232_v54, %v2275_v56  ;;  %v2338_v61 = vsel %vm7610_vm6, %v6362_v12, %v2337_v60  ;;  %v6469_v62 = vpop.permute.xlu0 %2388  ;;  %v1704_v63 = vpop.permute.xlu1 %1703  ;;  %vm7617_vm6 = vcmask 867328   ;;  %vm7663_vm15 = vcmask 220160  }
 0x1e1   : > { %2285 = vst [vmem:[#allocation3 + $0xe8] sm:$0xcc] %v2276_v57  ;;  %2347 = vst [vmem:[#allocation3 + $0x104] sm:$0x33] %v2338_v61  ;;  %v2394_v0 = vrot.slane %v6469_v62, 4  ;;  %v1711_v44 = vrot.slane %v1704_v63, 4 }
 0x1e2   : > { %1523 = vrot.lane.b32.xlu0 %v6158_v45, %s5823_s14  ;;  %1585 = vrot.lane.b32.xlu1 %v6350_v17, %s5824_s5  ;;  %s5830_s14 = smov 10   ;;  %s7627_s5 = smov 110  }
 0x1e3   : > { %v2399_v54 = vsel %vm1281_vm13, %v2393_v32, %v2394_v0 }
 0x1e4   : > { %v2400_v58 = vsel %vm7611_vm7, %v6294_v21, %v2399_v54  ;;  %v6483_v12 = vpop.permute.xlu0 %1705  ;;  %v1766_v35 = vpop.permute.xlu1 %1765  ;;  %v5665_v18 = vld [vmem:[#allocation3 + $0xac] ss:$28 sps:$4 sm:$0xff]   ;;  %vm7645_vm7 = vcmask 228352  }
 0x1e5   : > { %v5667_v33 = vld [vmem:[#allocation3 + $0xa8] ss:$28 sps:$4 sm:$0xff]   ;;  %2409 = vst [vmem:[#allocation3 + $0x104] sm:$0xcc] %v2400_v58  ;;  %v1712_v7 = vrot.slane %v6483_v12, 4  ;;  %3167 = vmatprep.subr.bf16.mxu0 %v5665_v18  ;;  %v1773_v10 = vrot.slane %v1766_v35, 4 }
 0x1e6   : > { %1647 = vrot.lane.b32.xlu0 %v6158_v45, %s5804_s10  ;;  %1275 = vrot.lane.b32.xlu1 %v6158_v45, %s5783_s20  ;;  %s5831_s10 = smov 89  }
 0x1e7   : > { %v1715_v21 = vsel %vm1281_vm13, %v1711_v44, %v1712_v7  ;;  %3168 = vmatpush1.bf16.msra.mxu0 %v5667_v33 }
 0x1e8   : > { %v1717_v32 = vsel %vm7617_vm6, %v1704_v63, %v1715_v21  ;;  %v6494_v8 = vpop.permute.xlu0 %1767  ;;  %v1828_v9 = vpop.permute.xlu1 %1827 }
 0x1e9   : > { %1727 = vst [vmem:[#allocation3 + $0x70] sm:$0x33] %v1717_v32  ;;  %v1774_v13 = vrot.slane %v6494_v8, 4  ;;  %v1835_v30 = vrot.slane %v1828_v9, 4 }
 0x1ea   : > { %1337 = vrot.lane.b32.xlu0 %v6350_v17, %s5825_s11  ;;  %1399 = vrot.lane.b32.xlu1 %v6158_v45, %s5826_s16  ;;  %s7702_s11 = smov 19  }
 0x1eb   : > { %v1777_v16 = vsel %vm1281_vm13, %v1773_v10, %v1774_v13 }
 0x1ec   : > { %v1779_v20 = vsel %vm7645_vm7, %v1766_v35, %v1777_v16  ;;  %v6505_v22 = vpop.permute.xlu0 %1829  ;;  %v1889_v24 = vpop.permute.xlu1 %1888  ;;  %v5668_v26 = vld [vmem:[#allocation3 + $0xec] ss:$28 sps:$4 sm:$0xff]  }
 0x1ed   : > { %v5670_v27 = vld [vmem:[#allocation3 + $0xe8] ss:$28 sps:$4 sm:$0xff]   ;;  %1789 = vst [vmem:[#allocation3 + $0x70] sm:$0xcc] %v1779_v20  ;;  %v1836_v14 = vrot.slane %v6505_v22, 4  ;;  %3206 = vmatprep.subr.bf16.mxu1 %v5668_v26  ;;  %v1896_v40 = vrot.slane %v1889_v24, 4 }
 0x1ee   : > { %3207 = vmatpush1.bf16.msra.mxu1 %v5670_v27 }
 0x1ef   : > { %v1839_v45 = vsel %vm1281_vm13, %v1835_v30, %v1836_v14 }
 0x1f0   : > { %v1840_v17 = vsel %vm7663_vm15, %v1828_v9, %v1839_v45  ;;  %v6512_v38 = vpop.permute.xlu0 %1890  ;;  %v6514_v39 = vpop.permute.xlu1 %1954  ;;  %vm1468_vm15 = vcmask 957440  }
 0x1f1   : > { %1850 = vst [vmem:[#allocation3 + $0x8c] sm:$0x33] %v1840_v17  ;;  %v1897_v56 = vrot.slane %v6512_v38, 4  ;;  %v1960_v60 = vrot.slane %v6514_v39, 4 }
 0x1f3   : > { %v1900_v57 = vsel %vm1281_vm13, %v1896_v40, %v1897_v56  ;;  %v1965_v61 = vsel %vm1281_vm13, %v1959_v1, %v1960_v60 }
 0x1f4   : > { %v1902_v63 = vsel %vm7620_vm14, %v1889_v24, %v1900_v57  ;;  %v1966_v54 = vsel %vm7639_vm12, %v6391_v59, %v1965_v61  ;;  %v6529_v58 = vpop.permute.xlu0 %2016  ;;  %v6531_v35 = vpop.permute.xlu1 %2078 }
 0x1f5   : > { %1912 = vst [vmem:[#allocation3 + $0x8c] sm:$0xcc] %v1902_v63  ;;  %1975 = vst [vmem:[#allocation3 + $0xb0] sm:$0x33] %v1966_v54  ;;  %v2022_v18 = vrot.slane %v6529_v58, 4  ;;  %v2084_v33 = vrot.slane %v6531_v35, 4 }
 0x1f7   : > { %v2027_v1 = vsel %vm1281_vm13, %v2021_v31, %v2022_v18  ;;  %v2089_v59 = vsel %vm1281_vm13, %v2083_v25, %v2084_v33 }
 0x1f8   : > { %v2028_v44 = vsel %vm7616_vm8, %v6402_v5, %v2027_v1  ;;  %v2090_v21 = vsel %vm7615_vm11, %v6413_v15, %v2089_v59  ;;  %v6549_v32 = vpop.permute.xlu0 %2140  ;;  %v1456_v9 = vpop.permute.xlu1 %1455  ;;  %vm1592_vm11 = vcmask 883712   ;;  %vm1654_vm8 = vcmask 875520  }
 0x1f9   : > { %2037 = vst [vmem:[#allocation3 + $0xb0] sm:$0xcc] %v2028_v44  ;;  %2099 = vst [vmem:[#allocation3 + $0xcc] sm:$0x33] %v2090_v21  ;;  %v2146_v10 = vrot.slane %v6549_v32, 4  ;;  %v1463_v24 = vrot.slane %v1456_v9, 4 }
 0x1fb   : > { %v2151_v31 = vsel %vm1281_vm13, %v2145_v36, %v2146_v10 }
 0x1fc   : > { %v2152_v25 = vsel %vm7614_vm5, %v6424_v28, %v2151_v31  ;;  %v6559_v5 = vpop.permute.xlu0 %1457  ;;  %v1518_v16 = vpop.permute.xlu1 %1517  ;;  %v5671_v15 = vld [vmem:[#allocation3 + $0x74] ss:$28 sps:$4 sm:$0xff]   ;;  %vm1530_vm5 = vcmask 949248  }
 0x1fd   : > { %v5673_v20 = vld [vmem:[#allocation3 + $0x70] ss:$28 sps:$4 sm:$0xff]   ;;  %2161 = vst [vmem:[#allocation3 + $0xcc] sm:$0xcc] %v2152_v25  ;;  %v1464_v26 = vrot.slane %v6559_v5, 4  ;;  %3169 = vmatprep.subr.bf16.mxu0 %v5671_v15  ;;  %v1525_v45 = vrot.slane %v1518_v16, 4 }
 0x1fe   : > { %3170 = vmatpush1.bf16.msra.mxu0 %v5673_v20 }
 0x1ff   : > { %v1467_v27 = vsel %vm1281_vm13, %v1463_v24, %v1464_v26 }
 0x200   : > { %v1469_v36 = vsel %vm1468_vm15, %v1456_v9, %v1467_v27  ;;  %v6566_v30 = vpop.permute.xlu0 %1519  ;;  %v1580_v28 = vpop.permute.xlu1 %1579 }
 0x201   : > { %1479 = vst [vmem:[#allocation3 + $0x38] sm:$0x33] %v1469_v36  ;;  %v1526_v17 = vrot.slane %v6566_v30, 4  ;;  %v1587_v59 = vrot.slane %v1580_v28, 4 }
 0x203   : > { %v1529_v40 = vsel %vm1281_vm13, %v1525_v45, %v1526_v17 }
 0x204   : > { %v1531_v57 = vsel %vm1530_vm5, %v1518_v16, %v1529_v40  ;;  %v6573_v61 = vpop.permute.xlu0 %1581  ;;  %v1642_v63 = vpop.permute.xlu1 %1641  ;;  %v5674_v54 = vld [vmem:[#allocation3 + $0xb4] ss:$28 sps:$4 sm:$0xff]  }
 0x205   : > { %v5676_v1 = vld [vmem:[#allocation3 + $0xb0] ss:$28 sps:$4 sm:$0xff]   ;;  %1541 = vst [vmem:[#allocation3 + $0x38] sm:$0xcc] %v1531_v57  ;;  %v1588_v44 = vrot.slane %v6573_v61, 4  ;;  %3208 = vmatprep.subr.bf16.mxu1 %v5674_v54  ;;  %v1649_v16 = vrot.slane %v1642_v63, 4 }
 0x206   : > { %3209 = vmatpush1.bf16.msra.mxu1 %v5676_v1 }
 0x207   : > { %v1591_v21 = vsel %vm1281_vm13, %v1587_v59, %v1588_v44 }
 0x208   : > { %v1593_v9 = vsel %vm1592_vm11, %v1580_v28, %v1591_v21  ;;  %v6580_v31 = vpop.permute.xlu0 %1643  ;;  %v6582_v25 = vpop.permute.xlu1 %1707 }
 0x209   : > { %1603 = vst [vmem:[#allocation3 + $0x54] sm:$0x33] %v1593_v9  ;;  %v1650_v15 = vrot.slane %v6580_v31, 4  ;;  %v1713_v20 = vrot.slane %v6582_v25, 4 }
 0x20b   : > { %v1653_v24 = vsel %vm1281_vm13, %v1649_v16, %v1650_v15  ;;  %v1718_v27 = vsel %vm1281_vm13, %v1712_v7, %v1713_v20 }
 0x20c   : > { %v1655_v36 = vsel %vm1654_vm8, %v1642_v63, %v1653_v24  ;;  %v1719_v28 = vsel %vm7617_vm6, %v6483_v12, %v1718_v27  ;;  %v6597_v45 = vpop.permute.xlu0 %1769  ;;  %v6599_v40 = vpop.permute.xlu1 %1831  ;;  %vm7664_vm6 = vcmask 220160  }
 0x20d   : > { %1665 = vst [vmem:[#allocation3 + $0x54] sm:$0xcc] %v1655_v36  ;;  %1728 = vst [vmem:[#allocation3 + $0x78] sm:$0x33] %v1719_v28  ;;  %v1775_v57 = vrot.slane %v6597_v45, 4  ;;  %v7619_v54 = vrot.slane %v6599_v40, 4 }
 0x20f   : > { %v1780_v7 = vsel %vm1281_vm13, %v1774_v13, %v1775_v57  ;;  %v1841_v12 = vsel %vm1281_vm13, %v1836_v14, %v7619_v54 }
 0x210   : > { %v1781_v63 = vsel %vm7645_vm7, %v6494_v8, %v1780_v7  ;;  %v1842_v1 = vsel %vm7664_vm6, %v6505_v22, %v1841_v12  ;;  %v6617_v59 = vpop.permute.xlu0 %1892  ;;  %v1270_v21 = vpop.permute.xlu1 %1269  ;;  %vm1344_vm6 = vcmask 1031168  }
 0x211   : > { %1790 = vst [vmem:[#allocation3 + $0x78] sm:$0xcc] %v1781_v63  ;;  %1851 = vst [vmem:[#allocation3 + $0x94] sm:$0x33] %v1842_v1  ;;  %v7618_v9 = vrot.slane %v6617_v59, 4  ;;  %v1277_v27 = vrot.slane %v1270_v21, 4 }
 0x213   : > { %v1903_v13 = vsel %vm1281_vm13, %v1897_v56, %v7618_v9 }
 0x214   : > { %v1904_v14 = vsel %vm7620_vm14, %v6512_v38, %v1903_v13  ;;  %v1272_v8 = vpop.permute.xlu0 %1271  ;;  %v1332_v16 = vpop.permute.xlu1 %1331  ;;  %v5677_v24 = vld [vmem:[#allocation3 + $0x3c] ss:$28 sps:$4 sm:$0xff]   ;;  %vm1406_vm14 = vcmask 965632  }
 0x215   : > { %v5679_v22 = vld [vmem:[#allocation3 + $0x38] ss:$28 sps:$4 sm:$0xff]   ;;  %1913 = vst [vmem:[#allocation3 + $0x94] sm:$0xcc] %v1904_v14  ;;  %v1278_v36 = vrot.slane %v1272_v8, 4  ;;  %3171 = vmatprep.subr.bf16.mxu0 %v5677_v24  ;;  %v1339_v56 = vrot.slane %v1332_v16, 4 }
 0x216   : > { %3172 = vmatpush1.bf16.msra.mxu0 %v5679_v22 }
 0x217   : > { %v1282_v28 = vsel %vm1281_vm13, %v1277_v27, %v1278_v36 }
 0x218   : > { %v1283_v7 = vsel %vm7623_vm9, %v1270_v21, %v1282_v28  ;;  %v1334_v12 = vpop.permute.xlu0 %1333  ;;  %v1394_v63 = vpop.permute.xlu1 %1393 }
 0x219   : > { %1293 = vst [vmem:[#allocation3] sm:$0xcc] %v1283_v7  ;;  %v1340_v1 = vrot.slane %v1334_v12, 4  ;;  %v1401_v27 = vrot.slane %v1394_v63, 4 }
 0x21b   : > { %v1343_v38 = vsel %vm1281_vm13, %v1339_v56, %v1340_v1 }
 0x21c   : > { %v1345_v13 = vsel %vm1344_vm6, %v1332_v16, %v1343_v38  ;;  %v1396_v9 = vpop.permute.xlu0 %1395  ;;  %v6631_v14 = vpop.permute.xlu1 %1459  ;;  %v5680_v54 = vld [vmem:[#allocation3 + $0x7c] ss:$28 sps:$4 sm:$0xff]  }
 0x21d   : > { %v5682_v24 = vld [vmem:[#allocation3 + $0x78] ss:$28 sps:$4 sm:$0xff]   ;;  %1355 = vst [vmem:[#allocation3 + $0x1c] sm:$0x33] %v1345_v13  ;;  %v1402_v22 = vrot.slane %v1396_v9, 4  ;;  %v1465_v21 = vrot.slane %v6631_v14, 4  ;;  %3210 = vmatprep.subr.bf16.mxu1 %v5680_v54 }
 0x21e   : > { %3211 = vmatpush1.bf16.msra.mxu1 %v5682_v24 }
 0x21f   : > { %v1405_v28 = vsel %vm1281_vm13, %v1401_v27, %v1402_v22  ;;  %v1470_v16 = vsel %vm1281_vm13, %v1464_v26, %v1465_v21 }
 0x220   : > { %v1407_v7 = vsel %vm1406_vm14, %v1394_v63, %v1405_v28  ;;  %v1471_v56 = vsel %vm1468_vm15, %v6559_v5, %v1470_v16  ;;  %v6643_v38 = vpop.permute.xlu0 %1521  ;;  %v6645_v13 = vpop.permute.xlu1 %1583 }
 0x221   : > { %1417 = vst [vmem:[#allocation3 + $0x1c] sm:$0xcc] %v1407_v7  ;;  %1480 = vst [vmem:[#allocation3 + $0x40] sm:$0x33] %v1471_v56  ;;  %v1527_v54 = vrot.slane %v6643_v38, 4  ;;  %v7621_v27 = vrot.slane %v6645_v13, 4 }
 0x223   : > { %v1532_v26 = vsel %vm1281_vm13, %v1526_v17, %v1527_v54  ;;  %v1594_v5 = vsel %vm1281_vm13, %v1588_v44, %v7621_v27 }
 0x224   : > { %v1533_v63 = vsel %vm1530_vm5, %v6566_v30, %v1532_v26  ;;  %v1595_v24 = vsel %vm1592_vm11, %v6573_v61, %v1594_v5  ;;  %v6663_v28 = vpop.permute.xlu0 %1645  ;;  %v6665_v16 = vpop.permute.xlu1 %1273 }
 0x225   : > { %1542 = vst [vmem:[#allocation3 + $0x40] sm:$0xcc] %v1533_v63  ;;  %1604 = vst [vmem:[#allocation3 + $0x5c] sm:$0x33] %v1595_v24  ;;  %v1651_v17 = vrot.slane %v6663_v28, 4  ;;  %v7622_v7 = vrot.slane %v6665_v16, 4 }
 0x227   : > { %v1656_v44 = vsel %vm1281_vm13, %v1650_v15, %v1651_v17  ;;  %v1284_v30 = vsel %vm1281_vm13, %v1278_v36, %v7622_v7 }
 0x228   : > { %v1657_v61 = vsel %vm1654_vm8, %v6580_v31, %v1656_v44  ;;  %v1285_v56 = vsel %vm7623_vm9, %v1272_v8, %v1284_v30  ;;  %v6680_v26 = vpop.permute.xlu0 %1335  ;;  %v6682_v5 = vpop.permute.xlu1 %1397  ;;  %v5683_v63 = vld [vmem:[#allocation3 + $0x4] ss:$28 sps:$4 sm:$0xff]   ;;  %vm3155_vm9 = vcmask 916480  }
 0x229   : > { %v5685_v24 = vld [vmem:[#allocation3] ss:$28 sps:$4 sm:$0xff]   ;;  %1666 = vst [vmem:[#allocation3 + $0x5c] sm:$0xcc] %v1657_v61  ;;  %1294 = vst [vmem:[#allocation3 + $0x8] sm:$0xcc] %v1285_v56  ;;  %3173 = vmatprep.subr.bf16.mxu0 %v5683_v63 }
 0x22a   : > { %v1341_v27 = vrot.slane %v6680_v26, 4  ;;  %v1403_v15 = vrot.slane %v6682_v5, 4  ;;  %3174 = vmatpush1.bf16.msra.mxu0 %v5685_v24  ;;  %v6697_v63 = vld [vmem:[%s7570_s2] sm:$0xf] }
 0x22c   : > { %v1346_v36 = vsel %vm1281_vm13, %v1340_v1, %v1341_v27  ;;  %v1408_v31 = vsel %vm1281_vm13, %v1402_v22, %v1403_v15  ;;  %v2701_v30 = vpop.permute.xlu0 %2700  ;;  %v2763_v61 = vpop.permute.xlu1 %2762 }
 0x22d   : > { %v1347_v8 = vsel %vm1344_vm6, %v1334_v12, %v1346_v36  ;;  %v1409_v44 = vsel %vm1406_vm14, %v1396_v9, %v1408_v31  ;;  %v2705_v56 = vrot.slane %v2701_v30, 4  ;;  %v2767_v7 = vrot.slane %v2763_v61, 4  ;;  %5401 = vmatmul.mubr.msk.bf16.vlgmr.msra.gmra.mxu0 %vm3155_vm9, %v6697_v63 }
 0x22e   : > { %1356 = vst [vmem:[#allocation3 + $0x24] sm:$0x33] %v1347_v8  ;;  %1418 = vst [vmem:[#allocation3 + $0x24] sm:$0xcc] %v1409_v44  ;;  %3273 = vmatprep.mubr.bf16.mxu0 %v5827_v2 }
 0x22f   : > { %v2711_v12 = vsel %vm1281_vm13, %v2704_v23, %v2705_v56  ;;  %v2713_v9 = vsel %vm2707_vm0, %v2701_v30, %v2705_v56  ;;  %v2773_v1 = vsel %vm1281_vm13, %v2766_v4, %v2767_v7  ;;  %v2775_v22 = vsel %vm2769_vm2, %v2763_v61, %v2767_v7 }
 0x230   : > { %v2712_v24 = vsel %vm2707_vm0, %v6208_v48, %v2711_v12  ;;  %2721 = vst [vmem:[#allocation3 + $0x168] sm:$0x3] %v2713_v9  ;;  %v2774_v36 = vsel %vm2769_vm2, %v6226_v53, %v2773_v1  ;;  %2783 = vst [vmem:[#allocation3 + $0x168] sm:$0xc] %v2775_v22  ;;  %v2825_v31 = vpop.permute.xlu0 %2824  ;;  %v2453_v23 = vpop.permute.xlu1 %2452  ;;  %v5686_v8 = vld [vmem:[#allocation3 + $0x44] ss:$28 sps:$4 sm:$0xff]  }
 0x231   : > { %v5688_v44 = vld [vmem:[#allocation3 + $0x40] ss:$28 sps:$4 sm:$0xff]   ;;  %2720 = vst [vmem:[#allocation3 + $0x160] sm:$0x33] %v2712_v24  ;;  %2782 = vst [vmem:[#allocation3 + $0x160] sm:$0xcc] %v2774_v36  ;;  %3212 = vmatprep.subr.bf16.mxu1 %v5686_v8 }
 0x232   : > { %v2829_v30 = vrot.slane %v2825_v31, 4  ;;  %v2457_v4 = vrot.slane %v2453_v23, 4  ;;  %3213 = vmatpush1.bf16.msra.mxu1 %v5688_v44  ;;  %vm7665_vm2 = vcmask 359424   ;;  %vm5829_vm0 = vmmov 0  }
 0x234   : > { %v2835_v7 = vsel %vm1281_vm13, %v2828_v34, %v2829_v30  ;;  %v2837_v48 = vsel %vm2831_vm4, %v2825_v31, %v2829_v30  ;;  %v2463_v53 = vsel %vm1281_vm13, %v2456_v41, %v2457_v4  ;;  %v2465_v61 = vsel %vm2459_vm1, %v2453_v23, %v2457_v4  ;;  %v2515_v9 = vpop.permute.xlu0 %2514  ;;  %v2577_v1 = vpop.permute.xlu1 %2576 }
 0x235   : > { %v2836_v56 = vsel %vm2831_vm4, %v6216_v50, %v2835_v7  ;;  %2845 = vst [vmem:[#allocation3 + $0x184] sm:$0x3] %v2837_v48  ;;  %v2464_v12 = vsel %vm2459_vm1, %v6210_v49, %v2463_v53  ;;  %2473 = vst [vmem:[#allocation3 + $0x130] sm:$0x3] %v2465_v61  ;;  %v5689_v34 = vld [vmem:[#allocation3 + $0xc] ss:$28 sps:$4 sm:$0xff]  }
 0x236   : > { %v5691_v22 = vld [vmem:[#allocation3 + $0x8] ss:$28 sps:$4 sm:$0xff]   ;;  %2844 = vst [vmem:[#allocation3 + $0x17c] sm:$0x33] %v2836_v56  ;;  %2472 = vst [vmem:[#allocation3 + $0x128] sm:$0x33] %v2464_v12  ;;  %3214 = vmatprep.subr.bf16.mxu1 %v5689_v34 }
 0x237   : > { %v2519_v24 = vrot.slane %v2515_v9, 4  ;;  %v2581_v36 = vrot.slane %v2577_v1, 4  ;;  %3215 = vmatpush1.bf16.msra.mxu1 %v5691_v22  ;;  %vm7667_vm4 = vmmov %vm7665_vm2 }
 0x238   : > { %v2639_v44 = vpop.permute.xlu0 %2638  ;;  %v2205_v30 = vpop.permute.xlu1 %2204 }
 0x239   : > { %v2525_v41 = vsel %vm1281_vm13, %v2518_v11, %v2519_v24  ;;  %v2527_v50 = vsel %vm2521_vm3, %v2515_v9, %v2519_v24  ;;  %v2587_v49 = vsel %vm1281_vm13, %v2580_v3, %v2581_v36  ;;  %v2589_v31 = vsel %vm2583_vm10, %v2577_v1, %v2581_v36 }
 0x23a   : > { %v2526_v23 = vsel %vm2521_vm3, %v6224_v52, %v2525_v41  ;;  %2535 = vst [vmem:[#allocation3 + $0x130] sm:$0xc] %v2527_v50  ;;  %v2588_v8 = vsel %vm2583_vm10, %v6218_v51, %v2587_v49  ;;  %2597 = vst [vmem:[#allocation3 + $0x14c] sm:$0x3] %v2589_v31  ;;  %v5828_v11 = vmov 0.0   ;;  %v2643_v4 = vrot.slane %v2639_v44, 4  ;;  %5402 = vmatmul.mubr.msk.bf16.vlgmr.msra.gmra.mxu1 %vm3155_vm9, %v6697_v63 }
 0x23b   : > { %5528 = vmatprep.subr.bf16.mxu1 %v5828_v11  ;;  %2534 = vst [vmem:[#allocation3 + $0x128] sm:$0xcc] %v2526_v23  ;;  %2596 = vst [vmem:[#allocation3 + $0x144] sm:$0x33] %v2588_v8  ;;  %v2209_v3 = vrot.slane %v2205_v30, 4  ;;  %vm7666_vm3 = vcmask 56320   ;;  %5542 = vmatprep.mubr.msk.bf16.mxu1 %vm5829_vm0, %v5828_v11 }
 0x23c   : > { %v2649_v52 = vsel %vm1281_vm13, %v2642_v55, %v2643_v4  ;;  %v2651_v7 = vsel %vm7665_vm2, %v2639_v44, %v2643_v4  ;;  %v5692_v53 = vld [vmem:[#allocation3 + $0x168] ss:$28 sps:$4 sm:$0xff]   ;;  %vm7668_vm1 = vmmov %vm7666_vm3  ;;  %v2267_v55 = vpop.permute.xlu0 %2266  ;;  %v2329_v12 = vpop.permute.xlu1 %2328  ;;  %vm7669_vm10 = vcmask 48128   ;;  %vm7670_vm2 = vcmask 457728  }
 0x23d   : > { %v2215_v51 = vsel %vm1281_vm13, %v2208_v37, %v2209_v3  ;;  %v2217_v48 = vsel %vm7666_vm3, %v2205_v30, %v2209_v3  ;;  %v2650_v61 = vsel %vm7667_vm4, %v6379_v46, %v2649_v52  ;;  %2659 = vst [vmem:[#allocation3 + $0x14c] sm:$0xc] %v2651_v7  ;;  %v5693_v9 = vld [vmem:[#allocation3 + $0x160] ss:$28 sps:$4 sm:$0xff]   ;;  %v2271_v37 = vrot.slane %v2267_v55, 4  ;;  %5529 = vmatpush3.bf16.msra.mxu1 %v5692_v53  ;;  %vm7671_vm3 = vmmov %vm7669_vm10 }
 0x23e   : > { %v2216_v56 = vsel %vm7668_vm1, %v6426_v29, %v2215_v51  ;;  %2225 = vst [vmem:[#allocation3 + $0xf8] sm:$0x3] %v2217_v48  ;;  %v5695_v1 = vld [vmem:[#allocation3 + $0x164] ss:$28 sps:$4 sm:$0xff]   ;;  %2658 = vst [vmem:[#allocation3 + $0x144] sm:$0xcc] %v2650_v61  ;;  %5530 = vmatprep.subr.bf16.mxu1 %v5828_v11 }
 0x23f   : > { %2224 = vst [vmem:[#allocation3 + $0xf0] sm:$0x33] %v2216_v56  ;;  %v2333_v34 = vrot.slane %v2329_v12, 4  ;;  %3243 = vmatprep.subr.bf16.mxu0 %v5695_v1  ;;  %v2277_v46 = vsel %vm1281_vm13, %v2270_v47, %v2271_v37  ;;  %v2279_v22 = vsel %vm7669_vm10, %v2267_v55, %v2271_v37  ;;  %vm7672_vm0 = vmmov %vm7670_vm2  ;;  %vm7673_vm4 = vcmask 449536  }
 0x240   : > { %3244 = vmatpush1.bf16.msra.mxu0 %v5693_v9  ;;  %v2278_v36 = vsel %vm7671_vm3, %v6445_v42, %v2277_v46  ;;  %2287 = vst [vmem:[#allocation3 + $0xf8] sm:$0xc] %v2279_v22  ;;  %v2391_v50 = vpop.permute.xlu0 %2390  ;;  %v1957_v49 = vpop.permute.xlu1 %1956  ;;  %vm7674_vm1 = vmmov %vm7673_vm4  ;;  %vm7675_vm10 = vcmask 138240  }
 0x241   : > { %v2339_v29 = vsel %vm1281_vm13, %v2332_v19, %v2333_v34  ;;  %v2341_v24 = vsel %vm7670_vm2, %v2329_v12, %v2333_v34  ;;  %2286 = vst [vmem:[#allocation3 + $0xf0] sm:$0xcc] %v2278_v36  ;;  %v2395_v47 = vrot.slane %v2391_v50, 4  ;;  %v1961_v31 = vrot.slane %v1957_v49, 4  ;;  %vm7677_vm3 = vmmov %vm7675_vm10 }
 0x242   : > { %v2340_v41 = vsel %vm7672_vm0, %v6447_v43, %v2339_v29  ;;  %2349 = vst [vmem:[#allocation3 + $0x114] sm:$0x3] %v2341_v24  ;;  %vm7676_vm2 = vcmask 130048  }
 0x243   : > { %2348 = vst [vmem:[#allocation3 + $0x10c] sm:$0x33] %v2340_v41  ;;  %v2401_v19 = vsel %vm1281_vm13, %v2394_v0, %v2395_v47  ;;  %v2403_v23 = vsel %vm7673_vm4, %v2391_v50, %v2395_v47  ;;  %v1967_v42 = vsel %vm1281_vm13, %v1960_v60, %v1961_v31  ;;  %v1969_v8 = vsel %vm7639_vm12, %v1957_v49, %v1961_v31  ;;  %vm7678_vm0 = vmmov %vm7676_vm2 }
 0x244   : > { %v5696_v43 = vld [vmem:[#allocation3 + $0x130] ss:$28 sps:$4 sm:$0xff]   ;;  %v2402_v44 = vsel %vm7674_vm1, %v6469_v62, %v2401_v19  ;;  %2411 = vst [vmem:[#allocation3 + $0x114] sm:$0xc] %v2403_v23  ;;  %v1968_v30 = vsel %vm7639_vm12, %v6514_v39, %v1967_v42  ;;  %1977 = vst [vmem:[#allocation3 + $0xc0] sm:$0x3] %v1969_v8  ;;  %v2019_v4 = vpop.permute.xlu0 %2018  ;;  %v2081_v3 = vpop.permute.xlu1 %2080 }
 0x245   : > { %v5697_v0 = vld [vmem:[#allocation3 + $0x128] ss:$28 sps:$4 sm:$0xff]   ;;  %2410 = vst [vmem:[#allocation3 + $0x10c] sm:$0xcc] %v2402_v44  ;;  %1976 = vst [vmem:[#allocation3 + $0xb8] sm:$0x33] %v1968_v30  ;;  %5531 = vmatpush3.bf16.msra.mxu1 %v5696_v43 }
 0x246   : > { %v5699_v52 = vld [vmem:[#allocation3 + $0x12c] ss:$28 sps:$4 sm:$0xff]   ;;  %v2023_v7 = vrot.slane %v2019_v4, 4  ;;  %v2085_v51 = vrot.slane %v2081_v3, 4  ;;  %5532 = vmatprep.subr.bf16.mxu1 %v5828_v11  ;;  %vm7679_vm4 = vcmask 64512   ;;  %vm7680_vm1 = vcmask 867328  }
 0x247   : > { %3245 = vmatprep.subr.bf16.mxu0 %v5699_v52  ;;  %v7686_v42 = vrot.slane %v6617_v59, 4 }
 0x248   : > { %v2029_v62 = vsel %vm1281_vm13, %v2022_v18, %v2023_v7  ;;  %v2031_v60 = vsel %vm7675_vm10, %v2019_v4, %v2023_v7  ;;  %v2091_v39 = vsel %vm1281_vm13, %v2084_v33, %v2085_v51  ;;  %v2093_v48 = vsel %vm7676_vm2, %v2081_v3, %v2085_v51  ;;  %3246 = vmatpush1.bf16.msra.mxu0 %v5697_v0  ;;  %v2143_v56 = vpop.permute.xlu0 %2142  ;;  %v1710_v55 = vpop.permute.xlu1 %1709  ;;  %vm7681_vm10 = vmmov %vm7679_vm4 }
 0x249   : > { %v2030_v53 = vsel %vm7677_vm3, %v6529_v58, %v2029_v62  ;;  %2039 = vst [vmem:[#allocation3 + $0xc0] sm:$0xc] %v2031_v60  ;;  %v2092_v61 = vsel %vm7678_vm0, %v6531_v35, %v2091_v39  ;;  %2101 = vst [vmem:[#allocation3 + $0xdc] sm:$0x3] %v2093_v48  ;;  %v2147_v18 = vrot.slane %v2143_v56, 4  ;;  %v1714_v12 = vrot.slane %v1710_v55, 4 }
 0x24a   : > { %2038 = vst [vmem:[#allocation3 + $0xb8] sm:$0xcc] %v2030_v53  ;;  %2100 = vst [vmem:[#allocation3 + $0xd4] sm:$0x33] %v2092_v61  ;;  %vm7684_vm3 = vcmask 220160  }
 0x24b   : > { %v2153_v33 = vsel %vm1281_vm13, %v2146_v10, %v2147_v18  ;;  %v2155_v9 = vsel %vm7679_vm4, %v2143_v56, %v2147_v18  ;;  %v1720_v58 = vsel %vm1281_vm13, %v1713_v20, %v1714_v12  ;;  %v1722_v1 = vsel %vm7680_vm1, %v1710_v55, %v1714_v12  ;;  %v5700_v35 = vld [vmem:[#allocation3 + $0xf8] ss:$28 sps:$4 sm:$0xff]   ;;  %vm7682_vm2 = vmmov %vm7680_vm1 }
 0x24c   : > { %v2154_v37 = vsel %vm7681_vm10, %v6549_v32, %v2153_v33  ;;  %2163 = vst [vmem:[#allocation3 + $0xdc] sm:$0xc] %v2155_v9  ;;  %v1721_v34 = vsel %vm7682_vm2, %v6582_v25, %v1720_v58  ;;  %1730 = vst [vmem:[#allocation3 + $0x88] sm:$0x3] %v1722_v1  ;;  %v1772_v46 = vpop.permute.xlu0 %1771  ;;  %v1834_v22 = vpop.permute.xlu1 %1833  ;;  %v5701_v10 = vld [vmem:[#allocation3 + $0xf0] ss:$28 sps:$4 sm:$0xff]   ;;  %5533 = vmatpush3.bf16.msra.mxu1 %v5700_v35 }
 0x24d   : > { %v5703_v29 = vld [vmem:[#allocation3 + $0xf4] ss:$28 sps:$4 sm:$0xff]   ;;  %2162 = vst [vmem:[#allocation3 + $0xd4] sm:$0xcc] %v2154_v37  ;;  %1729 = vst [vmem:[#allocation3 + $0x80] sm:$0x33] %v1721_v34  ;;  %5534 = vmatprep.subr.bf16.mxu1 %v5828_v11 }
 0x24e   : > { %v1776_v24 = vrot.slane %v1772_v46, 4  ;;  %v1838_v36 = vrot.slane %v1834_v22, 4  ;;  %3247 = vmatprep.subr.bf16.mxu0 %v5703_v29  ;;  %v7683_v25 = vrot.slane %v6599_v40, 4  ;;  %vm7685_vm0 = vmmov %vm7684_vm3  ;;  %vm7687_vm4 = vcmask 211968  }
 0x24f   : > { %3248 = vmatpush1.bf16.msra.mxu0 %v5701_v10  ;;  %vm7688_vm1 = vmmov %vm7687_vm4  ;;  %v7690_v33 = vrot.slane %v6665_v16, 4 }
 0x250   : > { %v1782_v32 = vsel %vm1281_vm13, %v1775_v57, %v1776_v24  ;;  %v1784_v20 = vsel %vm7645_vm7, %v1772_v46, %v1776_v24  ;;  %v1843_v41 = vsel %vm1281_vm13, %v7683_v25, %v1838_v36  ;;  %v1845_v50 = vsel %vm7684_vm3, %v1834_v22, %v1838_v36  ;;  %v1895_v31 = vpop.permute.xlu0 %1894  ;;  %v1462_v19 = vpop.permute.xlu1 %1461 }
 0x251   : > { %v1783_v49 = vsel %vm7645_vm7, %v6597_v45, %v1782_v32  ;;  %1792 = vst [vmem:[#allocation3 + $0x88] sm:$0xc] %v1784_v20  ;;  %v1844_v47 = vsel %vm7685_vm0, %v6599_v40, %v1843_v41  ;;  %1853 = vst [vmem:[#allocation3 + $0xa4] sm:$0x3] %v1845_v50  ;;  %v1899_v57 = vrot.slane %v1895_v31, 4  ;;  %v1466_v23 = vrot.slane %v1462_v19, 4 }
 0x252   : > { %1791 = vst [vmem:[#allocation3 + $0x80] sm:$0xcc] %v1783_v49  ;;  %1852 = vst [vmem:[#allocation3 + $0x9c] sm:$0x33] %v1844_v47 }
 0x253   : > { %v1905_v8 = vsel %vm1281_vm13, %v7686_v42, %v1899_v57  ;;  %v1907_v43 = vsel %vm7687_vm4, %v1895_v31, %v1899_v57  ;;  %v1472_v45 = vsel %vm1281_vm13, %v1465_v21, %v1466_v23  ;;  %v1474_v44 = vsel %vm1468_vm15, %v1462_v19, %v1466_v23  ;;  %v5704_v40 = vld [vmem:[#allocation3 + $0xc0] ss:$28 sps:$4 sm:$0xff]   ;;  %v219_v42 = vld [vmem:[%s7568_s0] sm:$0xff] }
 0x254   : > { %v1906_v30 = vsel %vm7688_vm1, %v6617_v59, %v1905_v8  ;;  %1915 = vst [vmem:[#allocation3 + $0xa4] sm:$0xc] %v1907_v43  ;;  %v1473_v4 = vsel %vm1468_vm15, %v6631_v14, %v1472_v45  ;;  %1482 = vst [vmem:[#allocation3 + $0x50] sm:$0x3] %v1474_v44  ;;  %v1524_v3 = vpop.permute.xlu0 %1523  ;;  %v1586_v0 = vpop.permute.xlu1 %1585  ;;  %v5705_v52 = vld [vmem:[#allocation3 + $0xb8] ss:$28 sps:$4 sm:$0xff]   ;;  %5535 = vmatpush3.bf16.msra.mxu1 %v5704_v40 }
 0x255   : > { %v5707_v7 = vld [vmem:[#allocation3 + $0xbc] ss:$28 sps:$4 sm:$0xff]   ;;  %1914 = vst [vmem:[#allocation3 + $0x9c] sm:$0xcc] %v1906_v30  ;;  %1481 = vst [vmem:[#allocation3 + $0x48] sm:$0x33] %v1473_v4  ;;  %5536 = vmatprep.subr.bf16.mxu1 %v5828_v11 }
 0x256   : > { %v1528_v51 = vrot.slane %v1524_v3, 4  ;;  %v1590_v62 = vrot.slane %v1586_v0, 4  ;;  %3249 = vmatprep.subr.bf16.mxu0 %v5707_v7  ;;  %v7689_v14 = vrot.slane %v6645_v13, 4  ;;  %v3325_v57 = vsub.s32 0, %v5881_v6 }
 0x257   : > { %3250 = vmatpush1.bf16.msra.mxu0 %v5705_v52  ;;  %v3329_v23 = vsub.s32 1, %v5881_v6  ;;  %v3337_v30 = vsub.s32 3, %v5881_v6  ;;  %v3341_v52 = vsub.s32 4, %v5881_v6  ;;  %v3349_v7 = vsub.s32 6, %v5881_v6 }
 0x258   : > { %v1534_v59 = vsel %vm1281_vm13, %v1527_v54, %v1528_v51  ;;  %v1536_v21 = vsel %vm1530_vm5, %v1524_v3, %v1528_v51  ;;  %v1596_v60 = vsel %vm1281_vm13, %v7689_v14, %v1590_v62  ;;  %v1598_v39 = vsel %vm1592_vm11, %v1586_v0, %v1590_v62  ;;  %v1648_v61 = vpop.permute.xlu0 %1647  ;;  %v1276_v56 = vpop.permute.xlu1 %1275 }
 0x259   : > { %v1535_v48 = vsel %vm1530_vm5, %v6643_v38, %v1534_v59  ;;  %1544 = vst [vmem:[#allocation3 + $0x50] sm:$0xc] %v1536_v21  ;;  %v1597_v53 = vsel %vm1592_vm11, %v6645_v13, %v1596_v60  ;;  %1606 = vst [vmem:[#allocation3 + $0x6c] sm:$0x3] %v1598_v39  ;;  %v1652_v54 = vrot.slane %v1648_v61, 4  ;;  %v1280_v55 = vrot.slane %v1276_v56, 4 }
 0x25a   : > { %1543 = vst [vmem:[#allocation3 + $0x48] sm:$0xcc] %v1535_v48  ;;  %1605 = vst [vmem:[#allocation3 + $0x64] sm:$0x33] %v1597_v53  ;;  %vm7691_vm5 = vcmask 1039360   ;;  %v6877_v8 = vrot.slane %v219_v42, %v3325_v57  ;;  %v6879_v43 = vrot.slane %v219_v42, %v3329_v23  ;;  %v6888_v0 = vrot.slane %v219_v42, %v3337_v30 }
 0x25b   : > { %v1658_v18 = vsel %vm1281_vm13, %v1651_v17, %v1652_v54  ;;  %v1660_v12 = vsel %vm1654_vm8, %v1648_v61, %v1652_v54  ;;  %v1286_v38 = vsel %vm1281_vm13, %v7690_v33, %v1280_v55  ;;  %v1288_v9 = vsel %vm7691_vm5, %v1276_v56, %v1280_v55  ;;  %v5708_v13 = vld [vmem:[#allocation3 + $0x88] ss:$28 sps:$4 sm:$0xff]   ;;  %vm7692_vm11 = vmmov %vm7691_vm5 }
 0x25c   : > { %v1659_v58 = vsel %vm1654_vm8, %v6663_v28, %v1658_v18  ;;  %1668 = vst [vmem:[#allocation3 + $0x6c] sm:$0xc] %v1660_v12  ;;  %v1287_v1 = vsel %vm7692_vm11, %v6665_v16, %v1286_v38  ;;  %1296 = vst [vmem:[#allocation3 + $0x18] sm:$0xc] %v1288_v9  ;;  %v1338_v35 = vpop.permute.xlu0 %1337  ;;  %v1400_v37 = vpop.permute.xlu1 %1399  ;;  %v5709_v17 = vld [vmem:[#allocation3 + $0x80] ss:$28 sps:$4 sm:$0xff]   ;;  %5537 = vmatpush3.bf16.msra.mxu1 %v5708_v13  ;;  %v6894_v21 = vrot.slane %v219_v42, %v3341_v52 }
 0x25d   : > { %v5711_v34 = vld [vmem:[#allocation3 + $0x84] ss:$28 sps:$4 sm:$0xff]   ;;  %1667 = vst [vmem:[#allocation3 + $0x64] sm:$0xcc] %v1659_v58  ;;  %1295 = vst [vmem:[#allocation3 + $0x10] sm:$0xcc] %v1287_v1  ;;  %5538 = vmatprep.subr.bf16.mxu1 %v5828_v11  ;;  %v6896_v60 = vrot.slane %v219_v42, %v3349_v7 }
 0x25e   : > { %v1342_v46 = vrot.slane %v1338_v35, 4  ;;  %v1404_v22 = vrot.slane %v1400_v37, 4  ;;  %3251 = vmatprep.subr.bf16.mxu0 %v5711_v34  ;;  %v3345_v51 = vsub.s32 5, %v5881_v6  ;;  %vm7704_vm4 = vmmov %vm7691_vm5  ;;  %vm4006_vm1 = vcmask 973824  }
 0x25f   : > { %3252 = vmatpush1.bf16.msra.mxu0 %v5709_v17  ;;  %vm3927_vm5 = vcmask 7168   ;;  %vm7707_vm11 = vmmov %vm7704_vm4 }
 0x260   : > { %v1348_v28 = vsel %vm1281_vm13, %v1341_v27, %v1342_v46  ;;  %v1350_v10 = vsel %vm1344_vm6, %v1338_v35, %v1342_v46  ;;  %v1410_v16 = vsel %vm1281_vm13, %v1403_v15, %v1404_v22  ;;  %v1412_v29 = vsel %vm1406_vm14, %v1400_v37, %v1404_v22 }
 0x261   : > { %v1349_v24 = vsel %vm1344_vm6, %v6680_v26, %v1348_v28  ;;  %1358 = vst [vmem:[#allocation3 + $0x34] sm:$0x3] %v1350_v10  ;;  %v1411_v36 = vsel %vm1406_vm14, %v6682_v5, %v1410_v16  ;;  %1420 = vst [vmem:[#allocation3 + $0x34] sm:$0xc] %v1412_v29  ;;  %v6898_v39 = vrot.slane %v219_v42, %v3345_v51 }
 0x262   : > { %1357 = vst [vmem:[#allocation3 + $0x2c] sm:$0x33] %v1349_v24  ;;  %1419 = vst [vmem:[#allocation3 + $0x2c] sm:$0xcc] %v1411_v36 }
 0x263   : > { %v5712_v27 = vld [vmem:[#allocation3 + $0x50] ss:$28 sps:$4 sm:$0xff]  }
 0x264   : > { %v5713_v32 = vld [vmem:[#allocation3 + $0x48] ss:$28 sps:$4 sm:$0xff]   ;;  %5539 = vmatpush3.bf16.msra.mxu1 %v5712_v27 }
 0x265   : > { %v5715_v20 = vld [vmem:[#allocation3 + $0x4c] ss:$28 sps:$4 sm:$0xff]   ;;  %5540 = vmatprep.subr.bf16.mxu1 %v5828_v11 }
 0x266   : > { %3253 = vmatprep.subr.bf16.mxu0 %v5715_v20 }
 0x267   : > { %3254 = vmatpush1.bf16.msra.mxu0 %v5713_v32 }
 0x268   : > { %v5716_v15 = vld [vmem:[#allocation3 + $0x18] ss:$28 sps:$4 sm:$0xff]  }
 0x269   : > { %v5717_v25 = vld [vmem:[#allocation3 + $0x10] ss:$28 sps:$4 sm:$0xff]   ;;  %5541 = vmatpush3.bf16.msra.mxu1 %v5716_v15 }
 0x26a   : > { %v5719_v41 = vld [vmem:[#allocation3 + $0x14] ss:$28 sps:$4 sm:$0xff]  }
 0x26b   : > { %3255 = vmatprep.subr.bf16.mxu0 %v5719_v41 }
 0x26c   : > { %3256 = vmatpush1.bf16.msra.mxu0 %v5717_v25  ;;  %5543 = vmatmul.mubr.msk.bf16.vlgmr.msra.gmra.mxu1 %vm3155_vm9, %v6697_v63 }
 0x26f   : > { %5403 = vmatmul.mubr.msk.bf16.vlgmr.msra.gmra.mxu0 %vm3155_vm9, %v6697_v63  ;;  %v3333_v63 = vsub.s32 2, %v5881_v6 }
 0x271   : > { %v6884_v40 = vrot.slane %v219_v42, %v3333_v63 }
 0x2ed   : > { %v3193_v26 = vpop.f32.mrf.mxu0 }
 0x2ee   : > { %v3358_v45 = vmul.f32 %v6877_v8, %v3193_v26 }
 0x2ef   : > { %v3195_v5 = vpop.f32.mrf.mxu0 }
 0x2f0   : > { %v3359_v44 = vmul.f32 %v6879_v43, %v3195_v5 }
 0x2f1   : > { %v3197_v50 = vpop.f32.mrf.mxu0 }
 0x2f2   : > { %v3365_v4 = vadd.f32 %v3359_v44, %v3358_v45 }
 0x2f3   : > { %v3198_v49 = vpop.f32.mrf.mxu0 }
 0x2fa   : > { %v3234_v47 = vpop.f32.mrf.mxu1 }
 0x2fb   : > { %v3360_v3 = vmul.f32 %v6884_v40, %v3234_v47 }
 0x2fc   : > { %v3236_v31 = vpop.f32.mrf.mxu1 }
 0x2fd   : > { %v3366_v62 = vadd.f32 %v3365_v4, %v3360_v3  ;;  %v3361_v59 = vmul.f32 %v6888_v0, %v3236_v31 }
 0x2fe   : > { %v3238_v11 = vpop.f32.mrf.mxu1 }
 0x2ff   : > { %v3367_v61 = vadd.f32 %v3366_v62, %v3361_v59 }
 0x300   : > { %v3239_v19 = vpop.f32.mrf.mxu1 }
 0x32c   : > { %v3316_v14 = vpop.f32.mrf.mxu1 }
 0x32d   : > { %v3364_v18 = vmul.f32 %v6896_v60, %v3316_v14 }
 0x32e   : > { %v5544_v53 = vpop.f32.mrf.mxu1 }
 0x32f   : > { %v3275_v48 = vpop.f32.mrf.mxu0 }
 0x330   : > { %v3362_v56 = vmul.f32 %v6894_v21, %v3275_v48  ;;  %v3319_v55 = vpop.f32.mrf.mxu1 }
 0x331   : > { %v3277_v54 = vpop.f32.mrf.mxu0 }
 0x332   : > { %v3368_v6 = vadd.f32 %v3367_v61, %v3362_v56  ;;  %v3363_v12 = vmul.f32 %v6898_v39, %v3277_v54  ;;  %v5545_v38 = vpop.f32.mrf.mxu1 }
 0x333   : > { %v3279_v33 = vpop.f32.mrf.mxu0 }
 0x334   : > { %v3369_v9 = vadd.f32 %v3368_v6, %v3363_v12 }
 0x335   : > { %v3280_v13 = vpop.f32.mrf.mxu0 }
 0x336   : > { %v3370_v58 = vadd.f32 %v3369_v9, %v3364_v18 }
 0x338   : > { %3371 = vadd.xlane.f32.xlu0 %v3370_v58 }
 0x3c1   : > { %v3372_v1 = vpop.xlane.xlu0 %3371 }
 0x3c2   : > { %v3373_v35 = vmul.f32 0.001953125, %v3372_v1 }
 0x3c4   : > { %v3374_v37 = vsub.f32 %v3193_v26, %v3373_v35  ;;  %v3375_v17 = vsub.f32 %v3195_v5, %v3373_v35  ;;  %v3376_v34 = vsub.f32 %v3234_v47, %v3373_v35  ;;  %v3377_v46 = vsub.f32 %v3236_v31, %v3373_v35 }
 0x3c5   : > { %v3378_v22 = vsub.f32 %v3275_v48, %v3373_v35  ;;  %v3379_v29 = vsub.f32 %v3277_v54, %v3373_v35  ;;  %v3380_v32 = vsub.f32 %v3316_v14, %v3373_v35 }
 0x3c6   : > { %v3381_v28 = vmul.f32 %v3374_v37, %v6877_v8  ;;  %v3382_v10 = vmul.f32 %v3375_v17, %v6879_v43  ;;  %v3383_v16 = vmul.f32 %v3376_v34, %v6884_v40  ;;  %v3384_v24 = vmul.f32 %v3377_v46, %v6888_v0 }
 0x3c7   : > { %v3385_v20 = vmul.f32 %v3378_v22, %v6894_v21  ;;  %v3386_v41 = vmul.f32 %v3379_v29, %v6898_v39  ;;  %v3387_v50 = vmul.f32 %v3380_v32, %v6896_v60 }
 0x3c8   : > { %v3388_v36 = vmul.f32 %v3381_v28, %v3381_v28  ;;  %v3389_v27 = vmul.f32 %v3382_v10, %v3382_v10  ;;  %v3390_v15 = vmul.f32 %v3383_v16, %v3383_v16  ;;  %v3391_v26 = vmul.f32 %v3384_v24, %v3384_v24 }
 0x3c9   : > { %v3392_v49 = vmul.f32 %v3385_v20, %v3385_v20  ;;  %v3393_v31 = vmul.f32 %v3386_v41, %v3386_v41  ;;  %v3394_v19 = vmul.f32 %v3387_v50, %v3387_v50 }
 0x3ca   : > { %v3395_v25 = vadd.f32 %v3389_v27, %v3388_v36 }
 0x3cc   : > { %v3396_v5 = vadd.f32 %v3395_v25, %v3390_v15 }
 0x3ce   : > { %v3397_v47 = vadd.f32 %v3396_v5, %v3391_v26 }
 0x3d0   : > { %v3398_v11 = vadd.f32 %v3397_v47, %v3392_v49 }
 0x3d2   : > { %v3399_v57 = vadd.f32 %v3398_v11, %v3393_v31 }
 0x3d4   : > { %v3400_v23 = vadd.f32 %v3399_v57, %v3394_v19 }
 0x3d6   : > { %3401 = vadd.xlane.f32.xlu1 %v3400_v23 }
 0x45f   : > { %v3402_v42 = vpop.xlane.xlu1 %3401 }
 0x460   : > { %v3403_v63 = vmul.f32 0.001953125, %v3402_v42 }
 0x462   : > { %v3404_v45 = vadd.f32 1e-05, %v3403_v63 }
 0x464   : > { %5736 = vrsqrt.f32 %v3404_v45 }
 0x471   : > { %v5737_v44 = vpop.eup %5736 }
 0x472   : > { %v3408_v30 = vmul.f32 %v5737_v44, %v3376_v34  ;;  %v3409_v4 = vmul.f32 %v5737_v44, %v3377_v46  ;;  %v3406_v3 = vmul.f32 %v5737_v44, %v3374_v37  ;;  %v3407_v52 = vmul.f32 %v5737_v44, %v3375_v17 }
 0x473   : > { %v3410_v7 = vmul.f32 %v5737_v44, %v3378_v22  ;;  %v3411_v51 = vmul.f32 %v5737_v44, %v3379_v29  ;;  %v3412_v62 = vmul.f32 %v5737_v44, %v3380_v32 }
 0x474   : > { %vm3415_vm9 = vcmp.gt.f32.partialorder %v3408_v30, 0.0  ;;  %vm3416_vm8 = vcmp.gt.f32.partialorder %v3409_v4, 0.0  ;;  %v3422_v59 = vmul.f32 0.01, %v3408_v30  ;;  %v3423_v14 = vmul.f32 0.01, %v3409_v4 }
 0x475   : > { %vm3413_vm6 = vcmp.gt.f32.partialorder %v3406_v3, 0.0  ;;  %vm3414_vm10 = vcmp.gt.f32.partialorder %v3407_v52, 0.0  ;;  %v3420_v48 = vmul.f32 0.01, %v3406_v3  ;;  %v3421_v53 = vmul.f32 0.01, %v3407_v52 }
 0x476   : > { %v3429_v61 = vsel %vm3415_vm9, %v3408_v30, %v3422_v59  ;;  %v3430_v56 = vsel %vm3416_vm8, %v3409_v4, %v3423_v14  ;;  %vm3417_vm2 = vcmp.gt.f32.partialorder %v3410_v7, 0.0  ;;  %vm3418_vm3 = vcmp.gt.f32.partialorder %v3411_v51, 0.0 }
 0x477   : > { %v3436_v54 = vmul.f32 %v3429_v61, %v6884_v40  ;;  %v3437_v55 = vmul.f32 %v3430_v56, %v6888_v0  ;;  %v3427_v18 = vsel %vm3413_vm6, %v3406_v3, %v3420_v48  ;;  %v3428_v6 = vsel %vm3414_vm10, %v3407_v52, %v3421_v53 }
 0x478   : > { %v3434_v12 = vmul.f32 %v3427_v18, %v6877_v8  ;;  %v3435_v33 = vmul.f32 %v3428_v6, %v6879_v43  ;;  %v3424_v38 = vmul.f32 0.01, %v3410_v7  ;;  %v3425_v9 = vmul.f32 0.01, %v3411_v51 }
 0x479   : > { %v6914_v13 = vpack.c.bf16 %v3437_v55, %v3436_v54  ;;  %vm3419_vm0 = vcmp.gt.f32.partialorder %v3412_v62, 0.0  ;;  %v3426_v58 = vmul.f32 0.01, %v3412_v62  ;;  %vm3855_vm9 = vcmask 80896  }
 0x47a   : > { %v6916_v1 = vpack.c.bf16 %v3435_v33, %v3434_v12  ;;  %v3431_v35 = vsel %vm3417_vm2, %v3410_v7, %v3424_v38  ;;  %v3432_v37 = vsel %vm3418_vm3, %v3411_v51, %v3425_v9  ;;  %vm3891_vm8 = vcmask 72704  }
 0x47b   : > { %3471 = vst [vmem:[#allocation5 + $0xc] sm:$0xff] %v6914_v13  ;;  %3960 = vrot.lane.b32.xlu1 %v6914_v13, %s5783_s20  ;;  %v3438_v17 = vmul.f32 %v3431_v35, %v6894_v21  ;;  %v3439_v34 = vmul.f32 %v3432_v37, %v6898_v39  ;;  %v3433_v46 = vsel %vm3419_vm0, %v3412_v62, %v3426_v58  ;;  %vm3783_vm6 = vcmask 728064  }
 0x47c   : > { %3470 = vst [vmem:[#allocation5 + $0x4] sm:$0xff] %v6916_v1  ;;  %3958 = vrot.lane.b32.xlu0 %v6916_v1, %s5783_s20  ;;  %v3440_v22 = vmul.f32 %v3433_v46, %v6896_v60  ;;  %vm3819_vm10 = vcmask 89088   ;;  %vm5034_vm2 = vcmask 785408   ;;  %vm7628_vm3 = vcmask 744448  }
 0x47d   : > { %v6927_v28 = vpack.c.bf16 %v3439_v34, %v3438_v17  ;;  %vm7629_vm0 = vcmask 736256  }
 0x47e   : > { %v5519_v10 = vpack.c.bf16 %v3440_v22, %v3440_v22 }
 0x47f   : > { %3995 = vrot.lane.b32.xlu1 %v6914_v13, %s7693_s17  ;;  %3472 = vst [vmem:[#allocation5 + $0x14] sm:$0xff] %v6927_v28 }
 0x480   : > { %3993 = vrot.lane.b32.xlu0 %v6916_v1, %s7693_s17  ;;  %3473 = vst [vmem:[#allocation5 + $0x1c] sm:$0xf] %v5519_v10 }
 0x483   : > { %v3907_v16 = vld [vmem:[#allocation5 + $0x8] sm:$0xff]  ;;  %v3906_v29 = vld [vmem:[#allocation5] sm:$0xff] }
 0x484   : > { %3916 = vrot.lane.b32.xlu1 %v3907_v16, %s7694_s19  ;;  %3914 = vrot.lane.b32.xlu0 %v3906_v29, %s7694_s19 }
 0x486   : > { %v3944_v24 = vld [vmem:[#allocation5 + $0x14] sm:$0xff] }
 0x487   : > { %3948 = vst [vmem:[#allocation4 + $0x17c] sm:$0xff] %v3944_v24  ;;  %v3945_v36 = vld [vmem:[#allocation5 + $0x1c] sm:$0xf]  ;;  %v3908_v27 = vld [vmem:[#allocation5 + $0x10] sm:$0xff] }
 0x488   : > { %3997 = vrot.lane.b32.xlu1 %v6927_v28, %s7693_s17  ;;  %3962 = vrot.lane.b32.xlu0 %v6927_v28, %s5783_s20  ;;  %3949 = vst [vmem:[#allocation4 + $0x184] sm:$0xf] %v3945_v36 }
 0x48c   : > { %3844 = vrot.lane.b32.xlu1 %v3907_v16, %s5830_s14  ;;  %3842 = vrot.lane.b32.xlu0 %v3906_v29, %s5830_s14 }
 0x490   : > { %3880 = vrot.lane.b32.xlu1 %v3907_v16, %s7695_s13  ;;  %3878 = vrot.lane.b32.xlu0 %v3906_v29, %s7695_s13 }
 0x494   : > { %3918 = vrot.lane.b32.xlu0 %v3908_v27, %s7694_s19  ;;  %3770 = vrot.lane.b32.xlu1 %v3906_v29, %s5831_s10 }
 0x498   : > { %3772 = vrot.lane.b32.xlu0 %v3907_v16, %s5831_s10  ;;  %3806 = vrot.lane.b32.xlu1 %v3906_v29, %s7696_s23 }
 0x49c   : > { %3808 = vrot.lane.b32.xlu0 %v3907_v16, %s7696_s23  ;;  %3846 = vrot.lane.b32.xlu1 %v3908_v27, %s5830_s14 }
 0x4a0   : > { %3882 = vrot.lane.b32.xlu0 %v3908_v27, %s7695_s13  ;;  %3698 = vrot.lane.b32.xlu1 %v3906_v29, %s7697_s6 }
 0x4a4   : > { %3700 = vrot.lane.b32.xlu0 %v3907_v16, %s7697_s6  ;;  %3734 = vrot.lane.b32.xlu1 %v3906_v29, %s5832_s7 }
 0x4a8   : > { %3736 = vrot.lane.b32.xlu0 %v3907_v16, %s5832_s7  ;;  %3774 = vrot.lane.b32.xlu1 %v3908_v27, %s5831_s10 }
 0x4ac   : > { %3810 = vrot.lane.b32.xlu0 %v3908_v27, %s7696_s23  ;;  %3626 = vrot.lane.b32.xlu1 %v3906_v29, %s5833_s22 }
 0x4b0   : > { %3628 = vrot.lane.b32.xlu0 %v3907_v16, %s5833_s22  ;;  %3662 = vrot.lane.b32.xlu1 %v3906_v29, %s7698_s26 }
 0x4b4   : > { %3664 = vrot.lane.b32.xlu0 %v3907_v16, %s7698_s26  ;;  %3702 = vrot.lane.b32.xlu1 %v3908_v27, %s7697_s6 }
 0x4b8   : > { %3738 = vrot.lane.b32.xlu0 %v3908_v27, %s5832_s7  ;;  %3554 = vrot.lane.b32.xlu1 %v3906_v29, %s7699_s27 }
 0x4bc   : > { %3556 = vrot.lane.b32.xlu0 %v3907_v16, %s7699_s27  ;;  %3590 = vrot.lane.b32.xlu1 %v3906_v29, %s7700_s30 }
 0x4c0   : > { %3592 = vrot.lane.b32.xlu0 %v3907_v16, %s7700_s30  ;;  %3630 = vrot.lane.b32.xlu1 %v3908_v27, %s5833_s22 }
 0x4c4   : > { %3666 = vrot.lane.b32.xlu0 %v3908_v27, %s7698_s26  ;;  %3482 = vrot.lane.b32.xlu1 %v3906_v29, %s7701_s12 }
 0x4c8   : > { %3484 = vrot.lane.b32.xlu0 %v3907_v16, %s7701_s12  ;;  %3518 = vrot.lane.b32.xlu1 %v3906_v29, %s7627_s5 }
 0x4cc   : > { %3520 = vrot.lane.b32.xlu0 %v3907_v16, %s7627_s5  ;;  %3558 = vrot.lane.b32.xlu1 %v3908_v27, %s7699_s27 }
 0x4d0   : > { %3594 = vrot.lane.b32.xlu0 %v3908_v27, %s7700_s30  ;;  %3486 = vrot.lane.b32.xlu1 %v3908_v27, %s7701_s12 }
 0x4d4   : > { %3522 = vrot.lane.b32.xlu0 %v3908_v27, %s7627_s5  ;;  %4384 = vrot.lane.b32.xlu1 %v6916_v1, %s7626_s21 }
 0x4d8   : > { %4386 = vrot.lane.b32.xlu0 %v6914_v13, %s7626_s21  ;;  %4313 = vrot.lane.b32.xlu1 %v6916_v1, %s7702_s11 }
 0x4dc   : > { %4315 = vrot.lane.b32.xlu0 %v6914_v13, %s7702_s11  ;;  %4349 = vrot.lane.b32.xlu1 %v6916_v1, %s7625_s29 }
 0x4e0   : > { %4351 = vrot.lane.b32.xlu0 %v6914_v13, %s7625_s29  ;;  %4388 = vrot.lane.b32.xlu1 %v6927_v28, %s7626_s21  ;;  %s7709_s21 = smov 17  }
 0x4e4   : > { %4243 = vrot.lane.b32.xlu0 %v6916_v1, %s7624_s24  ;;  %4245 = vrot.lane.b32.xlu1 %v6914_v13, %s7624_s24 }
 0x4e8   : > { %4278 = vrot.lane.b32.xlu0 %v6916_v1, %s7661_s9  ;;  %4280 = vrot.lane.b32.xlu1 %v6914_v13, %s7661_s9 }
 0x4ec   : > { %4317 = vrot.lane.b32.xlu0 %v6927_v28, %s7702_s11  ;;  %4353 = vrot.lane.b32.xlu1 %v6927_v28, %s7625_s29  ;;  %s5835_s29 = smov 38  }
 0x4ed   : > { %v3961_v32 = vpop.permute.xlu1 %3960 }
 0x4ee   : > { %v3967_v20 = vrot.slane %v3961_v32, 4  ;;  %v3959_v15 = vpop.permute.xlu0 %3958 }
 0x4ef   : > { %v3966_v25 = vrot.slane %v3959_v15, 4 }
 0x4f0   : > { %4171 = vrot.lane.b32.xlu0 %v6916_v1, %s7703_s18  ;;  %4173 = vrot.lane.b32.xlu1 %v6914_v13, %s7703_s18 }
 0x4f1   : > { %v3970_v41 = vsel %vm1281_vm13, %v3966_v25, %v3967_v20  ;;  %v3996_v26 = vpop.permute.xlu1 %3995 }
 0x4f2   : > { %v3971_v5 = vsel %vm7704_vm4, %v3959_v15, %v3970_v41  ;;  %v4002_v50 = vrot.slane %v3996_v26, 4  ;;  %v3994_v49 = vpop.permute.xlu0 %3993  ;;  %vm7630_vm4 = vcmask 818176  }
 0x4f3   : > { %v4001_v47 = vrot.slane %v3994_v49, 4 }
 0x4f4   : > { %4207 = vrot.lane.b32.xlu0 %v6916_v1, %s7705_s8  ;;  %4209 = vrot.lane.b32.xlu1 %v6914_v13, %s7705_s8 }
 0x4f5   : > { %v4005_v31 = vsel %vm1281_vm13, %v4001_v47, %v4002_v50 }
 0x4f6   : > { %v4007_v11 = vsel %vm4006_vm1, %v3994_v49, %v4005_v31  ;;  %v3917_v19 = vpop.permute.xlu1 %3916  ;;  %v3915_v57 = vpop.permute.xlu0 %3914 }
 0x4f7   : > { %v3923_v23 = vrot.slane %v3917_v19, 4  ;;  %v3922_v42 = vrot.slane %v3915_v57, 4  ;;  %v5460_v63 = vcombine.low %v3971_v5, %v4007_v11  ;;  %v5461_v45 = vcombine.high %v3971_v5, %v4007_v11 }
 0x4f8   : > { %4247 = vrot.lane.b32.xlu0 %v6927_v28, %s7624_s24  ;;  %4282 = vrot.lane.b32.xlu1 %v6927_v28, %s7661_s9  ;;  %s7706_s24 = smov 39  }
 0x4f9   : > { %v3926_v44 = vsel %vm1281_vm13, %v3922_v42, %v3923_v23  ;;  %5038 = vmatprep.subr.bf16.mxu0 %v5461_v45 }
 0x4fa   : > { %v3928_v30 = vsel %vm3927_vm5, %v3915_v57, %v3926_v44  ;;  %v7021_v4 = vpop.permute.xlu1 %3997  ;;  %v7023_v3 = vpop.permute.xlu0 %3962  ;;  %5039 = vmatpush1.bf16.msra.mxu0 %v5460_v63  ;;  %v7111_v44 = vld [vmem:[#allocation5 + $0x1c] sm:$0xff] }
 0x4fb   : > { %v4003_v52 = vrot.slane %v7021_v4, 4  ;;  %v3968_v7 = vrot.slane %v7023_v3, 4  ;;  %v5453_v51 = vcombine.low %v3928_v30, %v6916_v1  ;;  %v5454_v62 = vcombine.high %v3928_v30, %v6916_v1 }
 0x4fc   : > { %4099 = vrot.lane.b32.xlu0 %v6916_v1, %s7706_s24  ;;  %4101 = vrot.lane.b32.xlu1 %v6914_v13, %s7706_s24 }
 0x4fd   : > { %v4008_v59 = vsel %vm1281_vm13, %v4002_v50, %v4003_v52  ;;  %v3972_v14 = vsel %vm1281_vm13, %v3967_v20, %v3968_v7  ;;  %5040 = vmatprep.subr.bf16.mxu0 %v5454_v62 }
 0x4fe   : > { %v4009_v48 = vsel %vm4006_vm1, %v3996_v26, %v4008_v59  ;;  %v3973_v53 = vsel %vm7707_vm11, %v3961_v32, %v3972_v14  ;;  %v7041_v61 = vpop.permute.xlu1 %3844  ;;  %v3843_v56 = vpop.permute.xlu0 %3842  ;;  %5041 = vmatpush1.bf16.msra.mxu0 %v5453_v51  ;;  %v7080_v26 = vld [vmem:[%s7571_s3] sm:$0xff]  ;;  %vm7631_vm11 = vcmask 809984  }
 0x4ff   : > { %v3851_v54 = vrot.slane %v7041_v61, 4  ;;  %v3850_v55 = vrot.slane %v3843_v56, 4  ;;  %v5462_v18 = vcombine.low %v3973_v53, %v4009_v48  ;;  %v5463_v6 = vcombine.high %v3973_v53, %v4009_v48 }
 0x500   : > { %4135 = vrot.lane.b32.xlu0 %v6916_v1, %s5835_s29  ;;  %4137 = vrot.lane.b32.xlu1 %v6914_v13, %s5835_s29 }
 0x501   : > { %v3854_v12 = vsel %vm1281_vm13, %v3850_v55, %v3851_v54  ;;  %5079 = vmatprep.subr.bf16.mxu1 %v5463_v6 }
 0x502   : > { %v3856_v33 = vsel %vm3855_vm9, %v3843_v56, %v3854_v12  ;;  %v3881_v38 = vpop.permute.xlu1 %3880  ;;  %v3879_v9 = vpop.permute.xlu0 %3878  ;;  %5080 = vmatpush1.bf16.msra.mxu1 %v5462_v18 }
 0x503   : > { %v3887_v58 = vrot.slane %v3881_v38, 4  ;;  %v3886_v35 = vrot.slane %v3879_v9, 4 }
 0x504   : > { %4175 = vrot.lane.b32.xlu0 %v6927_v28, %s7703_s18  ;;  %4211 = vrot.lane.b32.xlu1 %v6927_v28, %s7705_s8 }
 0x505   : > { %v3890_v37 = vsel %vm1281_vm13, %v3886_v35, %v3887_v58 }
 0x506   : > { %v3892_v17 = vsel %vm3891_vm8, %v3879_v9, %v3890_v37  ;;  %v7056_v34 = vpop.permute.xlu0 %3918  ;;  %v3771_v46 = vpop.permute.xlu1 %3770 }
 0x507   : > { %v3924_v22 = vrot.slane %v7056_v34, 4  ;;  %v5446_v10 = vcombine.low %v3856_v33, %v3892_v17  ;;  %v5447_v16 = vcombine.high %v3856_v33, %v3892_v17  ;;  %v3778_v32 = vrot.slane %v3771_v46, 4 }
 0x508   : > { %4029 = vrot.lane.b32.xlu0 %v6916_v1, %s5826_s16  ;;  %4031 = vrot.lane.b32.xlu1 %v6914_v13, %s5826_s16 }
 0x509   : > { %v3929_v29 = vsel %vm1281_vm13, %v3923_v23, %v3924_v22  ;;  %5042 = vmatprep.subr.bf16.mxu0 %v5447_v16 }
 0x50a   : > { %v3930_v24 = vsel %vm3927_vm5, %v3917_v19, %v3929_v29  ;;  %v7067_v36 = vpop.permute.xlu0 %3772  ;;  %v3807_v27 = vpop.permute.xlu1 %3806  ;;  %5043 = vmatpush1.bf16.msra.mxu0 %v5446_v10 }
 0x50b   : > { %v3779_v20 = vrot.slane %v7067_v36, 4  ;;  %v5455_v15 = vcombine.low %v3930_v24, %v6914_v13  ;;  %v5456_v25 = vcombine.high %v3930_v24, %v6914_v13 }
 0x50c   : > { %4064 = vrot.lane.b32.xlu0 %v6916_v1, %s5753_s28  ;;  %4066 = vrot.lane.b32.xlu1 %v6914_v13, %s5753_s28  ;;  %v7089_v1 = vcombine.high %v7080_v26, %v7080_v26  ;;  %v3814_v13 = vrot.slane %v3807_v27, 4 }
 0x50d   : > { %v3782_v41 = vsel %vm1281_vm13, %v3778_v32, %v3779_v20  ;;  %5081 = vmatprep.subr.bf16.mxu1 %v5456_v25 }
 0x50e   : > { %v3784_v5 = vsel %vm3783_vm6, %v3771_v46, %v3782_v41  ;;  %v7083_v50 = vpop.permute.xlu0 %3808  ;;  %v7085_v49 = vpop.permute.xlu1 %3846  ;;  %5082 = vmatpush1.bf16.msra.mxu1 %v5455_v15  ;;  %5509 = vmatprep.mubr.msk.bf16.mxu0 %vm5034_vm2, %v7089_v1 }
 0x50f   : > { %v3815_v47 = vrot.slane %v7083_v50, 4  ;;  %v3852_v31 = vrot.slane %v7085_v49, 4  ;;  %5510 = vmatprep.mubr.msk.bf16.mxu1 %vm5034_vm2, %v7089_v1 }
 0x510   : > { %4103 = vrot.lane.b32.xlu0 %v6927_v28, %s7706_s24  ;;  %4139 = vrot.lane.b32.xlu1 %v6927_v28, %s5835_s29 }
 0x511   : > { %v3818_v11 = vsel %vm1281_vm13, %v3814_v13, %v3815_v47  ;;  %v3857_v19 = vsel %vm1281_vm13, %v3851_v54, %v3852_v31 }
 0x512   : > { %v3820_v57 = vsel %vm3819_vm10, %v3807_v27, %v3818_v11  ;;  %v3858_v23 = vsel %vm3855_vm9, %v7041_v61, %v3857_v19  ;;  %v7108_v42 = vpop.permute.xlu0 %3882  ;;  %v3699_v63 = vpop.permute.xlu1 %3698 }
 0x513   : > { %v3888_v45 = vrot.slane %v7108_v42, 4  ;;  %v5439_v30 = vcombine.low %v3784_v5, %v3820_v57  ;;  %v5440_v51 = vcombine.high %v3784_v5, %v3820_v57  ;;  %v3706_v53 = vrot.slane %v3699_v63, 4 }
 0x514   : > { %3964 = vrot.lane.b32.xlu0 %v7111_v44, %s5783_s20  ;;  %3999 = vrot.lane.b32.xlu1 %v7111_v44, %s7693_s17  ;;  %s7708_s20 = smov 110   ;;  %s7710_s17 = smov 18  }
 0x515   : > { %v3893_v62 = vsel %vm1281_vm13, %v3887_v58, %v3888_v45  ;;  %5044 = vmatprep.subr.bf16.mxu0 %v5440_v51  ;;  %v7130_v58 = vld [vmem:[#allocation5 + $0x18] sm:$0xff] }
 0x516   : > { %v3894_v59 = vsel %vm3891_vm8, %v3881_v38, %v3893_v62  ;;  %v3701_v14 = vpop.permute.xlu0 %3700  ;;  %v3735_v48 = vpop.permute.xlu1 %3734  ;;  %5045 = vmatpush1.bf16.msra.mxu0 %v5439_v30 }
 0x517   : > { %v3707_v61 = vrot.slane %v3701_v14, 4  ;;  %v5448_v56 = vcombine.low %v3858_v23, %v3894_v59  ;;  %v5449_v54 = vcombine.high %v3858_v23, %v3894_v59  ;;  %v3742_v33 = vrot.slane %v3735_v48, 4 }
 0x518   : > { %4033 = vrot.lane.b32.xlu0 %v6927_v28, %s5826_s16  ;;  %4068 = vrot.lane.b32.xlu1 %v6927_v28, %s5753_s28 }
 0x519   : > { %v3710_v55 = vsel %vm1281_vm13, %v3706_v53, %v3707_v61  ;;  %5083 = vmatprep.subr.bf16.mxu1 %v5449_v54 }
 0x51a   : > { %v3712_v18 = vsel %vm7628_vm3, %v3699_v63, %v3710_v55  ;;  %v3737_v6 = vpop.permute.xlu0 %3736  ;;  %v7127_v12 = vpop.permute.xlu1 %3774  ;;  %5084 = vmatpush1.bf16.msra.mxu1 %v5448_v56 }
 0x51b   : > { %v3743_v38 = vrot.slane %v3737_v6, 4  ;;  %v3780_v9 = vrot.slane %v7127_v12, 4 }
 0x51c   : > { %3920 = vrot.lane.b32.xlu0 %v7130_v58, %s7694_s19  ;;  %3848 = vrot.lane.b32.xlu1 %v7130_v58, %s5830_s14  ;;  %s7711_s19 = smov 28  }
 0x51d   : > { %v3746_v28 = vsel %vm1281_vm13, %v3742_v33, %v3743_v38  ;;  %v3785_v35 = vsel %vm1281_vm13, %v3779_v20, %v3780_v9 }
 0x51e   : > { %v3748_v37 = vsel %vm7629_vm0, %v3735_v48, %v3746_v28  ;;  %v3786_v17 = vsel %vm3783_vm6, %v7067_v36, %v3785_v35  ;;  %v7143_v46 = vpop.permute.xlu0 %3810  ;;  %v3627_v10 = vpop.permute.xlu1 %3626 }
 0x51f   : > { %v3816_v16 = vrot.slane %v7143_v46, 4  ;;  %v5432_v29 = vcombine.low %v3712_v18, %v3748_v37  ;;  %v5433_v24 = vcombine.high %v3712_v18, %v3748_v37  ;;  %v3634_v15 = vrot.slane %v3627_v10, 4 }
 0x520   : > { %3884 = vrot.lane.b32.xlu0 %v7130_v58, %s7695_s13  ;;  %3776 = vrot.lane.b32.xlu1 %v7130_v58, %s5831_s10 }
 0x521   : > { %v3821_v27 = vsel %vm1281_vm13, %v3815_v47, %v3816_v16  ;;  %5046 = vmatprep.subr.bf16.mxu0 %v5433_v24 }
 0x522   : > { %v3822_v36 = vsel %vm3819_vm10, %v7083_v50, %v3821_v27  ;;  %v3629_v32 = vpop.permute.xlu0 %3628  ;;  %v3663_v20 = vpop.permute.xlu1 %3662  ;;  %5047 = vmatpush1.bf16.msra.mxu0 %v5432_v29 }
 0x523   : > { %v3635_v25 = vrot.slane %v3629_v32, 4  ;;  %v5441_v41 = vcombine.low %v3786_v17, %v3822_v36  ;;  %v5442_v5 = vcombine.high %v3786_v17, %v3822_v36  ;;  %v3670_v19 = vrot.slane %v3663_v20, 4 }
 0x524   : > { %3812 = vrot.lane.b32.xlu0 %v7130_v58, %s7696_s23  ;;  %3704 = vrot.lane.b32.xlu1 %v7130_v58, %s7697_s6 }
 0x525   : > { %v3638_v13 = vsel %vm1281_vm13, %v3634_v15, %v3635_v25  ;;  %5085 = vmatprep.subr.bf16.mxu1 %v5442_v5 }
 0x526   : > { %v3640_v47 = vsel %vm7630_vm4, %v3627_v10, %v3638_v13  ;;  %v3665_v50 = vpop.permute.xlu0 %3664  ;;  %v7161_v11 = vpop.permute.xlu1 %3702  ;;  %5086 = vmatpush1.bf16.msra.mxu1 %v5441_v41 }
 0x527   : > { %v3671_v57 = vrot.slane %v3665_v50, 4  ;;  %v3708_v23 = vrot.slane %v7161_v11, 4 }
 0x528   : > { %3740 = vrot.lane.b32.xlu0 %v7130_v58, %s5832_s7  ;;  %3632 = vrot.lane.b32.xlu1 %v7130_v58, %s5833_s22 }
 0x529   : > { %v3674_v63 = vsel %vm1281_vm13, %v3670_v19, %v3671_v57  ;;  %v3713_v30 = vsel %vm1281_vm13, %v3707_v61, %v3708_v23 }
 0x52a   : > { %v3676_v51 = vsel %vm7631_vm11, %v3663_v20, %v3674_v63  ;;  %v3714_v62 = vsel %vm7628_vm3, %v3701_v14, %v3713_v30  ;;  %v7174_v59 = vpop.permute.xlu0 %3738  ;;  %v3555_v48 = vpop.permute.xlu1 %3554  ;;  %vm3567_vm3 = vcmask 891904  }
 0x52b   : > { %v7650_v53 = vrot.slane %v7174_v59, 4  ;;  %v5425_v56 = vcombine.low %v3640_v47, %v3676_v51  ;;  %v5426_v54 = vcombine.high %v3640_v47, %v3676_v51  ;;  %v3562_v33 = vrot.slane %v3555_v48, 4 }
 0x52c   : > { %3668 = vrot.lane.b32.xlu0 %v7130_v58, %s7698_s26  ;;  %3560 = vrot.lane.b32.xlu1 %v7130_v58, %s7699_s27 }
 0x52d   : > { %v3749_v61 = vsel %vm1281_vm13, %v3743_v38, %v7650_v53  ;;  %5048 = vmatprep.subr.bf16.mxu0 %v5426_v54 }
 0x52e   : > { %v3750_v14 = vsel %vm7629_vm0, %v3737_v6, %v3749_v61  ;;  %v3557_v55 = vpop.permute.xlu0 %3556  ;;  %v3591_v18 = vpop.permute.xlu1 %3590  ;;  %5049 = vmatpush1.bf16.msra.mxu0 %v5425_v56  ;;  %vm7633_vm0 = vcmask 826368  }
 0x52f   : > { %v3563_v28 = vrot.slane %v3557_v55, 4  ;;  %v5434_v35 = vcombine.low %v3714_v62, %v3750_v14  ;;  %v5435_v37 = vcombine.high %v3714_v62, %v3750_v14  ;;  %v3598_v29 = vrot.slane %v3591_v18, 4 }
 0x530   : > { %3596 = vrot.lane.b32.xlu0 %v7130_v58, %s7700_s30  ;;  %3488 = vrot.lane.b32.xlu1 %v7130_v58, %s7701_s12 }
 0x531   : > { %v3566_v17 = vsel %vm1281_vm13, %v3562_v33, %v3563_v28  ;;  %5087 = vmatprep.subr.bf16.mxu1 %v5435_v37 }
 0x532   : > { %v3568_v38 = vsel %vm3567_vm3, %v3555_v48, %v3566_v17  ;;  %v3593_v6 = vpop.permute.xlu0 %3592  ;;  %v7191_v10 = vpop.permute.xlu1 %3630  ;;  %5088 = vmatpush1.bf16.msra.mxu1 %v5434_v35 }
 0x533   : > { %v3599_v24 = vrot.slane %v3593_v6, 4  ;;  %v7648_v27 = vrot.slane %v7191_v10, 4 }
 0x534   : > { %3524 = vrot.lane.b32.xlu0 %v7130_v58, %s7708_s20  ;;  %4390 = vrot.lane.b32.xlu1 %v7111_v44, %s7709_s21 }
 0x535   : > { %v3602_v36 = vsel %vm1281_vm13, %v3598_v29, %v3599_v24  ;;  %v3641_v20 = vsel %vm1281_vm13, %v3635_v25, %v7648_v27 }
 0x536   : > { %v3604_v15 = vsel %vm7633_vm0, %v3591_v18, %v3602_v36  ;;  %v3642_v41 = vsel %vm7630_vm4, %v3629_v32, %v3641_v20  ;;  %v7204_v5 = vpop.permute.xlu0 %3666  ;;  %v3483_v13 = vpop.permute.xlu1 %3482  ;;  %vm7632_vm4 = vcmask 908288  }
 0x537   : > { %v7647_v47 = vrot.slane %v7204_v5, 4  ;;  %v5418_v19 = vcombine.low %v3568_v38, %v3604_v15  ;;  %v5419_v58 = vcombine.high %v3568_v38, %v3604_v15  ;;  %v3490_v51 = vrot.slane %v3483_v13, 4 }
 0x538   : > { %4319 = vrot.lane.b32.xlu0 %v7111_v44, %s7702_s11  ;;  %4355 = vrot.lane.b32.xlu1 %v7111_v44, %s7710_s17 }
 0x539   : > { %v3677_v25 = vsel %vm1281_vm13, %v3671_v57, %v7647_v47  ;;  %5050 = vmatprep.subr.bf16.mxu0 %v5419_v58 }
 0x53a   : > { %v3678_v32 = vsel %vm7631_vm11, %v3665_v50, %v3677_v25  ;;  %v3485_v63 = vpop.permute.xlu0 %3484  ;;  %v3519_v30 = vpop.permute.xlu1 %3518  ;;  %5051 = vmatpush1.bf16.msra.mxu0 %v5418_v19  ;;  %vm7640_vm11 = vcmask 900096  }
 0x53b   : > { %v3491_v62 = vrot.slane %v3485_v63, 4  ;;  %v5427_v48 = vcombine.low %v3642_v41, %v3678_v32  ;;  %v5428_v56 = vcombine.high %v3642_v41, %v3678_v32  ;;  %v3526_v14 = vrot.slane %v3519_v30, 4 }
 0x53c   : > { %4249 = vrot.lane.b32.xlu0 %v7111_v44, %s7711_s19  ;;  %4284 = vrot.lane.b32.xlu1 %v7111_v44, %s7661_s9 }
 0x53d   : > { %v3494_v54 = vsel %vm1281_vm13, %v3490_v51, %v3491_v62  ;;  %5089 = vmatprep.subr.bf16.mxu1 %v5428_v56 }
 0x53e   : > { %v3496_v57 = vsel %vm7632_vm4, %v3483_v13, %v3494_v54  ;;  %v3521_v50 = vpop.permute.xlu0 %3520  ;;  %v7221_v61 = vpop.permute.xlu1 %3558  ;;  %5090 = vmatpush1.bf16.msra.mxu1 %v5427_v48 }
 0x53f   : > { %v3527_v18 = vrot.slane %v3521_v50, 4  ;;  %v7643_v33 = vrot.slane %v7221_v61, 4 }
 0x540   : > { %4177 = vrot.lane.b32.xlu0 %v7111_v44, %s7703_s18  ;;  %4213 = vrot.lane.b32.xlu1 %v7111_v44, %s7705_s8 }
 0x541   : > { %v3530_v35 = vsel %vm1281_vm13, %v3526_v14, %v3527_v18  ;;  %v3569_v37 = vsel %vm1281_vm13, %v3563_v28, %v7643_v33 }
 0x542   : > { %v3532_v17 = vsel %vm7640_vm11, %v3519_v30, %v3530_v35  ;;  %v3570_v38 = vsel %vm3567_vm3, %v3557_v55, %v3569_v37  ;;  %v7234_v29 = vpop.permute.xlu0 %3594  ;;  %v7236_v36 = vpop.permute.xlu1 %3486  ;;  %v4520_v35 = vld [vmem:[#allocation4 + $0x2f4] sm:$0xff] }
 0x543   : > { %v7642_v20 = vrot.slane %v7234_v29, 4  ;;  %v7635_v15 = vrot.slane %v7236_v36, 4  ;;  %v5411_v41 = vcombine.low %v3496_v57, %v3532_v17  ;;  %v5412_v13 = vcombine.high %v3496_v57, %v3532_v17 }
 0x544   : > { %4105 = vrot.lane.b32.xlu0 %v7111_v44, %s7706_s24  ;;  %4141 = vrot.lane.b32.xlu1 %v7111_v44, %s5835_s29 }
 0x545   : > { %v3605_v55 = vsel %vm1281_vm13, %v3599_v24, %v7642_v20  ;;  %v3497_v28 = vsel %vm1281_vm13, %v3491_v62, %v7635_v15  ;;  %5052 = vmatprep.subr.bf16.mxu0 %v5412_v13 }
 0x546   : > { %v3606_v19 = vsel %vm7633_vm0, %v3593_v6, %v3605_v55  ;;  %v3498_v58 = vsel %vm7632_vm4, %v3485_v63, %v3497_v28  ;;  %v7252_v25 = vpop.permute.xlu0 %3522  ;;  %v4385_v32 = vpop.permute.xlu1 %4384  ;;  %5053 = vmatpush1.bf16.msra.mxu0 %v5411_v41  ;;  %vm7712_vm4 = vcmask 138240   ;;  %vm7638_vm0 = vcmask 154624  }
 0x547   : > { %v7634_v30 = vrot.slane %v7252_v25, 4  ;;  %v5420_v51 = vcombine.low %v3570_v38, %v3606_v19  ;;  %v5421_v48 = vcombine.high %v3570_v38, %v3606_v19  ;;  %v4392_v56 = vrot.slane %v4385_v32, 4 }
 0x548   : > { %4035 = vrot.lane.b32.xlu0 %v7111_v44, %s5826_s16  ;;  %4070 = vrot.lane.b32.xlu1 %v7111_v44, %s5753_s28 }
 0x549   : > { %v3533_v6 = vsel %vm1281_vm13, %v3527_v18, %v7634_v30  ;;  %5091 = vmatprep.subr.bf16.mxu1 %v5421_v48 }
 0x54a   : > { %v3534_v24 = vsel %vm7640_vm11, %v3521_v50, %v3533_v6  ;;  %v4387_v63 = vpop.permute.xlu0 %4386  ;;  %v4314_v62 = vpop.permute.xlu1 %4313  ;;  %5092 = vmatpush1.bf16.msra.mxu1 %v5420_v51  ;;  %vm4112_vm11 = vcmask 318464  }
 0x54b   : > { %v4393_v54 = vrot.slane %v4387_v63, 4  ;;  %v5413_v57 = vcombine.low %v3498_v58, %v3534_v24  ;;  %v5414_v14 = vcombine.high %v3498_v58, %v3534_v24  ;;  %v4321_v18 = vrot.slane %v4314_v62, 4 }
 0x54d   : > { %v4396_v37 = vsel %vm1281_vm13, %v4392_v56, %v4393_v54  ;;  %5093 = vmatprep.subr.bf16.mxu1 %v5414_v14  ;;  %v4521_v56 = vld [vmem:[#allocation4 + $0x2fc] sm:$0xff] }
 0x54e   : > { %v4397_v44 = vsel %vm7712_vm4, %v4385_v32, %v4396_v37  ;;  %v4316_v17 = vpop.permute.xlu0 %4315  ;;  %v4350_v38 = vpop.permute.xlu1 %4349  ;;  %5094 = vmatpush1.bf16.msra.mxu1 %v5413_v57 }
 0x54f   : > { %v4322_v41 = vrot.slane %v4316_v17, 4  ;;  %v5502_v50 = vcombine.low %v4397_v44, %v4520_v35  ;;  %v5503_v13 = vcombine.high %v4397_v44, %v4520_v35  ;;  %v4357_v51 = vrot.slane %v4350_v38, 4 }
 0x551   : > { %v4325_v55 = vsel %vm1281_vm13, %v4321_v18, %v4322_v41  ;;  %5058 = vmatprep.subr.bf16.mxu0 %v5503_v13 }
 0x552   : > { %v4327_v28 = vsel %vm7638_vm0, %v4314_v62, %v4325_v55  ;;  %v4352_v19 = vpop.permute.xlu0 %4351  ;;  %v7267_v58 = vpop.permute.xlu1 %4388  ;;  %5059 = vmatpush2.bf16.msra.mxu0 %v5502_v50 }
 0x553   : > { %v4358_v48 = vrot.slane %v4352_v19, 4  ;;  %v7636_v32 = vrot.slane %v7267_v58, 4 }
 0x555   : > { %v4361_v6 = vsel %vm1281_vm13, %v4357_v51, %v4358_v48  ;;  %v4398_v24 = vsel %vm1281_vm13, %v4393_v54, %v7636_v32 }
 0x556   : > { %v4362_v57 = vsel %vm7639_vm12, %v4350_v38, %v4361_v6  ;;  %v4399_v14 = vsel %vm7712_vm4, %v4387_v63, %v4398_v24  ;;  %v4244_v62 = vpop.permute.xlu0 %4243  ;;  %v4246_v35 = vpop.permute.xlu1 %4245  ;;  %vm7713_vm4 = vcmask 220160  }
 0x557   : > { %v4251_v37 = vrot.slane %v4244_v62, 4  ;;  %v4252_v44 = vrot.slane %v4246_v35, 4  ;;  %v5495_v18 = vcombine.low %v4327_v28, %v4362_v57  ;;  %v5496_v50 = vcombine.high %v4327_v28, %v4362_v57 }
 0x558   : > { %v5504_v13 = vcombine.low %v4399_v14, %v4521_v56  ;;  %v5505_v55 = vcombine.high %v4399_v14, %v4521_v56 }
 0x559   : > { %v4255_v30 = vsel %vm1281_vm13, %v4251_v37, %v4252_v44  ;;  %5060 = vmatprep.subr.bf16.mxu0 %v5496_v50 }
 0x55a   : > { %v4256_v51 = vsel %vm7645_vm7, %v4244_v62, %v4255_v30  ;;  %v4279_v15 = vpop.permute.xlu0 %4278  ;;  %v4281_v54 = vpop.permute.xlu1 %4280  ;;  %5099 = vmatprep.subr.bf16.mxu1 %v5505_v55  ;;  %5061 = vmatpush2.bf16.msra.mxu0 %v5495_v18 }
 0x55b   : > { %v4286_v38 = vrot.slane %v4279_v15, 4  ;;  %v4287_v6 = vrot.slane %v4281_v54, 4  ;;  %5100 = vmatpush2.bf16.msra.mxu1 %v5504_v13 }
 0x55d   : > { %v4290_v63 = vsel %vm1281_vm13, %v4286_v38, %v4287_v6 }
 0x55e   : > { %v4291_v24 = vsel %vm7713_vm4, %v4279_v15, %v4290_v63  ;;  %v7280_v32 = vpop.permute.xlu0 %4317  ;;  %v7282_v28 = vpop.permute.xlu1 %4353  ;;  %vm4184_vm4 = vcmask 302080  }
 0x55f   : > { %v7637_v56 = vrot.slane %v7280_v32, 4  ;;  %v7641_v57 = vrot.slane %v7282_v28, 4  ;;  %v5488_v30 = vcombine.low %v4256_v51, %v4291_v24  ;;  %v5489_v14 = vcombine.high %v4256_v51, %v4291_v24 }
 0x561   : > { %v4328_v62 = vsel %vm1281_vm13, %v4322_v41, %v7637_v56  ;;  %v4363_v37 = vsel %vm1281_vm13, %v4358_v48, %v7641_v57  ;;  %5062 = vmatprep.subr.bf16.mxu0 %v5489_v14 }
 0x562   : > { %v4329_v15 = vsel %vm7638_vm0, %v4316_v17, %v4328_v62  ;;  %v4364_v18 = vsel %vm7639_vm12, %v4352_v19, %v4363_v37  ;;  %v4172_v50 = vpop.permute.xlu0 %4171  ;;  %v4174_v13 = vpop.permute.xlu1 %4173  ;;  %5063 = vmatpush2.bf16.msra.mxu0 %v5488_v30  ;;  %vm4220_vm0 = vcmask 236544   ;;  %vm7714_vm12 = vcmask 220160  }
 0x563   : > { %v4179_v55 = vrot.slane %v4172_v50, 4  ;;  %v4180_v38 = vrot.slane %v4174_v13, 4  ;;  %v5497_v51 = vcombine.low %v4329_v15, %v4364_v18  ;;  %v5498_v63 = vcombine.high %v4329_v15, %v4364_v18 }
 0x565   : > { %v4183_v24 = vsel %vm1281_vm13, %v4179_v55, %v4180_v38  ;;  %5101 = vmatprep.subr.bf16.mxu1 %v5498_v63 }
 0x566   : > { %v4185_v41 = vsel %vm4184_vm4, %v4172_v50, %v4183_v24  ;;  %v4208_v56 = vpop.permute.xlu0 %4207  ;;  %v4210_v48 = vpop.permute.xlu1 %4209  ;;  %5102 = vmatpush2.bf16.msra.mxu1 %v5497_v51 }
 0x567   : > { %v4215_v14 = vrot.slane %v4208_v56, 4  ;;  %v4216_v17 = vrot.slane %v4210_v48, 4 }
 0x569   : > { %v4219_v19 = vsel %vm1281_vm13, %v4215_v14, %v4216_v17 }
 0x56a   : > { %v4221_v62 = vsel %vm4220_vm0, %v4208_v56, %v4219_v19  ;;  %v7298_v30 = vpop.permute.xlu0 %4247  ;;  %v7300_v37 = vpop.permute.xlu1 %4282 }
 0x56b   : > { %v7644_v15 = vrot.slane %v7298_v30, 4  ;;  %v7646_v18 = vrot.slane %v7300_v37, 4  ;;  %v5481_v55 = vcombine.low %v4185_v41, %v4221_v62  ;;  %v5482_v50 = vcombine.high %v4185_v41, %v4221_v62 }
 0x56d   : > { %v4257_v51 = vsel %vm1281_vm13, %v4252_v44, %v7644_v15  ;;  %v4292_v63 = vsel %vm1281_vm13, %v4287_v6, %v7646_v18  ;;  %5064 = vmatprep.subr.bf16.mxu0 %v5482_v50 }
 0x56e   : > { %v4258_v56 = vsel %vm7645_vm7, %v4246_v35, %v4257_v51  ;;  %v4293_v24 = vsel %vm7714_vm12, %v4281_v54, %v4292_v63  ;;  %v4100_v14 = vpop.permute.xlu0 %4099  ;;  %v4102_v19 = vpop.permute.xlu1 %4101  ;;  %5065 = vmatpush2.bf16.msra.mxu0 %v5481_v55  ;;  %vm7652_vm7 = vcmask 310272   ;;  %vm7715_vm12 = vcmask 1039360  }
 0x56f   : > { %v4107_v57 = vrot.slane %v4100_v14, 4  ;;  %v4108_v20 = vrot.slane %v4102_v19, 4  ;;  %v5490_v41 = vcombine.low %v4258_v56, %v4293_v24  ;;  %v5491_v62 = vcombine.high %v4258_v56, %v4293_v24 }
 0x571   : > { %v4111_v33 = vsel %vm1281_vm13, %v4107_v57, %v4108_v20  ;;  %5103 = vmatprep.subr.bf16.mxu1 %v5491_v62 }
 0x572   : > { %v4113_v44 = vsel %vm4112_vm11, %v4100_v14, %v4111_v33  ;;  %v4136_v15 = vpop.permute.xlu0 %4135  ;;  %v4138_v6 = vpop.permute.xlu1 %4137  ;;  %5104 = vmatpush2.bf16.msra.mxu1 %v5490_v41 }
 0x573   : > { %v4143_v50 = vrot.slane %v4136_v15, 4  ;;  %v4144_v35 = vrot.slane %v4138_v6, 4 }
 0x575   : > { %v4147_v54 = vsel %vm1281_vm13, %v4143_v50, %v4144_v35 }
 0x576   : > { %v4149_v51 = vsel %vm7652_vm7, %v4136_v15, %v4147_v54  ;;  %v7316_v55 = vpop.permute.xlu0 %4175  ;;  %v7318_v63 = vpop.permute.xlu1 %4211 }
 0x577   : > { %v7649_v56 = vrot.slane %v7316_v55, 4  ;;  %v7651_v57 = vrot.slane %v7318_v63, 4  ;;  %v5474_v24 = vcombine.low %v4113_v44, %v4149_v51  ;;  %v5475_v33 = vcombine.high %v4113_v44, %v4149_v51 }
 0x579   : > { %v4186_v14 = vsel %vm1281_vm13, %v4180_v38, %v7649_v56  ;;  %v4222_v41 = vsel %vm1281_vm13, %v4216_v17, %v7651_v57  ;;  %5066 = vmatprep.subr.bf16.mxu0 %v5475_v33 }
 0x57a   : > { %v4187_v15 = vsel %vm4184_vm4, %v4174_v13, %v4186_v14  ;;  %v4223_v62 = vsel %vm4220_vm0, %v4210_v48, %v4222_v41  ;;  %v4030_v50 = vpop.permute.xlu0 %4029  ;;  %v4032_v54 = vpop.permute.xlu1 %4031  ;;  %5067 = vmatpush2.bf16.msra.mxu0 %v5474_v24 }
 0x57b   : > { %v4037_v18 = vrot.slane %v4030_v50, 4  ;;  %v4038_v47 = vrot.slane %v4032_v54, 4  ;;  %v5483_v27 = vcombine.low %v4187_v15, %v4223_v62  ;;  %v5484_v44 = vcombine.high %v4187_v15, %v4223_v62 }
 0x57d   : > { %v4041_v51 = vsel %vm1281_vm13, %v4037_v18, %v4038_v47  ;;  %5105 = vmatprep.subr.bf16.mxu1 %v5484_v44 }
 0x57e   : > { %v4042_v38 = vsel %vm1406_vm14, %v4030_v50, %v4041_v51  ;;  %v4065_v56 = vpop.permute.xlu0 %4064  ;;  %v4067_v53 = vpop.permute.xlu1 %4066  ;;  %5106 = vmatpush2.bf16.msra.mxu1 %v5483_v27 }
 0x57f   : > { %v4072_v17 = vrot.slane %v4065_v56, 4  ;;  %v4073_v33 = vrot.slane %v4067_v53, 4 }
 0x581   : > { %v4076_v13 = vsel %vm1281_vm13, %v4072_v17, %v4073_v33 }
 0x582   : > { %v4077_v48 = vsel %vm1468_vm15, %v4065_v56, %v4076_v13  ;;  %v7334_v14 = vpop.permute.xlu0 %4103  ;;  %v7336_v24 = vpop.permute.xlu1 %4139  ;;  %v7350_v13 = vcombine.low %v7080_v26, %v7080_v26 }
 0x583   : > { %v4109_v41 = vrot.slane %v7334_v14, 4  ;;  %v4145_v18 = vrot.slane %v7336_v24, 4  ;;  %v5467_v15 = vcombine.low %v4042_v38, %v4077_v48  ;;  %v5468_v62 = vcombine.high %v4042_v38, %v4077_v48 }
 0x585   : > { %v4114_v27 = vsel %vm1281_vm13, %v4108_v20, %v4109_v41  ;;  %v4150_v50 = vsel %vm1281_vm13, %v4144_v35, %v4145_v18  ;;  %5068 = vmatprep.subr.bf16.mxu0 %v5468_v62 }
 0x586   : > { %v4115_v56 = vsel %vm4112_vm11, %v4102_v19, %v4114_v27  ;;  %v4151_v44 = vsel %vm7652_vm7, %v4138_v6, %v4150_v50  ;;  %v3965_v51 = vpop.permute.xlu0 %3964  ;;  %v4000_v17 = vpop.permute.xlu1 %3999  ;;  %5069 = vmatpush2.bf16.msra.mxu0 %v5467_v15  ;;  %vm7716_vm7 = vmmov %vm7715_vm12 }
 0x587   : > { %v3969_v38 = vrot.slane %v3965_v51, 4  ;;  %v4004_v48 = vrot.slane %v4000_v17, 4  ;;  %v5476_v57 = vcombine.low %v4115_v56, %v4151_v44  ;;  %v5477_v20 = vcombine.high %v4115_v56, %v4151_v44 }
 0x589   : > { %v3974_v35 = vsel %vm1281_vm13, %v3968_v7, %v3969_v38  ;;  %v3976_v62 = vsel %vm7715_vm12, %v3965_v51, %v3969_v38  ;;  %v4010_v19 = vsel %vm1281_vm13, %v4003_v52, %v4004_v48  ;;  %v4012_v6 = vsel %vm4006_vm1, %v4000_v17, %v4004_v48  ;;  %5107 = vmatprep.subr.bf16.mxu1 %v5477_v20 }
 0x58a   : > { %v3975_v26 = vsel %vm7716_vm7, %v7023_v3, %v3974_v35  ;;  %3984 = vst [vmem:[#allocation4 + $0x1a0] sm:$0xf] %v3976_v62  ;;  %v4011_v15 = vsel %vm4006_vm1, %v7021_v4, %v4010_v19  ;;  %4020 = vst [vmem:[#allocation4 + $0x1bc] sm:$0xf] %v4012_v6  ;;  %v7364_v27 = vpop.permute.xlu0 %4033  ;;  %v7366_v7 = vpop.permute.xlu1 %4068  ;;  %5108 = vmatpush2.bf16.msra.mxu1 %v5476_v57  ;;  %5071 = vmatmul.mubr.bf16.vlgmr.msra.gmra.mxu0 %v7350_v13  ;;  %vm7717_vm7 = vcmask 744448   ;;  %vm7730_vm12 = vcmask 826368  }
 0x58b   : > { %v4039_v52 = vrot.slane %v7364_v27, 4  ;;  %v4074_v50 = vrot.slane %v7366_v7, 4  ;;  %v5464_v56 = vcombine.low %v3975_v26, %v4011_v15  ;;  %v5465_v44 = vcombine.high %v3975_v26, %v4011_v15  ;;  %5511 = vmatprep.mubr.msk.bf16.mxu0 %vm5034_vm2, %v7089_v1  ;;  %vm7718_vm1 = vmmov %vm7717_vm7 }
 0x58d   : > { %v4043_v4 = vsel %vm1281_vm13, %v4038_v47, %v4039_v52  ;;  %v4078_v3 = vsel %vm1281_vm13, %v4073_v33, %v4074_v50  ;;  %5120 = vmatprep.subr.bf16.mxu0 %v5465_v44  ;;  %v5740_v44 = vld [vmem:[#allocation4 + $0x17c] sm:$0xff] }
 0x58e   : > { %v4044_v57 = vsel %vm1406_vm14, %v4032_v54, %v4043_v4  ;;  %v4079_v51 = vsel %vm1468_vm15, %v4067_v53, %v4078_v3  ;;  %v3921_v17 = vpop.permute.xlu0 %3920  ;;  %v3849_v38 = vpop.permute.xlu1 %3848  ;;  %5121 = vmatpush1.bf16.msra.mxu0 %v5464_v56 }
 0x58f   : > { %v3925_v48 = vrot.slane %v3921_v17, 4  ;;  %v3853_v20 = vrot.slane %v3849_v38, 4  ;;  %v5469_v35 = vcombine.low %v4044_v57, %v4079_v51  ;;  %v5470_v62 = vcombine.high %v4044_v57, %v4079_v51 }
 0x591   : > { %v3931_v47 = vsel %vm1281_vm13, %v3924_v22, %v3925_v48  ;;  %v3933_v19 = vsel %vm3927_vm5, %v3921_v17, %v3925_v48  ;;  %v3859_v33 = vsel %vm1281_vm13, %v3852_v31, %v3853_v20  ;;  %v3861_v54 = vsel %vm3855_vm9, %v3849_v38, %v3853_v20  ;;  %5109 = vmatprep.subr.bf16.mxu1 %v5470_v62  ;;  %v5722_v31 = vld [vmem:[#allocation4 + $0x1a0] ss:$28 sps:$4 sm:$0xff]  }
 0x592   : > { %v3932_v53 = vsel %vm3927_vm5, %v7056_v34, %v3931_v47  ;;  %3941 = vst [vmem:[#allocation4 + $0x168] sm:$0xf] %v3933_v19  ;;  %v3860_v6 = vsel %vm3855_vm9, %v7085_v49, %v3859_v33  ;;  %3869 = vst [vmem:[#allocation4 + $0x130] sm:$0xf] %v3861_v54  ;;  %v3885_v26 = vpop.permute.xlu0 %3884  ;;  %v3777_v15 = vpop.permute.xlu1 %3776  ;;  %5110 = vmatpush2.bf16.msra.mxu1 %v5469_v35  ;;  %vm7720_vm5 = vcmask 736256   ;;  %vm7722_vm9 = vcmask 818176  }
 0x593   : > { %v3889_v22 = vrot.slane %v3885_v26, 4  ;;  %v3781_v56 = vrot.slane %v3777_v15, 4  ;;  %v5457_v4 = vcombine.low %v3932_v53, %v5740_v44  ;;  %v5458_v3 = vcombine.high %v3932_v53, %v5740_v44  ;;  %5161 = vmatprep.subr.bf16.mxu1 %v5827_v2 }
 0x594   : > { %v7721_v44 = vrot.slane %v7191_v10, 4 }
 0x595   : > { %v3895_v34 = vsel %vm1281_vm13, %v3888_v45, %v3889_v22  ;;  %v3897_v57 = vsel %vm3891_vm8, %v3885_v26, %v3889_v22  ;;  %v3787_v49 = vsel %vm1281_vm13, %v3780_v9, %v3781_v56  ;;  %v3789_v51 = vsel %vm3783_vm6, %v3777_v15, %v3781_v56  ;;  %5112 = vmatmul.mubr.bf16.vlgmr.msra.gmra.mxu1 %v7350_v13 }
 0x596   : > { %v3896_v17 = vsel %vm3891_vm8, %v7108_v42, %v3895_v34  ;;  %3905 = vst [vmem:[#allocation4 + $0x14c] sm:$0xf] %v3897_v57  ;;  %v3788_v38 = vsel %vm3783_vm6, %v7127_v12, %v3787_v49  ;;  %3797 = vst [vmem:[#allocation4 + $0xf8] sm:$0xf] %v3789_v51  ;;  %v3813_v48 = vpop.permute.xlu0 %3812  ;;  %v3705_v45 = vpop.permute.xlu1 %3704  ;;  %5122 = vmatprep.subr.bf16.mxu0 %v5458_v3  ;;  %5162 = vmatpush1.bf16.msra.mxu1 %v5722_v31  ;;  %v7719_v22 = vrot.slane %v7174_v59, 4 }
 0x597   : > { %v3817_v20 = vrot.slane %v3813_v48, 4  ;;  %v3709_v35 = vrot.slane %v3705_v45, 4  ;;  %5123 = vmatpush1.bf16.msra.mxu0 %v5457_v4  ;;  %v5450_v9 = vcombine.low %v3860_v6, %v3896_v17  ;;  %v5451_v62 = vcombine.high %v3860_v6, %v3896_v17  ;;  %5163 = vmatprep.subr.bf16.mxu1 %v5827_v2  ;;  %vm7723_vm8 = vmmov %vm7720_vm5 }
 0x598   : > { %5512 = vmatprep.mubr.msk.bf16.mxu1 %vm5034_vm2, %v7089_v1  ;;  %vm7724_vm6 = vmmov %vm7722_vm9 }
 0x599   : > { %v3823_v42 = vsel %vm1281_vm13, %v3816_v16, %v3817_v20  ;;  %v3825_v12 = vsel %vm3819_vm10, %v3813_v48, %v3817_v20  ;;  %v3715_v47 = vsel %vm1281_vm13, %v3708_v23, %v3709_v35  ;;  %v3717_v19 = vsel %vm7717_vm7, %v3705_v45, %v3709_v35  ;;  %5124 = vmatprep.subr.bf16.mxu0 %v5451_v62  ;;  %v5723_v33 = vld [vmem:[#allocation4 + $0x168] ss:$28 sps:$4 sm:$0xff]   ;;  %vm7733_vm7 = vmmov %vm7730_vm12 }
 0x59a   : > { %v3824_v54 = vsel %vm3819_vm10, %v7143_v46, %v3823_v42  ;;  %3833 = vst [vmem:[#allocation4 + $0x114] sm:$0xf] %v3825_v12  ;;  %v3716_v1 = vsel %vm7718_vm1, %v7161_v11, %v3715_v47  ;;  %3725 = vst [vmem:[#allocation4 + $0xc0] sm:$0xf] %v3717_v19  ;;  %v3741_v53 = vpop.permute.xlu0 %3740  ;;  %v3633_v16 = vpop.permute.xlu1 %3632  ;;  %5164 = vmatpush1.bf16.msra.mxu1 %v5723_v33  ;;  %v7725_v45 = vrot.slane %v7204_v5, 4  ;;  %vm7726_vm10 = vcmask 809984  }
 0x59b   : > { %v3745_v6 = vrot.slane %v3741_v53, 4  ;;  %v3637_v26 = vrot.slane %v3633_v16, 4  ;;  %5125 = vmatpush1.bf16.msra.mxu0 %v5450_v9  ;;  %v5443_v15 = vcombine.low %v3788_v38, %v3824_v54  ;;  %v5444_v23 = vcombine.high %v3788_v38, %v3824_v54  ;;  %5165 = vmatprep.subr.bf16.mxu1 %v5827_v2  ;;  %vm7728_vm2 = vmmov %vm7726_vm10 }
 0x59c   : > { %v7727_v35 = vrot.slane %v7221_v61, 4 }
 0x59d   : > { %v3751_v56 = vsel %vm1281_vm13, %v7719_v22, %v3745_v6  ;;  %v3753_v46 = vsel %vm7720_vm5, %v3741_v53, %v3745_v6  ;;  %v3643_v11 = vsel %vm1281_vm13, %v7721_v44, %v3637_v26  ;;  %v3645_v4 = vsel %vm7722_vm9, %v3633_v16, %v3637_v26  ;;  %5126 = vmatprep.subr.bf16.mxu0 %v5444_v23  ;;  %v5724_v3 = vld [vmem:[#allocation4 + $0x130] ss:$28 sps:$4 sm:$0xff]  }
 0x59e   : > { %v3752_v31 = vsel %vm7723_vm8, %v7174_v59, %v3751_v56  ;;  %3761 = vst [vmem:[#allocation4 + $0xdc] sm:$0xf] %v3753_v46  ;;  %v3644_v34 = vsel %vm7724_vm6, %v7191_v10, %v3643_v11  ;;  %3653 = vst [vmem:[#allocation4 + $0x88] sm:$0xf] %v3645_v4  ;;  %v3669_v57 = vpop.permute.xlu0 %3668  ;;  %v3561_v49 = vpop.permute.xlu1 %3560  ;;  %5166 = vmatpush1.bf16.msra.mxu1 %v5724_v3  ;;  %v7729_v16 = vrot.slane %v7234_v29, 4  ;;  %v7731_v26 = vrot.slane %v7236_v36, 4 }
 0x59f   : > { %v3673_v51 = vrot.slane %v3669_v57, 4  ;;  %v3565_v17 = vrot.slane %v3561_v49, 4  ;;  %5127 = vmatpush1.bf16.msra.mxu0 %v5443_v15  ;;  %v5436_v38 = vcombine.low %v3716_v1, %v3752_v31  ;;  %v5437_v48 = vcombine.high %v3716_v1, %v3752_v31  ;;  %5167 = vmatprep.subr.bf16.mxu1 %v5827_v2 }
 0x5a0   : > { %vm7736_vm5 = vcmask 900096   ;;  %vm7738_vm9 = vcmask 138240  }
 0x5a1   : > { %v3679_v20 = vsel %vm1281_vm13, %v7725_v45, %v3673_v51  ;;  %v3681_v59 = vsel %vm7726_vm10, %v3669_v57, %v3673_v51  ;;  %v3571_v10 = vsel %vm1281_vm13, %v7727_v35, %v3565_v17  ;;  %v3573_v9 = vsel %vm3567_vm3, %v3561_v49, %v3565_v17  ;;  %5128 = vmatprep.subr.bf16.mxu0 %v5437_v48  ;;  %v5725_v62 = vld [vmem:[#allocation4 + $0xf8] ss:$28 sps:$4 sm:$0xff]   ;;  %vm7739_vm8 = vmmov %vm7736_vm5 }
 0x5a2   : > { %v3680_v42 = vsel %vm7728_vm2, %v7204_v5, %v3679_v20  ;;  %3689 = vst [vmem:[#allocation4 + $0xa4] sm:$0xf] %v3681_v59  ;;  %v3572_v12 = vsel %vm3567_vm3, %v7221_v61, %v3571_v10  ;;  %3581 = vst [vmem:[#allocation4 + $0x50] sm:$0xf] %v3573_v9  ;;  %v3597_v47 = vpop.permute.xlu0 %3596  ;;  %v3489_v19 = vpop.permute.xlu1 %3488  ;;  %5168 = vmatpush1.bf16.msra.mxu1 %v5725_v62  ;;  %vm7732_vm3 = vcmask 908288   ;;  %v7737_v49 = vrot.slane %v7267_v58, 4 }
 0x5a3   : > { %v3601_v33 = vrot.slane %v3597_v47, 4  ;;  %v3493_v54 = vrot.slane %v3489_v19, 4  ;;  %5129 = vmatpush1.bf16.msra.mxu0 %v5436_v38  ;;  %v5429_v1 = vcombine.low %v3644_v34, %v3680_v42  ;;  %v5430_v53 = vcombine.high %v3644_v34, %v3680_v42  ;;  %5169 = vmatprep.subr.bf16.mxu1 %v5827_v2  ;;  %vm7734_vm1 = vmmov %vm7732_vm3  ;;  %v4522_v62 = vld [vmem:[#allocation4 + $0x304] sm:$0xff] }
 0x5a4   : > { %v7735_v34 = vrot.slane %v7252_v25, 4  ;;  %vm7740_vm6 = vmmov %vm7738_vm9  ;;  %v7741_v42 = vrot.slane %v7280_v32, 4  ;;  %vm7742_vm10 = vcmask 154624   ;;  %vm7744_vm2 = vcmask 146432  }
 0x5a5   : > { %v3607_v6 = vsel %vm1281_vm13, %v7729_v16, %v3601_v33  ;;  %v3609_v5 = vsel %vm7730_vm12, %v3597_v47, %v3601_v33  ;;  %v3499_v61 = vsel %vm1281_vm13, %v7731_v26, %v3493_v54  ;;  %v3501_v15 = vsel %vm7732_vm3, %v3489_v19, %v3493_v54  ;;  %5130 = vmatprep.subr.bf16.mxu0 %v5430_v53  ;;  %v5726_v23 = vld [vmem:[#allocation4 + $0xc0] ss:$28 sps:$4 sm:$0xff]   ;;  %vm7745_vm12 = vmmov %vm7742_vm10 }
 0x5a6   : > { %v3608_v22 = vsel %vm7733_vm7, %v7234_v29, %v3607_v6  ;;  %3617 = vst [vmem:[#allocation4 + $0x6c] sm:$0xf] %v3609_v5  ;;  %v3500_v56 = vsel %vm7734_vm1, %v7236_v36, %v3499_v61  ;;  %3509 = vst [vmem:[#allocation4 + $0x18] sm:$0xf] %v3501_v15  ;;  %v3525_v46 = vpop.permute.xlu0 %3524  ;;  %v4391_v44 = vpop.permute.xlu1 %4390  ;;  %5170 = vmatpush1.bf16.msra.mxu1 %v5726_v23  ;;  %v7747_v15 = vrot.slane %v7298_v30, 4  ;;  %vm7748_vm7 = vcmask 228352  }
 0x5a7   : > { %v3529_v11 = vrot.slane %v3525_v46, 4  ;;  %v4395_v4 = vrot.slane %v4391_v44, 4  ;;  %5131 = vmatpush1.bf16.msra.mxu0 %v5429_v1  ;;  %v5422_v3 = vcombine.low %v3572_v12, %v3608_v22  ;;  %v5423_v31 = vcombine.high %v3572_v12, %v3608_v22  ;;  %5171 = vmatprep.subr.bf16.mxu1 %v5827_v2  ;;  %vm7746_vm3 = vmmov %vm7744_vm2 }
 0x5a8   : > { %vm7750_vm1 = vcmask 220160  }
 0x5a9   : > { %v3535_v57 = vsel %vm1281_vm13, %v7735_v34, %v3529_v11  ;;  %v3537_v29 = vsel %vm7736_vm5, %v3525_v46, %v3529_v11  ;;  %v4400_v36 = vsel %vm1281_vm13, %v7737_v49, %v4395_v4  ;;  %v4402_v51 = vsel %vm7738_vm9, %v4391_v44, %v4395_v4  ;;  %5132 = vmatprep.subr.bf16.mxu0 %v5423_v31  ;;  %v5727_v17 = vld [vmem:[#allocation4 + $0x88] ss:$28 sps:$4 sm:$0xff]   ;;  %vm7751_vm5 = vmmov %vm7748_vm7 }
 0x5aa   : > { %v3536_v38 = vsel %vm7739_vm8, %v7252_v25, %v3535_v57  ;;  %3545 = vst [vmem:[#allocation4 + $0x34] sm:$0xf] %v3537_v29  ;;  %v4401_v48 = vsel %vm7740_vm6, %v7267_v58, %v4400_v36  ;;  %4410 = vst [vmem:[#allocation4 + $0x2f0] sm:$0xf] %v4402_v51  ;;  %v4320_v45 = vpop.permute.xlu0 %4319  ;;  %v4356_v20 = vpop.permute.xlu1 %4355  ;;  %5172 = vmatpush1.bf16.msra.mxu1 %v5727_v17  ;;  %v7743_v58 = vrot.slane %v7282_v28, 4  ;;  %v7753_v49 = vrot.slane %v7316_v55, 4 }
 0x5ab   : > { %v4324_v59 = vrot.slane %v4320_v45, 4  ;;  %v4360_v35 = vrot.slane %v4356_v20, 4  ;;  %5133 = vmatpush1.bf16.msra.mxu0 %v5422_v3  ;;  %v5415_v10 = vcombine.low %v3500_v56, %v3536_v38  ;;  %v5416_v9 = vcombine.high %v3500_v56, %v3536_v38  ;;  %5173 = vmatprep.subr.bf16.mxu1 %v5827_v2  ;;  %vm7752_vm9 = vmmov %vm7750_vm1 }
 0x5ac   : > { %v5507_v6 = vcombine.high %v4401_v48, %v4522_v62  ;;  %v5506_v61 = vcombine.low %v4401_v48, %v4522_v62 }
 0x5ad   : > { %v4330_v25 = vsel %vm1281_vm13, %v7741_v42, %v4324_v59  ;;  %v4332_v12 = vsel %vm7742_vm10, %v4320_v45, %v4324_v59  ;;  %v4365_v47 = vsel %vm1281_vm13, %v7743_v58, %v4360_v35  ;;  %v4367_v19 = vsel %vm7744_vm2, %v4356_v20, %v4360_v35  ;;  %5134 = vmatprep.subr.bf16.mxu0 %v5416_v9  ;;  %v5728_v33 = vld [vmem:[#allocation4 + $0x50] ss:$28 sps:$4 sm:$0xff]  }
 0x5ae   : > { %v4331_v54 = vsel %vm7745_vm12, %v7280_v32, %v4330_v25  ;;  %4340 = vst [vmem:[#allocation4 + $0x2b8] sm:$0xf] %v4332_v12  ;;  %v4366_v1 = vsel %vm7746_vm3, %v7282_v28, %v4365_v47  ;;  %4375 = vst [vmem:[#allocation4 + $0x2d4] sm:$0xf] %v4367_v19  ;;  %v4250_v53 = vpop.permute.xlu0 %4249  ;;  %v4285_v16 = vpop.permute.xlu1 %4284  ;;  %5174 = vmatpush1.bf16.msra.mxu1 %v5728_v33  ;;  %v7749_v28 = vrot.slane %v7300_v37, 4 }
 0x5af   : > { %v4254_v5 = vrot.slane %v4250_v53, 4  ;;  %v4289_v26 = vrot.slane %v4285_v16, 4  ;;  %5135 = vmatpush1.bf16.msra.mxu0 %v5415_v10  ;;  %5175 = vmatprep.subr.bf16.mxu1 %v5827_v2  ;;  %v5500_v31 = vcombine.high %v4331_v54, %v4366_v1  ;;  %v5499_v29 = vcombine.low %v4331_v54, %v4366_v1 }
 0x5b0   : > { %5140 = vmatprep.subr.bf16.mxu0 %v5507_v6 }
 0x5b1   : > { %v4259_v32 = vsel %vm1281_vm13, %v7747_v15, %v4254_v5  ;;  %v4261_v23 = vsel %vm7748_vm7, %v4250_v53, %v4254_v5  ;;  %v4294_v22 = vsel %vm1281_vm13, %v7749_v28, %v4289_v26  ;;  %v4296_v56 = vsel %vm7750_vm1, %v4285_v16, %v4289_v26  ;;  %v5729_v46 = vld [vmem:[#allocation4 + $0x18] ss:$28 sps:$4 sm:$0xff]   ;;  %v5730_v38 = vld [vmem:[#allocation4 + $0x2f0] ss:$28 sps:$4 sm:$0xff]  }
 0x5b2   : > { %v4260_v44 = vsel %vm7751_vm5, %v7298_v30, %v4259_v32  ;;  %4269 = vst [vmem:[#allocation4 + $0x280] sm:$0xf] %v4261_v23  ;;  %v4295_v11 = vsel %vm7752_vm9, %v7300_v37, %v4294_v22  ;;  %4304 = vst [vmem:[#allocation4 + $0x29c] sm:$0xf] %v4296_v56  ;;  %v4178_v4 = vpop.permute.xlu0 %4177  ;;  %v4214_v3 = vpop.permute.xlu1 %4213  ;;  %5176 = vmatpush1.bf16.msra.mxu1 %v5729_v46  ;;  %v7754_v37 = vrot.slane %v7318_v63, 4 }
 0x5b3   : > { %v4182_v34 = vrot.slane %v4178_v4, 4  ;;  %v4218_v57 = vrot.slane %v4214_v3, 4  ;;  %5141 = vmatpush2.bf16.msra.mxu0 %v5506_v61  ;;  %5181 = vmatprep.subr.bf16.mxu1 %v5827_v2  ;;  %v5493_v35 = vcombine.high %v4260_v44, %v4295_v11  ;;  %v5492_v62 = vcombine.low %v4260_v44, %v4295_v11 }
 0x5b4   : > { %5142 = vmatprep.subr.bf16.mxu0 %v5500_v31 }
 0x5b5   : > { %v4188_v30 = vsel %vm1281_vm13, %v7753_v49, %v4182_v34  ;;  %v4190_v36 = vsel %vm4184_vm4, %v4178_v4, %v4182_v34  ;;  %v4224_v51 = vsel %vm1281_vm13, %v7754_v37, %v4218_v57  ;;  %v4226_v17 = vsel %vm4220_vm0, %v4214_v3, %v4218_v57  ;;  %v5731_v12 = vld [vmem:[#allocation4 + $0x2b8] ss:$28 sps:$4 sm:$0xff]  }
 0x5b6   : > { %v4189_v48 = vsel %vm4184_vm4, %v7316_v55, %v4188_v30  ;;  %4198 = vst [vmem:[#allocation4 + $0x248] sm:$0xf] %v4190_v36  ;;  %v4225_v45 = vsel %vm4220_vm0, %v7318_v63, %v4224_v51  ;;  %4234 = vst [vmem:[#allocation4 + $0x264] sm:$0xf] %v4226_v17  ;;  %v4106_v20 = vpop.permute.xlu0 %4105  ;;  %v4142_v59 = vpop.permute.xlu1 %4141  ;;  %5182 = vmatpush2.bf16.msra.mxu1 %v5730_v38  ;;  %vm7755_vm0 = vcmask 310272  }
 0x5b7   : > { %v4110_v10 = vrot.slane %v4106_v20, 4  ;;  %v4146_v9 = vrot.slane %v4142_v59, 4  ;;  %5143 = vmatpush2.bf16.msra.mxu0 %v5499_v29  ;;  %5183 = vmatprep.subr.bf16.mxu1 %v5827_v2  ;;  %vm7756_vm4 = vmmov %vm7755_vm0  ;;  %v5485_v53 = vcombine.low %v4189_v48, %v4225_v45 }
 0x5b8   : > { %5144 = vmatprep.subr.bf16.mxu0 %v5493_v35 }
 0x5b9   : > { %v4116_v55 = vsel %vm1281_vm13, %v4109_v41, %v4110_v10  ;;  %v4118_v42 = vsel %vm4112_vm11, %v4106_v20, %v4110_v10  ;;  %v4152_v63 = vsel %vm1281_vm13, %v4145_v18, %v4146_v9  ;;  %v4154_v25 = vsel %vm7755_vm0, %v4142_v59, %v4146_v9  ;;  %v5732_v6 = vld [vmem:[#allocation4 + $0x280] ss:$28 sps:$4 sm:$0xff]  }
 0x5ba   : > { %v4117_v58 = vsel %vm4112_vm11, %v7334_v14, %v4116_v55  ;;  %4126 = vst [vmem:[#allocation4 + $0x210] sm:$0xf] %v4118_v42  ;;  %v4153_v47 = vsel %vm7756_vm4, %v7336_v24, %v4152_v63  ;;  %4162 = vst [vmem:[#allocation4 + $0x22c] sm:$0xf] %v4154_v25  ;;  %v4036_v19 = vpop.permute.xlu0 %4035  ;;  %v4071_v33 = vpop.permute.xlu1 %4070  ;;  %v5486_v41 = vcombine.high %v4189_v48, %v4225_v45  ;;  %5184 = vmatpush2.bf16.msra.mxu1 %v5731_v12 }
 0x5bb   : > { %v4040_v54 = vrot.slane %v4036_v19, 4  ;;  %v4075_v1 = vrot.slane %v4071_v33, 4  ;;  %5145 = vmatpush2.bf16.msra.mxu0 %v5492_v62  ;;  %5185 = vmatprep.subr.bf16.mxu1 %v5827_v2  ;;  %v5479_v61 = vcombine.high %v4117_v58, %v4153_v47 }
 0x5bc   : > { %5146 = vmatprep.subr.bf16.mxu0 %v5486_v41 }
 0x5bd   : > { %v4045_v14 = vsel %vm1281_vm13, %v4039_v52, %v4040_v54  ;;  %v4047_v18 = vsel %vm1406_vm14, %v4036_v19, %v4040_v54  ;;  %v4080_v24 = vsel %vm1281_vm13, %v4074_v50, %v4075_v1  ;;  %v4082_v16 = vsel %vm1468_vm15, %v4071_v33, %v4075_v1  ;;  %v5733_v15 = vld [vmem:[#allocation4 + $0x248] ss:$28 sps:$4 sm:$0xff]  }
 0x5be   : > { %v4046_v5 = vsel %vm1406_vm14, %v7364_v27, %v4045_v14  ;;  %4055 = vst [vmem:[#allocation4 + $0x1d8] sm:$0xf] %v4047_v18  ;;  %v4081_v26 = vsel %vm1468_vm15, %v7366_v7, %v4080_v24  ;;  %4090 = vst [vmem:[#allocation4 + $0x1f4] sm:$0xf] %v4082_v16  ;;  %5186 = vmatpush2.bf16.msra.mxu1 %v5732_v6  ;;  %v5478_v52 = vcombine.low %v4117_v58, %v4153_v47 }
 0x5bf   : > { %5147 = vmatpush2.bf16.msra.mxu0 %v5485_v53  ;;  %5187 = vmatprep.subr.bf16.mxu1 %v5827_v2  ;;  %v5472_v50 = vcombine.high %v4046_v5, %v4081_v26  ;;  %v5471_v27 = vcombine.low %v4046_v5, %v4081_v26 }
 0x5c0   : > { %5148 = vmatprep.subr.bf16.mxu0 %v5479_v61 }
 0x5c1   : > { %v5734_v32 = vld [vmem:[#allocation4 + $0x210] ss:$28 sps:$4 sm:$0xff]  }
 0x5c2   : > { %5188 = vmatpush2.bf16.msra.mxu1 %v5733_v15 }
 0x5c3   : > { %5149 = vmatpush2.bf16.msra.mxu0 %v5478_v52  ;;  %5189 = vmatprep.subr.bf16.mxu1 %v5827_v2 }
 0x5c4   : > { %5150 = vmatprep.subr.bf16.mxu0 %v5472_v50 }
 0x5c5   : > { %v5735_v7 = vld [vmem:[#allocation4 + $0x1d8] ss:$28 sps:$4 sm:$0xff]  }
 0x5c6   : > { %5190 = vmatpush2.bf16.msra.mxu1 %v5734_v32 }
 0x5c7   : > { %5151 = vmatpush2.bf16.msra.mxu0 %v5471_v27  ;;  %5191 = vmatprep.subr.bf16.mxu1 %v5827_v2 }
 0x5ca   : > { %5153 = vmatmul.mubr.bf16.vlgmr.msra.gmra.mxu0 %v7350_v13  ;;  %5192 = vmatpush2.bf16.msra.mxu1 %v5735_v7 }
 0x5cd   : > { %5194 = vmatmul.mubr.bf16.vlgmr.msra.gmra.mxu1 %v7350_v13 }
 0x64a   : > { %v5072_v23 = vpop.f32.mrf.mxu0 }
 0x64b   : > { %v5201_v3 = vmul.f32 %v5072_v23, %v6877_v8 }
 0x64c   : > { %v5074_v28 = vpop.f32.mrf.mxu0 }
 0x64d   : > { %v5202_v31 = vmul.f32 %v5074_v28, %v6879_v43 }
 0x64e   : > { %v5076_v22 = vpop.f32.mrf.mxu0 }
 0x64f   : > { %v5208_v34 = vadd.f32 %v5202_v31, %v5201_v3 }
 0x650   : > { %v5077_v56 = vpop.f32.mrf.mxu0 }
 0x655   : > { %v5113_v46 = vpop.f32.mrf.mxu1 }
 0x656   : > { %v5203_v2 = vmul.f32 %v5113_v46, %v6884_v40 }
 0x657   : > { %v5115_v44 = vpop.f32.mrf.mxu1 }
 0x658   : > { %v5209_v57 = vadd.f32 %v5208_v34, %v5203_v2  ;;  %v5204_v29 = vmul.f32 %v5115_v44, %v6888_v0 }
 0x659   : > { %v5117_v11 = vpop.f32.mrf.mxu1 }
 0x65a   : > { %v5210_v13 = vadd.f32 %v5209_v57, %v5204_v29 }
 0x65b   : > { %v5118_v4 = vpop.f32.mrf.mxu1 }
 0x68a   : > { %v5154_v49 = vpop.f32.mrf.mxu0 }
 0x68b   : > { %v5205_v30 = vmul.f32 %v5154_v49, %v6894_v21 }
 0x68c   : > { %v5156_v36 = vpop.f32.mrf.mxu0 }
 0x68d   : > { %v5211_v37 = vadd.f32 %v5210_v13, %v5205_v30  ;;  %v5206_v51 = vmul.f32 %v5156_v36, %v6898_v39  ;;  %v5195_v38 = vpop.f32.mrf.mxu1 }
 0x68e   : > { %v5158_v17 = vpop.f32.mrf.mxu0  ;;  %v5207_v45 = vmul.f32 %v5195_v38, %v6896_v60 }
 0x68f   : > { %v5212_v48 = vadd.f32 %v5211_v37, %v5206_v51  ;;  %v5197_v59 = vpop.f32.mrf.mxu1 }
 0x690   : > { %v5159_v20 = vpop.f32.mrf.mxu0 }
 0x691   : > { %v5213_v35 = vadd.f32 %v5212_v48, %v5207_v45  ;;  %v5198_v10 = vpop.f32.mrf.mxu1 }
 0x693   : > { %5214 = vadd.xlane.f32.xlu0 %v5213_v35  ;;  %v5199_v9 = vpop.f32.mrf.mxu1 }
 0x71c   : > { %v5215_v62 = vpop.xlane.xlu0 %5214 }
 0x71d   : > { %v5216_v55 = vmul.f32 0.001953125, %v5215_v62 }
 0x71f   : > { %v5217_v42 = vsub.f32 %v5072_v23, %v5216_v55  ;;  %v5218_v63 = vsub.f32 %v5074_v28, %v5216_v55  ;;  %v5219_v25 = vsub.f32 %v5113_v46, %v5216_v55  ;;  %v5220_v12 = vsub.f32 %v5115_v44, %v5216_v55 }
 0x720   : > { %v5221_v58 = vsub.f32 %v5154_v49, %v5216_v55  ;;  %v5222_v41 = vsub.f32 %v5156_v36, %v5216_v55  ;;  %v5223_v14 = vsub.f32 %v5195_v38, %v5216_v55 }
 0x721   : > { %v5224_v47 = vmul.f32 %v5217_v42, %v6877_v8  ;;  %v5225_v19 = vmul.f32 %v5218_v63, %v6879_v43  ;;  %v5226_v33 = vmul.f32 %v5219_v25, %v6884_v40  ;;  %v5227_v54 = vmul.f32 %v5220_v12, %v6888_v0 }
 0x722   : > { %v5228_v18 = vmul.f32 %v5221_v58, %v6894_v21  ;;  %v5229_v6 = vmul.f32 %v5222_v41, %v6898_v39  ;;  %v5230_v8 = vmul.f32 %v5223_v14, %v6896_v60 }
 0x723   : > { %v5231_v1 = vmul.f32 %v5224_v47, %v5224_v47  ;;  %v5232_v53 = vmul.f32 %v5225_v19, %v5225_v19  ;;  %v5233_v24 = vmul.f32 %v5226_v33, %v5226_v33  ;;  %v5234_v5 = vmul.f32 %v5227_v54, %v5227_v54 }
 0x724   : > { %v5235_v61 = vmul.f32 %v5228_v18, %v5228_v18  ;;  %v5236_v52 = vmul.f32 %v5229_v6, %v5229_v6  ;;  %v5237_v15 = vmul.f32 %v5230_v8, %v5230_v8 }
 0x725   : > { %v5238_v16 = vadd.f32 %v5232_v53, %v5231_v1 }
 0x727   : > { %v5239_v26 = vadd.f32 %v5238_v16, %v5233_v24 }
 0x729   : > { %v5240_v43 = vadd.f32 %v5239_v26, %v5234_v5 }
 0x72b   : > { %v5241_v40 = vadd.f32 %v5240_v43, %v5235_v61 }
 0x72d   : > { %v5242_v50 = vadd.f32 %v5241_v40, %v5236_v52 }
 0x72f   : > { %v5243_v0 = vadd.f32 %v5242_v50, %v5237_v15 }
 0x731   : > { %5244 = vadd.xlane.f32.xlu1 %v5243_v0 }
 0x7ba   : > { %v5245_v27 = vpop.xlane.xlu1 %5244 }
 0x7bb   : > { %v5246_v32 = vmul.f32 0.001953125, %v5245_v27 }
 0x7bd   : > { %v5247_v7 = vadd.f32 1e-05, %v5246_v32 }
 0x7bf   : > { %5738 = vrsqrt.f32 %v5247_v7 }
 0x7cc   : > { %v5739_v21 = vpop.eup %5738 }
 0x7cd   : > { %v5249_v23 = vmul.f32 %v5739_v21, %v5217_v42  ;;  %v5250_v28 = vmul.f32 %v5739_v21, %v5218_v63  ;;  %v5251_v39 = vmul.f32 %v5739_v21, %v5219_v25  ;;  %v5252_v22 = vmul.f32 %v5739_v21, %v5220_v12 }
 0x7ce   : > { %v5253_v56 = vmul.f32 %v5739_v21, %v5221_v58  ;;  %v5254_v46 = vmul.f32 %v5739_v21, %v5222_v41  ;;  %v5255_v60 = vmul.f32 %v5739_v21, %v5223_v14 }
 0x7cf   : > { %vm5256_vm13 = vcmp.gt.f32.partialorder %v5249_v23, 0.0  ;;  %vm5257_vm14 = vcmp.gt.f32.partialorder %v5250_v28, 0.0  ;;  %vm5258_vm15 = vcmp.gt.f32.partialorder %v5251_v39, 0.0  ;;  %vm5259_vm11 = vcmp.gt.f32.partialorder %v5252_v22, 0.0 }
 0x7d0   : > { %vm5260_vm8 = vcmp.gt.f32.partialorder %v5253_v56, 0.0  ;;  %vm5261_vm6 = vcmp.gt.f32.partialorder %v5254_v46, 0.0  ;;  %vm5262_vm10 = vcmp.gt.f32.partialorder %v5255_v60, 0.0  ;;  %v5263_v44 = vmul.f32 0.01, %v5249_v23 }
 0x7d1   : > { %v5264_v11 = vmul.f32 0.01, %v5250_v28  ;;  %v5265_v4 = vmul.f32 0.01, %v5251_v39  ;;  %v5266_v3 = vmul.f32 0.01, %v5252_v22 }
 0x7d2   : > { %v5267_v31 = vmul.f32 0.01, %v5253_v56  ;;  %v5268_v34 = vmul.f32 0.01, %v5254_v46  ;;  %v5269_v2 = vmul.f32 0.01, %v5255_v60  ;;  %v5270_v57 = vsel %vm5256_vm13, %v5249_v23, %v5263_v44 }
 0x7d3   : > { %v5271_v29 = vsel %vm5257_vm14, %v5250_v28, %v5264_v11  ;;  %v5272_v49 = vsel %vm5258_vm15, %v5251_v39, %v5265_v4  ;;  %v5273_v13 = vsel %vm5259_vm11, %v5252_v22, %v5266_v3  ;;  %5277 = vst [vmem:[%s5877_s25] sm:$0xff] %v5270_v57 }
 0x7d4   : > { %v5274_v30 = vsel %vm5260_vm8, %v5253_v56, %v5267_v31  ;;  %v5275_v36 = vsel %vm5261_vm6, %v5254_v46, %v5268_v34  ;;  %v5276_v37 = vsel %vm5262_vm10, %v5255_v60, %v5269_v2  ;;  %5278 = vst [vmem:[%s5877_s25 + $0x8] sm:$0xff] %v5271_v29  ;;  %5279 = vst [vmem:[%s5877_s25 + $0x10] sm:$0xff] %v5272_v49 }
 0x7d5   : > { %5280 = vst [vmem:[%s5877_s25 + $0x18] sm:$0xff] %v5273_v13  ;;  %5281 = vst [vmem:[%s5877_s25 + $0x20] sm:$0xff] %v5274_v30 }
 0x7d6   : > { %5282 = vst [vmem:[%s5877_s25 + $0x28] sm:$0xff] %v5275_v36  ;;  %5283 = vst [vmem:[%s5877_s25 + $0x30] sm:$0xff] %v5276_v37 }
 0x7d7 PF: > { %s14_s15 = sadd.s32 1, %s5747_s15  }
 0x7d8   : > { %p11_p5 = scmp.ge.s32.totalorder %s14_s15, 4  }
 0x7da   :  { %13 = sbr.rel (!%p11_p5) target bundleno = 1 (0x1), region = 70 }

</bundles_post_ra>
